<compile_context>
chip_gen: v7x
topology: tpu7x:2x2x1
jax: 0.10.0
libtpu: 0.0.40
codegen_flags: <defaults>
</compile_context>

<pallas_src>
import jax
import jax.numpy as jnp
from jax.experimental import pallas as pl
from jax.experimental.pallas import tpu as pltpu

class_num = 10
generator_layer_size = [256, 512, 1024]
img_size = 28
z_size = 100

H1, H2, H3 = generator_layer_size
OUT_FEATS = img_size * img_size                     # 784
OUT_FEATS_PAD = ((OUT_FEATS + 127) // 128) * 128    # 896 (7 * 128), lane-dense
K1 = z_size + class_num                             # 110
K1_PAD = 128                                        # fused layer-1 contraction


def _round_up(x, m):
    return (x + m - 1) // m * m


def _default_act_dtype():
    # v6e/v7x have bf16 VPU/EUP -> LeakyReLU/tanh in bf16 (2x elems per vreg).
    # v5e has no bf16 elementwise datapath -> keep activation math in f32.
    try:
        kind = jax.devices()[0].device_kind.lower()
    except Exception:
        return jnp.bfloat16
    return jnp.float32 if "v5" in kind else jnp.bfloat16


def _make_generator_kernel(act_dtype):
    def kernel(x_ref, w1_ref, w2_ref, b2_ref, w3_ref, b3_ref, w4_ref, b4_ref,
               o_ref):
        """One batch tile: 4 MXU matmuls (bf16 in, f32 acc) + LeakyReLU + tanh."""
        def lrelu(acc):
            x = acc.astype(act_dtype)
            return jnp.maximum(x, 0.2 * x).astype(jnp.bfloat16)

        # Layer 1: bias + embedding already folded into w1 (one-hot rows).
        h = lrelu(jnp.dot(x_ref[...], w1_ref[...],
                          preferred_element_type=jnp.float32))          # (tb, 256)
        h = lrelu(jnp.dot(h, w2_ref[...],
                          preferred_element_type=jnp.float32) + b2_ref[...])  # 512
        h = lrelu(jnp.dot(h, w3_ref[...],
                          preferred_element_type=jnp.float32) + b3_ref[...])  # 1024
        h = jnp.dot(h, w4_ref[...],
                    preferred_element_type=jnp.float32) + b4_ref[...]   # (tb, 896)
        o_ref[...] = jnp.tanh(h.astype(act_dtype)).astype(o_ref.dtype)
    return kernel


def init_params(key):
    """PyTorch-default-like init (U(+-1/sqrt(fan_in)); Embedding ~ N(0,1)).
    Linear weights stored as (in_features, out_features)."""
    dims = [z_size + class_num] + generator_layer_size + [OUT_FEATS]
    params = {}
    k_emb, *keys = jax.random.split(key, 1 + 2 * (len(dims) - 1))
    params["emb"] = jax.random.normal(k_emb, (class_num, class_num), jnp.float32)
    for i in range(len(dims) - 1):
        fan_in, fan_out = dims[i], dims[i + 1]
        bound = 1.0 / (fan_in ** 0.5)
        params[f"w{i+1}"] = jax.random.uniform(
            keys[2 * i], (fan_in, fan_out), jnp.float32, -bound, bound)
        params[f"b{i+1}"] = jax.random.uniform(
            keys[2 * i + 1], (1, fan_out), jnp.float32, -bound, bound)
    return params


def prepare_generator_params(params):
    """One-time conversion of canonical f32 params into kernel-ready operands.

    Layer-1 fusion: since the one-hot row sums to 1,
      [z | onehot] @ [w1[:100] ; emb@w1[100:110] + b1] == (concat(z, emb[lbl]) @ w1 + b1)
    so embedding, concat AND layer-1 bias collapse into one K=128 bf16 matmul.
    Output layer is zero-padded 784 -> 896 for lane-dense stores.
    """
    cls_rows = params["emb"] @ params["w1"][z_size:, :] + params["b1"]  # (10, 256)
    w1_fused = jnp.concatenate([
        params["w1"][:z_size, :],                                       # (100, 256)
        cls_rows,                                                       # (10, 256)
        jnp.zeros((K1_PAD - K1, H1), jnp.float32),                      # (18, 256)
    ], axis=0).astype(jnp.bfloat16)                                     # (128, 256)
    pad = OUT_FEATS_PAD - OUT_FEATS
    return {
        "w1": w1_fused,
        "w2": params["w2"].astype(jnp.bfloat16), "b2": params["b2"],
        "w3": params["w3"].astype(jnp.bfloat16), "b3": params["b3"],
        "w4": jnp.pad(params["w4"], ((0, 0), (0, pad))).astype(jnp.bfloat16),
        "b4": jnp.pad(params["b4"], ((0, 0), (0, pad))),
    }


def generator_forward(gp, z, labels, *, block_b=1024, act_dtype=None):
    if act_dtype is None:
        act_dtype = _default_act_dtype()

    z = z.reshape(-1, z_size)
    B = z.shape[0]

    # Batch tile: multiple of 16 (bf16 sublane packing); aim for >=2 grid steps
    # when the batch allows so v7x can shard tiles across its 2 TensorCores.
    # 1024-row tiles amortize the ~0.35 us per-grid-step overhead and fit VMEM
    # on every generation (v7x 64 MiB included).
    tb = min(block_b, max(16, _round_up(pl.cdiv(B, 2), 16)))
    b_pad = _round_up(B, tb)
    grid = (b_pad // tb,)

    # Fused layer-1 input: [z | one-hot(label) | 0] in bf16, 128 lanes.
    onehot = jax.nn.one_hot(labels, class_num, dtype=jnp.bfloat16)
    x = jnp.concatenate(
        [z.astype(jnp.bfloat16), onehot,
         jnp.zeros((B, K1_PAD - K1), jnp.bfloat16)], axis=1)
    x = jnp.pad(x, ((0, b_pad - B), (0, 0)))

    def resident(shape):
        # Same block every grid step -> stays VMEM-resident (no re-DMA).
        return pl.BlockSpec(shape, lambda i: (0, 0))
    # TODO(synk): single-buffer the resident weight specs (pipeline_mode) once
    # that path is robust for top-level pallas_call inputs; VMEM headroom is
    # already ample (~10 MB live at tb=1024) so it is only hygiene here.

    flops = 2 * b_pad * (K1_PAD * H1 + H1 * H2 + H2 * H3 + H3 * OUT_FEATS_PAD)
    bytes_accessed = (
        b_pad * K1_PAD * 2                                                # x (bf16)
        + (K1_PAD * H1 + H1 * H2 + H2 * H3 + H3 * OUT_FEATS_PAD) * 2      # bf16 weights
        + (H2 + H3 + OUT_FEATS_PAD) * 4                                   # f32 biases
        + b_pad * OUT_FEATS_PAD * 2)                                      # bf16 output

    out = pl.pallas_call(
        _make_generator_kernel(act_dtype),
        out_shape=jax.ShapeDtypeStruct((b_pad, OUT_FEATS_PAD), jnp.bfloat16),
        grid=grid,
        in_specs=[
            pl.BlockSpec((tb, K1_PAD), lambda i: (i, 0)),   # x tile (pipelined)
            resident((K1_PAD, H1)),                         # fused W1 (incl. emb, b1)
            resident((H1, H2)), resident((1, H2)),
            resident((H2, H3)), resident((1, H3)),
            resident((H3, OUT_FEATS_PAD)), resident((1, OUT_FEATS_PAD)),
        ],
        out_specs=pl.BlockSpec((tb, OUT_FEATS_PAD), lambda i: (i, 0)),
        compiler_params=pltpu.CompilerParams(
            dimension_semantics=("parallel",),              # shards tiles across 2 TCs on v7x
            vmem_limit_bytes=48 * 1024 * 1024),
        cost_estimate=pl.CostEstimate(
            flops=flops,
            transcendentals=b_pad * OUT_FEATS_PAD,
            bytes_accessed=bytes_accessed),
    )(x, gp["w1"], gp["w2"], gp["b2"], gp["w3"], gp["b3"], gp["w4"], gp["b4"])

    # NOTE: output is bf16 (halves HBM write + post-kernel slice traffic).
    return out[:B, :OUT_FEATS].reshape(B, img_size, img_size)


def _reference_forward(params, z, labels):
    """Pure-JAX f32 reference matching the PyTorch module."""
    z = z.reshape(-1, z_size).astype(jnp.float32)
    c = params["emb"][labels]
    h = jnp.concatenate([z, c], axis=1)

    def lrelu(x):
        return jnp.where(x > 0, x, 0.2 * x)

    h = lrelu(h @ params["w1"] + params["b1"])
    h = lrelu(h @ params["w2"] + params["b2"])
    h = lrelu(h @ params["w3"] + params["b3"])
    h = jnp.tanh(h @ params["w4"] + params["b4"])
    return h.reshape(-1, img_size, img_size)


if __name__ == "__main__":
    key = jax.random.PRNGKey(0)
    k_param, k_z, k_lbl = jax.random.split(key, 3)

    params = init_params(k_param)
    gp = prepare_generator_params(params)

    B = 8
    z = jax.random.normal(k_z, (B, z_size), jnp.float32)
    labels = jax.random.randint(k_lbl, (B,), 0, class_num, jnp.int32)

    fwd = jax.jit(generator_forward)
    out = jax.block_until_ready(fwd(gp, z, labels))

    ref = _reference_forward(params, z, labels)
    assert out.shape == (B, img_size, img_size)
    # bf16 weights/activations/output vs f32 reference: loosened tolerance
    # (tanh output in [-1, 1]).
    max_err = float(jnp.max(jnp.abs(out.astype(jnp.float32) - ref)))
    assert jnp.allclose(out.astype(jnp.float32), ref, atol=3e-2, rtol=3e-2), \
        f"max abs err {max_err}"

    print("KERNEL_OK")
</pallas_src>

<mosaic_0001>
module attributes {stable_mosaic.version = 11 : i64} {
  func.func @kernel(%arg0: i32, %arg1: memref<16x128xbf16, #tpu.memory_space<vmem>>, %arg2: memref<128x256xbf16, #tpu.memory_space<vmem>>, %arg3: memref<256x512xbf16, #tpu.memory_space<vmem>>, %arg4: memref<1x512xf32, #tpu.memory_space<vmem>>, %arg5: memref<512x1024xbf16, #tpu.memory_space<vmem>>, %arg6: memref<1x1024xf32, #tpu.memory_space<vmem>>, %arg7: memref<1024x896xbf16, #tpu.memory_space<vmem>>, %arg8: memref<1x896xf32, #tpu.memory_space<vmem>>, %arg9: memref<16x896xbf16, #tpu.memory_space<vmem>>) attributes {dimension_semantics = [#tpu.dimension_semantics<parallel>], iteration_bounds = array<i64: 1>, scalar_prefetch = 0 : i64, scratch_operands = 0 : i64, tpu.core_type = #tpu.core_type<tc>, window_params = [{transform_indices = @transform_0, window_bounds = array<i64: 16, 128>}, {pipeline_mode = #tpu.pipeline_mode<synchronous>, transform_indices = @transform_1, window_bounds = array<i64: 128, 256>}, {pipeline_mode = #tpu.pipeline_mode<synchronous>, transform_indices = @transform_2, window_bounds = array<i64: 256, 512>}, {pipeline_mode = #tpu.pipeline_mode<synchronous>, transform_indices = @transform_3, window_bounds = array<i64: 1, 512>}, {pipeline_mode = #tpu.pipeline_mode<synchronous>, transform_indices = @transform_4, window_bounds = array<i64: 512, 1024>}, {pipeline_mode = #tpu.pipeline_mode<synchronous>, transform_indices = @transform_5, window_bounds = array<i64: 1, 1024>}, {pipeline_mode = #tpu.pipeline_mode<synchronous>, transform_indices = @transform_6, window_bounds = array<i64: 1024, 896>}, {pipeline_mode = #tpu.pipeline_mode<synchronous>, transform_indices = @transform_7, window_bounds = array<i64: 1, 896>}, {transform_indices = @transform_8, window_bounds = array<i64: 16, 896>}]} {
    %c0 = arith.constant 0 : index
    %c0_0 = arith.constant 0 : index
    %0 = vector.load %arg1[%c0, %c0_0] : memref<16x128xbf16, #tpu.memory_space<vmem>>, vector<16x128xbf16>
    %c0_1 = arith.constant 0 : index
    %c0_2 = arith.constant 0 : index
    %1 = vector.load %arg2[%c0_1, %c0_2] : memref<128x256xbf16, #tpu.memory_space<vmem>>, vector<128x256xbf16>
    %cst = arith.constant dense<0.000000e+00> : vector<16x256xf32>
    %2 = tpu.matmul %0, %1, %cst {dimension_numbers = #tpu.dot_dimension_numbers<[1], [0], [0], [1], [0, 0, 1, 1], [], []>} : vector<16x128xbf16>, vector<128x256xbf16>, vector<16x256xf32> -> vector<16x256xf32>
    %3 = arith.truncf %2 : vector<16x256xf32> to vector<16x256xbf16>
    %cst_3 = arith.constant 2.001950e-01 : bf16
    %4 = vector.broadcast %cst_3 : bf16 to vector<16x256xbf16>
    %5 = arith.mulf %4, %3 : vector<16x256xbf16>
    %6 = arith.maximumf %3, %5 : vector<16x256xbf16>
    %c0_4 = arith.constant 0 : index
    %c0_5 = arith.constant 0 : index
    %7 = vector.load %arg3[%c0_4, %c0_5] : memref<256x512xbf16, #tpu.memory_space<vmem>>, vector<256x512xbf16>
    %cst_6 = arith.constant dense<0.000000e+00> : vector<16x512xf32>
    %8 = tpu.matmul %6, %7, %cst_6 {dimension_numbers = #tpu.dot_dimension_numbers<[1], [0], [0], [1], [0, 0, 1, 1], [], []>} : vector<16x256xbf16>, vector<256x512xbf16>, vector<16x512xf32> -> vector<16x512xf32>
    %c0_7 = arith.constant 0 : index
    %c0_8 = arith.constant 0 : index
    %9 = vector.load %arg4[%c0_7, %c0_8] : memref<1x512xf32, #tpu.memory_space<vmem>>, vector<1x512xf32>
    %10 = vector.broadcast %9 : vector<1x512xf32> to vector<16x512xf32>
    %11 = arith.addf %8, %10 : vector<16x512xf32>
    %12 = arith.truncf %11 : vector<16x512xf32> to vector<16x512xbf16>
    %cst_9 = arith.constant 2.001950e-01 : bf16
    %13 = vector.broadcast %cst_9 : bf16 to vector<16x512xbf16>
    %14 = arith.mulf %13, %12 : vector<16x512xbf16>
    %15 = arith.maximumf %12, %14 : vector<16x512xbf16>
    %c0_10 = arith.constant 0 : index
    %c0_11 = arith.constant 0 : index
    %16 = vector.load %arg5[%c0_10, %c0_11] : memref<512x1024xbf16, #tpu.memory_space<vmem>>, vector<512x1024xbf16>
    %cst_12 = arith.constant dense<0.000000e+00> : vector<16x1024xf32>
    %17 = tpu.matmul %15, %16, %cst_12 {dimension_numbers = #tpu.dot_dimension_numbers<[1], [0], [0], [1], [0, 0, 1, 1], [], []>} : vector<16x512xbf16>, vector<512x1024xbf16>, vector<16x1024xf32> -> vector<16x1024xf32>
    %c0_13 = arith.constant 0 : index
    %c0_14 = arith.constant 0 : index
    %18 = vector.load %arg6[%c0_13, %c0_14] : memref<1x1024xf32, #tpu.memory_space<vmem>>, vector<1x1024xf32>
    %19 = vector.broadcast %18 : vector<1x1024xf32> to vector<16x1024xf32>
    %20 = arith.addf %17, %19 : vector<16x1024xf32>
    %21 = arith.truncf %20 : vector<16x1024xf32> to vector<16x1024xbf16>
    %cst_15 = arith.constant 2.001950e-01 : bf16
    %22 = vector.broadcast %cst_15 : bf16 to vector<16x1024xbf16>
    %23 = arith.mulf %22, %21 : vector<16x1024xbf16>
    %24 = arith.maximumf %21, %23 : vector<16x1024xbf16>
    %c0_16 = arith.constant 0 : index
    %c0_17 = arith.constant 0 : index
    %25 = vector.load %arg7[%c0_16, %c0_17] : memref<1024x896xbf16, #tpu.memory_space<vmem>>, vector<1024x896xbf16>
    %cst_18 = arith.constant dense<0.000000e+00> : vector<16x896xf32>
    %26 = tpu.matmul %24, %25, %cst_18 {dimension_numbers = #tpu.dot_dimension_numbers<[1], [0], [0], [1], [0, 0, 1, 1], [], []>} : vector<16x1024xbf16>, vector<1024x896xbf16>, vector<16x896xf32> -> vector<16x896xf32>
    %c0_19 = arith.constant 0 : index
    %c0_20 = arith.constant 0 : index
    %27 = vector.load %arg8[%c0_19, %c0_20] : memref<1x896xf32, #tpu.memory_space<vmem>>, vector<1x896xf32>
    %28 = vector.broadcast %27 : vector<1x896xf32> to vector<16x896xf32>
    %29 = arith.addf %26, %28 : vector<16x896xf32>
    %30 = arith.truncf %29 : vector<16x896xf32> to vector<16x896xbf16>
    %31 = math.tanh %30 : vector<16x896xbf16>
    %c0_21 = arith.constant 0 : index
    %c0_22 = arith.constant 0 : index
    %32 = vector.load %arg9[%c0_21, %c0_22] : memref<16x896xbf16, #tpu.memory_space<vmem>>, vector<16x896xbf16>
    tpu.vector_store %arg9[%c0_21, %c0_22], %31 {strides = array<i32>} : memref<16x896xbf16, #tpu.memory_space<vmem>>, vector<16x896xbf16>,
    return
  }
  func.func @transform_0(%arg0: i32) -> (i32, i32) {
    %c0_i32 = arith.constant 0 : i32
    %c0_i32_0 = arith.constant 0 : i32
    return %arg0, %c0_i32 : i32, i32
  }
  func.func @transform_1(%arg0: i32) -> (i32, i32) {
    %c0_i32 = arith.constant 0 : i32
    %c0_i32_0 = arith.constant 0 : i32
    %c0_i32_1 = arith.constant 0 : i32
    return %c0_i32, %c0_i32_0 : i32, i32
  }
  func.func @transform_2(%arg0: i32) -> (i32, i32) {
    %c0_i32 = arith.constant 0 : i32
    %c0_i32_0 = arith.constant 0 : i32
    %c0_i32_1 = arith.constant 0 : i32
    return %c0_i32, %c0_i32_0 : i32, i32
  }
  func.func @transform_3(%arg0: i32) -> (i32, i32) {
    %c0_i32 = arith.constant 0 : i32
    %c0_i32_0 = arith.constant 0 : i32
    %c0_i32_1 = arith.constant 0 : i32
    return %c0_i32, %c0_i32_0 : i32, i32
  }
  func.func @transform_4(%arg0: i32) -> (i32, i32) {
    %c0_i32 = arith.constant 0 : i32
    %c0_i32_0 = arith.constant 0 : i32
    %c0_i32_1 = arith.constant 0 : i32
    return %c0_i32, %c0_i32_0 : i32, i32
  }
  func.func @transform_5(%arg0: i32) -> (i32, i32) {
    %c0_i32 = arith.constant 0 : i32
    %c0_i32_0 = arith.constant 0 : i32
    %c0_i32_1 = arith.constant 0 : i32
    return %c0_i32, %c0_i32_0 : i32, i32
  }
  func.func @transform_6(%arg0: i32) -> (i32, i32) {
    %c0_i32 = arith.constant 0 : i32
    %c0_i32_0 = arith.constant 0 : i32
    %c0_i32_1 = arith.constant 0 : i32
    return %c0_i32, %c0_i32_0 : i32, i32
  }
  func.func @transform_7(%arg0: i32) -> (i32, i32) {
    %c0_i32 = arith.constant 0 : i32
    %c0_i32_0 = arith.constant 0 : i32
    %c0_i32_1 = arith.constant 0 : i32
    return %c0_i32, %c0_i32_0 : i32, i32
  }
  func.func @transform_8(%arg0: i32) -> (i32, i32) {
    %c0_i32 = arith.constant 0 : i32
    %c0_i32_0 = arith.constant 0 : i32
    return %arg0, %c0_i32 : i32, i32
  }
}

</mosaic_0001>

<bundles_post_ra>
// kernel: generator_forward.1
= control target key start
LH: loop header
LB: loop body
LE: loop exit
PB: predicated region body
PF: predicated region fallthrough
CT: control target
= control target key end

     0   :  { %13 = vsyncpa [#allocation3], 0  ;;  %s8582_s0 = inlined_call_operand.vmem [shape: bf16[16,128], index: 0, kind: input, shape index: {}]   ;;  %s8583_s1 = inlined_call_operand.hbm [shape: bf16[128,256], index: 1, kind: input, shape index: {}]   ;;  %s8584_s2 = inlined_call_operand.hbm [shape: bf16[256,512], index: 2, kind: input, shape index: {}]   ;;  %s8585_s3 = inlined_call_operand.hbm [shape: f32[1,512], index: 3, kind: input, shape index: {}]   ;;  %s8586_s4 = inlined_call_operand.hbm [shape: bf16[512,1024], index: 4, kind: input, shape index: {}]   ;;  %s8587_s5 = inlined_call_operand.hbm [shape: f32[1,1024], index: 5, kind: input, shape index: {}]   ;;  %s8588_s6 = inlined_call_operand.hbm [shape: bf16[1024,896], index: 6, kind: input, shape index: {}]   ;;  %s8589_s7 = inlined_call_operand.hbm [shape: f32[1,896], index: 7, kind: input, shape index: {}]   ;;  %s8590_s8 = inlined_call_operand.vmem [shape: bf16[16,896], index: 8, kind: output, shape index: {}]  }
   0x1   :  { %14 = vsyncpa [#allocation5], 0 }
   0x2   :  { %15 = vsyncpa [#allocation8], 0 }
   0x3   :  { %16 = vsyncpa [#allocation11], 0  ;;  %s8237_s27 = smov [#allocation4]   ;;  %s8075_s9 = scalar_lea.hbm %s8584_s2, 8192 }
   0x4   :  { %s36_s28 = sshll.u32 %s8237_s27, 4  ;;  %p8076_p0 = scmp.ne.s32.totalorder %s8584_s2, %s8075_s9  ;;  %s37_s28 = int_to_ptr.vmem [resolvable:$true] %s36_s28 }
   0x5   :  { %p8079_p1 = scmp.lt.u32.totalorder %s8075_s9, %s8584_s2 }
   0x7   :  { %p8081_p2 = pnand %p8079_p1, %p8076_p0 }
   0x9   :  { %8084 = shalt.err (!%p8081_p2)
}
   0xa   :  { %s8085_s14 = scalar_lea.vmem %s37_s28, 8192  ;;  %p8090_p4 = scmp.lt.s32.totalorder %s37_s28, %s37_s28 }
   0xb   :  { %p8086_p3 = scmp.ne.s32.totalorder %s37_s28, %s8085_s14  ;;  %p8091_p5 = scmp.lt.s32.totalorder %s8085_s14, %s8085_s14 }
   0xd   :  { %p8092_p6 = por %p8091_p5, %p8090_p4 }
   0xf   :  { %p8093_p7 = pnand %p8092_p6, %p8086_p3 }
  0x11   :  { %8096 = shalt.err (!%p8093_p7)
}
  0x12   :  { %s8238_s15 = smov 256   ;;  %s8239_s16 = smov 16  }
  0x13   :  { %42 = dma.hbm_to_vmem [thread:$0]  %s8584_s2, 8192, %s37_s28, [#allocation5], %s8238_s15, %s8238_s15, %s8239_s16  }
  0x14   :  { %s8240_s19 = smov [#allocation7]   ;;  %s8097_s23 = scalar_lea.hbm %s8586_s4, 32768 }
  0x15   :  { %s58_s20 = sshll.u32 %s8240_s19, 4  ;;  %p8098_p8 = scmp.ne.s32.totalorder %s8586_s4, %s8097_s23  ;;  %s59_s20 = int_to_ptr.vmem [resolvable:$true] %s58_s20 }
  0x16   :  { %p8101_p9 = scmp.lt.u32.totalorder %s8097_s23, %s8586_s4 }
  0x18   :  { %p8103_p10 = pnand %p8101_p9, %p8098_p8 }
  0x1a   :  { %8106 = shalt.err (!%p8103_p10)
}
  0x1b   :  { %s8107_s29 = scalar_lea.vmem %s59_s20, 32768  ;;  %p8112_p12 = scmp.lt.s32.totalorder %s59_s20, %s59_s20 }
  0x1c   :  { %p8108_p11 = scmp.ne.s32.totalorder %s59_s20, %s8107_s29  ;;  %p8113_p13 = scmp.lt.s32.totalorder %s8107_s29, %s8107_s29 }
  0x1e   :  { %p8114_p0 = por %p8113_p13, %p8112_p12 }
  0x20   :  { %p8115_p1 = pnand %p8114_p0, %p8108_p11 }
  0x22   :  { %8118 = shalt.err (!%p8115_p1)
}
  0x23   :  { %s8241_s2 = smov 512   ;;  %s8242_s28 = smov 32  }
  0x24   :  { %64 = dma.hbm_to_vmem [thread:$0]  %s8586_s4, 32768, %s59_s20, [#allocation8], %s8241_s2, %s8241_s2, %s8242_s28  }
  0x25   :  { %s8243_s10 = smov [#allocation10]   ;;  %s8119_s14 = scalar_lea.hbm %s8588_s6, 57344 }
  0x26   :  { %s80_s11 = sshll.u32 %s8243_s10, 4  ;;  %p8120_p2 = scmp.ne.s32.totalorder %s8588_s6, %s8119_s14  ;;  %s81_s11 = int_to_ptr.vmem [resolvable:$true] %s80_s11 }
  0x27   :  { %p8123_p3 = scmp.lt.u32.totalorder %s8119_s14, %s8588_s6 }
  0x29   :  { %p8125_p4 = pnand %p8123_p3, %p8120_p2 }
  0x2b   :  { %8128 = shalt.err (!%p8125_p4)
}
  0x2c   :  { %s8129_s19 = scalar_lea.vmem %s81_s11, 57344  ;;  %p8134_p6 = scmp.lt.s32.totalorder %s81_s11, %s81_s11 }
  0x2d   :  { %p8130_p5 = scmp.ne.s32.totalorder %s81_s11, %s8129_s19  ;;  %p8135_p7 = scmp.lt.s32.totalorder %s8129_s19, %s8129_s19 }
  0x2f   :  { %p8136_p8 = por %p8135_p7, %p8134_p6 }
  0x31   :  { %p8137_p9 = pnand %p8136_p8, %p8130_p5 }
  0x33   :  { %8140 = shalt.err (!%p8137_p9)
}
  0x34   :  { %s8244_s4 = smov 448   ;;  %s8245_s20 = smov 28  }
  0x35   :  { %86 = dma.hbm_to_vmem [thread:$0]  %s8588_s6, 57344, %s81_s11, [#allocation11], %s8244_s4, %s8244_s4, %s8245_s20  }
  0x36   :  { %s8246_s23 = smov [#allocation2]   ;;  %s8141_s27 = scalar_lea.hbm %s8583_s1, 2048 }
  0x37   :  { %s24_s24 = sshll.u32 %s8246_s23, 4  ;;  %p8142_p10 = scmp.ne.s32.totalorder %s8583_s1, %s8141_s27  ;;  %s25_s24 = int_to_ptr.vmem [resolvable:$true] %s24_s24 }
  0x38   :  { %p8145_p11 = scmp.lt.u32.totalorder %s8141_s27, %s8583_s1 }
  0x3a   :  { %p8147_p12 = pnand %p8145_p11, %p8142_p10 }
  0x3c   :  { %8150 = shalt.err (!%p8147_p12)
}
  0x3d   :  { %s8151_s9 = scalar_lea.vmem %s25_s24, 2048  ;;  %p8156_p0 = scmp.lt.s32.totalorder %s25_s24, %s25_s24 }
  0x3e   :  { %p8152_p13 = scmp.ne.s32.totalorder %s25_s24, %s8151_s9  ;;  %p8157_p1 = scmp.lt.s32.totalorder %s8151_s9, %s8151_s9 }
  0x40   :  { %p8158_p2 = por %p8157_p1, %p8156_p0 }
  0x42   :  { %p8159_p3 = pnand %p8158_p2, %p8152_p13 }
  0x44   :  { %8162 = shalt.err (!%p8159_p3)
}
  0x45   :  { %s8247_s6 = smov 128   ;;  %s8248_s10 = smov 8  }
  0x46   :  { %30 = dma.hbm_to_vmem [thread:$0]  %s8583_s1, 2048, %s25_s24, [#allocation3], %s8247_s6, %s8247_s6, %s8248_s10  }
  0x47   :  { %s8249_s13 = smov [#allocation6]   ;;  %s8250_s15 = smov [#allocation9]  }
  0x48   :  { %s49_s14 = sshll.u32 %s8249_s13, 4  ;;  %s71_s16 = sshll.u32 %s8250_s15, 4  ;;  %s50_s14 = int_to_ptr.vmem [resolvable:$true] %s49_s14  ;;  %s72_s16 = int_to_ptr.vmem [resolvable:$true] %s71_s16 }
  0x49   :  { %s8163_s19 = scalar_lea.hbm %s8585_s3, 64 }
  0x4a   :  { %p8164_p4 = scmp.ne.s32.totalorder %s8585_s3, %s8163_s19  ;;  %p8167_p5 = scmp.lt.u32.totalorder %s8163_s19, %s8585_s3 }
  0x4c   :  { %p8169_p6 = pnand %p8167_p5, %p8164_p4 }
  0x4e   :  { %8172 = shalt.err (!%p8169_p6)
}
  0x4f   :  { %s8173_s1 = scalar_lea.vmem %s50_s14, 64  ;;  %p8178_p8 = scmp.lt.s32.totalorder %s50_s14, %s50_s14 }
  0x50   :  { %p8174_p7 = scmp.ne.s32.totalorder %s50_s14, %s8173_s1  ;;  %p8179_p9 = scmp.lt.s32.totalorder %s8173_s1, %s8173_s1 }
  0x52   :  { %p8180_p10 = por %p8179_p9, %p8178_p8 }
  0x54   :  { %p8181_p11 = pnand %p8180_p10, %p8174_p7 }
  0x56   :  { %8184 = shalt.err (!%p8181_p11)
}
  0x57   :  { %52 = dma.hbm_to_vmem [thread:$0]  %s8585_s3, 64, %s50_s14, [#allocation5]  }
  0x58   :  { %s8185_s27 = scalar_lea.hbm %s8587_s5, 128 }
  0x59   :  { %p8186_p12 = scmp.ne.s32.totalorder %s8587_s5, %s8185_s27  ;;  %p8189_p13 = scmp.lt.u32.totalorder %s8185_s27, %s8587_s5 }
  0x5b   :  { %p8191_p0 = pnand %p8189_p13, %p8186_p12 }
  0x5d   :  { %8194 = shalt.err (!%p8191_p0)
}
  0x5e   :  { %s8195_s9 = scalar_lea.vmem %s72_s16, 128  ;;  %p8200_p2 = scmp.lt.s32.totalorder %s72_s16, %s72_s16 }
  0x5f   :  { %p8196_p1 = scmp.ne.s32.totalorder %s72_s16, %s8195_s9  ;;  %p8201_p3 = scmp.lt.s32.totalorder %s8195_s9, %s8195_s9 }
  0x61   :  { %p8202_p4 = por %p8201_p3, %p8200_p2 }
  0x63   :  { %p8203_p5 = pnand %p8202_p4, %p8196_p1 }
  0x65   :  { %8206 = shalt.err (!%p8203_p5)
}
  0x66   :  { %74 = dma.hbm_to_vmem [thread:$0]  %s8587_s5, 128, %s72_s16, [#allocation8]  }
  0x67   :  { %s8251_s10 = smov [#allocation12]   ;;  %s8207_s14 = scalar_lea.hbm %s8589_s7, 112 }
  0x68   :  { %s93_s11 = sshll.u32 %s8251_s10, 4  ;;  %p8208_p6 = scmp.ne.s32.totalorder %s8589_s7, %s8207_s14  ;;  %s94_s11 = int_to_ptr.vmem [resolvable:$true] %s93_s11 }
  0x69   :  { %p8211_p7 = scmp.lt.u32.totalorder %s8207_s14, %s8589_s7 }
  0x6b   :  { %p8213_p8 = pnand %p8211_p7, %p8208_p6 }
  0x6d   :  { %8216 = shalt.err (!%p8213_p8)
}
  0x6e   :  { %s8217_s4 = scalar_lea.vmem %s94_s11, 112  ;;  %s8221_s5 = scalar_lea.vmem %s94_s11, 128 }
  0x6f   :  { %p8218_p9 = scmp.ne.s32.totalorder %s94_s11, %s8217_s4  ;;  %p8222_p10 = scmp.lt.s32.totalorder %s94_s11, %s94_s11 }
  0x70   :  { %p8223_p11 = scmp.lt.s32.totalorder %s8221_s5, %s8217_s4 }
  0x72   :  { %p8224_p12 = por %p8223_p11, %p8222_p10 }
  0x74   :  { %p8225_p13 = pnand %p8224_p12, %p8218_p9 }
  0x76   :  { %8228 = shalt.err (!%p8225_p13)
}
  0x77   :  { %96 = dma.hbm_to_vmem [thread:$0]  %s8589_s7, 112, %s94_s11, [#allocation11]  }
  0x78   :  { %8229 = dma.done.wait [#allocation3], 2048  }
  0x79   :  { %8230 = vsyncadd [#allocation3], 4294965248 }
  0x7a   :  { %8231 = dma.done.wait [#allocation5], 8256  }
  0x7b   :  { %8232 = vsyncadd [#allocation5], 4294959040 }
  0x7c   :  { %8233 = dma.done.wait [#allocation8], 32896  }
  0x7d   :  { %8234 = vsyncadd [#allocation8], 4294934400 }
  0x7e   :  { %8235 = dma.done.wait [#allocation11], 57456  }
  0x7f   :  { %8236 = vsyncadd [#allocation11], 4294909840  ;;  %v8252_v0 = vmov 0   ;;  %v7300_v1 = vld [vmem:[#allocation2 + $0x4] ss:$8 sps:$4 sm:$0xff]  }
  0x80   :  { %256 = vmatprep.mubr.bf16.mxu0 %v8252_v0  ;;  %v7302_v2 = vld [vmem:[#allocation2] ss:$8 sps:$4 sm:$0xff]   ;;  %224 = vmatprep.subr.bf16.mxu0 %v7300_v1  ;;  %v7303_v3 = vld [vmem:[#allocation2 + $0x14] ss:$8 sps:$4 sm:$0xff]   ;;  %v7305_v4 = vld [vmem:[#allocation2 + $0x10] ss:$8 sps:$4 sm:$0xff]  }
  0x81   :  { %225 = vmatpush1.bf16.msra.mxu0 %v7302_v2  ;;  %v7306_v5 = vld [vmem:[#allocation2 + $0x24] ss:$8 sps:$4 sm:$0xff]   ;;  %v7308_v6 = vld [vmem:[#allocation2 + $0x20] ss:$8 sps:$4 sm:$0xff]   ;;  %v7309_v7 = vld [vmem:[#allocation2 + $0x34] ss:$8 sps:$4 sm:$0xff]  }
  0x82   :  { %226 = vmatprep.subr.bf16.mxu0 %v7303_v3  ;;  %v7311_v8 = vld [vmem:[#allocation2 + $0x30] ss:$8 sps:$4 sm:$0xff]   ;;  %v7312_v9 = vld [vmem:[#allocation2 + $0x44] ss:$8 sps:$4 sm:$0xff]   ;;  %v7314_v10 = vld [vmem:[#allocation2 + $0x40] ss:$8 sps:$4 sm:$0xff]  }
  0x83   :  { %v7315_v11 = vld [vmem:[#allocation2 + $0x54] ss:$8 sps:$4 sm:$0xff]   ;;  %v7317_v12 = vld [vmem:[#allocation2 + $0x50] ss:$8 sps:$4 sm:$0xff]   ;;  %v7318_v13 = vld [vmem:[#allocation2 + $0x64] ss:$8 sps:$4 sm:$0xff]  }
  0x84   :  { %v7320_v14 = vld [vmem:[#allocation2 + $0x60] ss:$8 sps:$4 sm:$0xff]   ;;  %v7321_v15 = vld [vmem:[#allocation2 + $0x74] ss:$8 sps:$4 sm:$0xff]   ;;  %v7323_v16 = vld [vmem:[#allocation2 + $0x70] ss:$8 sps:$4 sm:$0xff]  }
  0x85   :  { %227 = vmatpush1.bf16.msra.mxu0 %v7305_v4  ;;  %v7324_v17 = vld [vmem:[%s8582_s0] sm:$0xff]   ;;  %v7375_v50 = vld [vmem:[#allocation4 + $0xc] ss:$16 sps:$4 sm:$0xff]  }
  0x86   :  { %228 = vmatprep.subr.bf16.mxu0 %v7306_v5  ;;  %v7327_v18 = vld [vmem:[#allocation4 + $0x4] ss:$16 sps:$4 sm:$0xff]   ;;  %v7325_v19 = vld [vmem:[#allocation4] ss:$16 sps:$4 sm:$0xff]  }
  0x87   :  { %v7330_v20 = vld [vmem:[#allocation4 + $0x24] ss:$16 sps:$4 sm:$0xff]   ;;  %v7328_v21 = vld [vmem:[#allocation4 + $0x20] ss:$16 sps:$4 sm:$0xff]  }
  0x88   :  { %v7333_v22 = vld [vmem:[#allocation4 + $0x44] ss:$16 sps:$4 sm:$0xff]   ;;  %v7331_v23 = vld [vmem:[#allocation4 + $0x40] ss:$16 sps:$4 sm:$0xff]  }
  0x89   :  { %229 = vmatpush1.bf16.msra.mxu0 %v7308_v6  ;;  %v7336_v24 = vld [vmem:[#allocation4 + $0x64] ss:$16 sps:$4 sm:$0xff]   ;;  %v7334_v25 = vld [vmem:[#allocation4 + $0x60] ss:$16 sps:$4 sm:$0xff]  }
  0x8a   :  { %230 = vmatprep.subr.bf16.mxu0 %v7309_v7  ;;  %v7339_v26 = vld [vmem:[#allocation4 + $0x84] ss:$16 sps:$4 sm:$0xff]   ;;  %v7337_v27 = vld [vmem:[#allocation4 + $0x80] ss:$16 sps:$4 sm:$0xff]  }
  0x8b   :  { %v7342_v28 = vld [vmem:[#allocation4 + $0xa4] ss:$16 sps:$4 sm:$0xff]   ;;  %v7340_v29 = vld [vmem:[#allocation4 + $0xa0] ss:$16 sps:$4 sm:$0xff]  }
  0x8c   :  { %v7345_v30 = vld [vmem:[#allocation4 + $0xc4] ss:$16 sps:$4 sm:$0xff]   ;;  %v7343_v31 = vld [vmem:[#allocation4 + $0xc0] ss:$16 sps:$4 sm:$0xff]  }
  0x8d   :  { %231 = vmatpush1.bf16.msra.mxu0 %v7311_v8  ;;  %v7348_v32 = vld [vmem:[#allocation4 + $0xe4] ss:$16 sps:$4 sm:$0xff]   ;;  %v7346_v33 = vld [vmem:[#allocation4 + $0xe0] ss:$16 sps:$4 sm:$0xff]  }
  0x8e   :  { %232 = vmatprep.subr.bf16.mxu0 %v7312_v9  ;;  %v7351_v34 = vld [vmem:[#allocation4 + $0x104] ss:$16 sps:$4 sm:$0xff]   ;;  %v7349_v35 = vld [vmem:[#allocation4 + $0x100] ss:$16 sps:$4 sm:$0xff]  }
  0x8f   :  { %v7354_v36 = vld [vmem:[#allocation4 + $0x124] ss:$16 sps:$4 sm:$0xff]   ;;  %v7352_v37 = vld [vmem:[#allocation4 + $0x120] ss:$16 sps:$4 sm:$0xff]  }
  0x90   :  { %v7357_v38 = vld [vmem:[#allocation4 + $0x144] ss:$16 sps:$4 sm:$0xff]   ;;  %v7355_v39 = vld [vmem:[#allocation4 + $0x140] ss:$16 sps:$4 sm:$0xff]  }
  0x91   :  { %233 = vmatpush1.bf16.msra.mxu0 %v7314_v10  ;;  %v7360_v40 = vld [vmem:[#allocation4 + $0x164] ss:$16 sps:$4 sm:$0xff]   ;;  %v7358_v41 = vld [vmem:[#allocation4 + $0x160] ss:$16 sps:$4 sm:$0xff]  }
  0x92   :  { %234 = vmatprep.subr.bf16.mxu0 %v7315_v11  ;;  %v7363_v42 = vld [vmem:[#allocation4 + $0x184] ss:$16 sps:$4 sm:$0xff]   ;;  %v7361_v43 = vld [vmem:[#allocation4 + $0x180] ss:$16 sps:$4 sm:$0xff]  }
  0x93   :  { %v7366_v44 = vld [vmem:[#allocation4 + $0x1a4] ss:$16 sps:$4 sm:$0xff]   ;;  %v7364_v45 = vld [vmem:[#allocation4 + $0x1a0] ss:$16 sps:$4 sm:$0xff]  }
  0x94   :  { %v7369_v46 = vld [vmem:[#allocation4 + $0x1c4] ss:$16 sps:$4 sm:$0xff]   ;;  %v7367_v47 = vld [vmem:[#allocation4 + $0x1c0] ss:$16 sps:$4 sm:$0xff]  }
  0x95   :  { %235 = vmatpush1.bf16.msra.mxu0 %v7317_v12  ;;  %v7372_v48 = vld [vmem:[#allocation4 + $0x1e4] ss:$16 sps:$4 sm:$0xff]   ;;  %v7370_v49 = vld [vmem:[#allocation4 + $0x1e0] ss:$16 sps:$4 sm:$0xff]  }
  0x96   :  { %236 = vmatprep.subr.bf16.mxu0 %v7318_v13  ;;  %v777_v51 = vld [vmem:[#allocation7] sm:$0xff] }
  0x97   :  { %v781_v52 = vld [vmem:[#allocation7 + $0x20] sm:$0xff] }
  0x98   :  { %v6405_v53 = vcombine.high %v777_v51, %v781_v52  ;;  %v6404_v54 = vcombine.low %v777_v51, %v781_v52  ;;  %v785_v55 = vld [vmem:[#allocation7 + $0x40] sm:$0xff]  ;;  %v7381_v52 = vld [vmem:[#allocation4 + $0x4c] ss:$16 sps:$4 sm:$0xff]  }
  0x99   :  { %237 = vmatpush1.bf16.msra.mxu0 %v7320_v14  ;;  %v789_v56 = vld [vmem:[#allocation7 + $0x60] sm:$0xff] }
  0x9a   :  { %238 = vmatprep.subr.bf16.mxu0 %v7321_v15  ;;  %v6413_v57 = vcombine.high %v785_v55, %v789_v56  ;;  %2355 = vmatprep.subr.bf16.mxu1 %v6405_v53  ;;  %v6412_v58 = vcombine.low %v785_v55, %v789_v56  ;;  %v793_v59 = vld [vmem:[#allocation7 + $0x80] sm:$0xff]  ;;  %v7387_v56 = vld [vmem:[#allocation4 + $0x8c] ss:$16 sps:$4 sm:$0xff]  }
  0x9b   :  { %2356 = vmatpush1.bf16.msra.mxu1 %v6404_v54  ;;  %v797_v60 = vld [vmem:[#allocation7 + $0xa0] sm:$0xff]  ;;  %v7384_v54 = vld [vmem:[#allocation4 + $0x6c] ss:$16 sps:$4 sm:$0xff]  }
  0x9c   :  { %2357 = vmatprep.subr.bf16.mxu1 %v6413_v57  ;;  %v6421_v61 = vcombine.high %v793_v59, %v797_v60  ;;  %v6420_v62 = vcombine.low %v793_v59, %v797_v60  ;;  %v801_v63 = vld [vmem:[#allocation7 + $0xc0] sm:$0xff]  ;;  %v7393_v60 = vld [vmem:[#allocation4 + $0xcc] ss:$16 sps:$4 sm:$0xff]  }
  0x9d   :  { %239 = vmatpush1.bf16.msra.mxu0 %v7323_v16  ;;  %v805_v0 = vld [vmem:[#allocation7 + $0xe0] sm:$0xff] }
  0x9e   :  { %679 = vmatprep.subr.bf16.mxu0 %v7327_v18  ;;  %v6429_v1 = vcombine.high %v801_v63, %v805_v0  ;;  %v6428_v2 = vcombine.low %v801_v63, %v805_v0  ;;  %v809_v3 = vld [vmem:[#allocation7 + $0x100] sm:$0xff]  ;;  %v7399_v0 = vld [vmem:[#allocation4 + $0x10c] ss:$16 sps:$4 sm:$0xff]  }
  0x9f   :  { %2358 = vmatpush1.bf16.msra.mxu1 %v6412_v58  ;;  %v813_v4 = vld [vmem:[#allocation7 + $0x120] sm:$0xff]  ;;  %v7390_v58 = vld [vmem:[#allocation4 + $0xac] ss:$16 sps:$4 sm:$0xff]  }
  0xa0   :  { %257 = vmatmul.mubr.bf16.vlgmr.msra.gmra.mrb[0].mxu0 %v7324_v17  ;;  %2359 = vmatprep.subr.bf16.mxu1 %v6421_v61  ;;  %v6437_v5 = vcombine.high %v809_v3, %v813_v4  ;;  %v6436_v6 = vcombine.low %v809_v3, %v813_v4  ;;  %v817_v7 = vld [vmem:[#allocation7 + $0x140] sm:$0xff]  ;;  %v7405_v4 = vld [vmem:[#allocation4 + $0x14c] ss:$16 sps:$4 sm:$0xff]  }
  0xa1   :  { %680 = vmatpush1.bf16.msra.mxu0 %v7325_v19  ;;  %v821_v8 = vld [vmem:[#allocation7 + $0x160] sm:$0xff] }
  0xa2   :  { %681 = vmatprep.subr.bf16.mxu0 %v7330_v20  ;;  %v6445_v9 = vcombine.high %v817_v7, %v821_v8  ;;  %v6444_v10 = vcombine.low %v817_v7, %v821_v8  ;;  %v825_v11 = vld [vmem:[#allocation7 + $0x180] sm:$0xff]  ;;  %v7411_v8 = vld [vmem:[#allocation4 + $0x18c] ss:$16 sps:$4 sm:$0xff]  }
  0xa3   :  { %2360 = vmatpush1.bf16.msra.mxu1 %v6420_v62  ;;  %v829_v12 = vld [vmem:[#allocation7 + $0x1a0] sm:$0xff]  ;;  %v7396_v62 = vld [vmem:[#allocation4 + $0xec] ss:$16 sps:$4 sm:$0xff]  }
  0xa4   :  { %2361 = vmatprep.subr.bf16.mxu1 %v6429_v1  ;;  %v6453_v13 = vcombine.high %v825_v11, %v829_v12  ;;  %v6452_v14 = vcombine.low %v825_v11, %v829_v12  ;;  %v833_v15 = vld [vmem:[#allocation7 + $0x1c0] sm:$0xff]  ;;  %v7417_v12 = vld [vmem:[#allocation4 + $0x1cc] ss:$16 sps:$4 sm:$0xff]  }
  0xa5   :  { %682 = vmatpush1.bf16.msra.mxu0 %v7328_v21  ;;  %v837_v16 = vld [vmem:[#allocation7 + $0x1e0] sm:$0xff] }
  0xa6   :  { %683 = vmatprep.subr.bf16.mxu0 %v7333_v22  ;;  %v6461_v17 = vcombine.high %v833_v15, %v837_v16  ;;  %v6460_v18 = vcombine.low %v833_v15, %v837_v16  ;;  %v841_v19 = vld [vmem:[#allocation7 + $0x200] sm:$0xff]  ;;  %v778_v15 = vld [vmem:[#allocation7 + $0x8] sm:$0xff] }
  0xa7   :  { %2362 = vmatpush1.bf16.msra.mxu1 %v6428_v2  ;;  %v845_v20 = vld [vmem:[#allocation7 + $0x220] sm:$0xff]  ;;  %v7402_v2 = vld [vmem:[#allocation4 + $0x12c] ss:$16 sps:$4 sm:$0xff]  }
  0xa8   :  { %2363 = vmatprep.subr.bf16.mxu1 %v6437_v5  ;;  %v6469_v21 = vcombine.high %v841_v19, %v845_v20  ;;  %v6468_v22 = vcombine.low %v841_v19, %v845_v20  ;;  %v7376_v51 = vld [vmem:[#allocation4 + $0x28] ss:$16 sps:$4 sm:$0xff]   ;;  %v782_v16 = vld [vmem:[#allocation7 + $0x28] sm:$0xff] }
  0xa9   :  { %684 = vmatpush1.bf16.msra.mxu0 %v7331_v23  ;;  %v849_v23 = vld [vmem:[#allocation7 + $0x240] sm:$0xff]  ;;  %v786_v19 = vld [vmem:[#allocation7 + $0x48] sm:$0xff] }
  0xaa   :  { %685 = vmatprep.subr.bf16.mxu0 %v7336_v24  ;;  %v853_v24 = vld [vmem:[#allocation7 + $0x260] sm:$0xff]  ;;  %v790_v20 = vld [vmem:[#allocation7 + $0x68] sm:$0xff] }
  0xab   :  { %2364 = vmatpush1.bf16.msra.mxu1 %v6436_v6  ;;  %v7379_v53 = vld [vmem:[#allocation4 + $0x48] ss:$16 sps:$4 sm:$0xff]   ;;  %v7408_v6 = vld [vmem:[#allocation4 + $0x16c] ss:$16 sps:$4 sm:$0xff]  }
  0xac   :  { %2365 = vmatprep.subr.bf16.mxu1 %v6445_v9  ;;  %v7382_v55 = vld [vmem:[#allocation4 + $0x68] ss:$16 sps:$4 sm:$0xff]  }
  0xad   :  { %686 = vmatpush1.bf16.msra.mxu0 %v7334_v25  ;;  %v6477_v25 = vcombine.high %v849_v23, %v853_v24  ;;  %v7385_v57 = vld [vmem:[#allocation4 + $0x88] ss:$16 sps:$4 sm:$0xff]  }
  0xae   :  { %687 = vmatprep.subr.bf16.mxu0 %v7339_v26  ;;  %v6476_v26 = vcombine.low %v849_v23, %v853_v24  ;;  %v7388_v59 = vld [vmem:[#allocation4 + $0xa8] ss:$16 sps:$4 sm:$0xff]   ;;  %v794_v23 = vld [vmem:[#allocation7 + $0x88] sm:$0xff] }
  0xaf   :  { %2366 = vmatpush1.bf16.msra.mxu1 %v6444_v10  ;;  %v7391_v61 = vld [vmem:[#allocation4 + $0xc8] ss:$16 sps:$4 sm:$0xff]   ;;  %v7414_v10 = vld [vmem:[#allocation4 + $0x1ac] ss:$16 sps:$4 sm:$0xff]  }
  0xb0   :  { %2367 = vmatprep.subr.bf16.mxu1 %v6453_v13  ;;  %v7394_v63 = vld [vmem:[#allocation4 + $0xe8] ss:$16 sps:$4 sm:$0xff]   ;;  %v798_v24 = vld [vmem:[#allocation7 + $0xa8] sm:$0xff] }
  0xb1   :  { %688 = vmatpush1.bf16.msra.mxu0 %v7337_v27  ;;  %v857_v27 = vld [vmem:[#allocation7 + $0x280] sm:$0xff] }
  0xb2   :  { %689 = vmatprep.subr.bf16.mxu0 %v7342_v28  ;;  %v861_v28 = vld [vmem:[#allocation7 + $0x2a0] sm:$0xff] }
  0xb3   :  { %2368 = vmatpush1.bf16.msra.mxu1 %v6452_v14  ;;  %v7397_v1 = vld [vmem:[#allocation4 + $0x108] ss:$16 sps:$4 sm:$0xff]   ;;  %v7420_v14 = vld [vmem:[#allocation4 + $0x1ec] ss:$16 sps:$4 sm:$0xff]  }
  0xb4   :  { %2369 = vmatprep.subr.bf16.mxu1 %v6461_v17  ;;  %v7400_v3 = vld [vmem:[#allocation4 + $0x128] ss:$16 sps:$4 sm:$0xff]  }
  0xb5   :  { %690 = vmatpush1.bf16.msra.mxu0 %v7340_v29  ;;  %v6485_v29 = vcombine.high %v857_v27, %v861_v28  ;;  %v7403_v5 = vld [vmem:[#allocation4 + $0x148] ss:$16 sps:$4 sm:$0xff]  }
  0xb6   :  { %691 = vmatprep.subr.bf16.mxu0 %v7345_v30  ;;  %v6484_v30 = vcombine.low %v857_v27, %v861_v28  ;;  %v7406_v7 = vld [vmem:[#allocation4 + $0x168] ss:$16 sps:$4 sm:$0xff]   ;;  %v802_v27 = vld [vmem:[#allocation7 + $0xc8] sm:$0xff] }
  0xb7   :  { %2370 = vmatpush1.bf16.msra.mxu1 %v6460_v18  ;;  %v7409_v9 = vld [vmem:[#allocation4 + $0x188] ss:$16 sps:$4 sm:$0xff]   ;;  %v6407_v18 = vcombine.high %v778_v15, %v782_v16  ;;  %v806_v28 = vld [vmem:[#allocation7 + $0xe8] sm:$0xff] }
  0xb8   :  { %2371 = vmatprep.subr.bf16.mxu1 %v6469_v21  ;;  %v7412_v11 = vld [vmem:[#allocation4 + $0x1a8] ss:$16 sps:$4 sm:$0xff]   ;;  %v6406_v21 = vcombine.low %v778_v15, %v782_v16  ;;  %v870_v15 = vld [vmem:[#allocation7 + $0x2e8] sm:$0xff] }
  0xb9   :  { %692 = vmatpush1.bf16.msra.mxu0 %v7343_v31  ;;  %v865_v31 = vld [vmem:[#allocation7 + $0x2c0] sm:$0xff] }
  0xba   :  { %693 = vmatprep.subr.bf16.mxu0 %v7348_v32  ;;  %v869_v32 = vld [vmem:[#allocation7 + $0x2e0] sm:$0xff] }
  0xbb   :  { %2372 = vmatpush1.bf16.msra.mxu1 %v6468_v22  ;;  %v7415_v13 = vld [vmem:[#allocation4 + $0x1c8] ss:$16 sps:$4 sm:$0xff]   ;;  %v6415_v22 = vcombine.high %v786_v19, %v790_v20 }
  0xbc   :  { %2373 = vmatprep.subr.bf16.mxu1 %v6477_v25  ;;  %v7418_v17 = vld [vmem:[#allocation4 + $0x1e8] ss:$16 sps:$4 sm:$0xff]   ;;  %v6414_v25 = vcombine.low %v786_v19, %v790_v20  ;;  %v878_v19 = vld [vmem:[#allocation7 + $0x328] sm:$0xff] }
  0xbd   :  { %694 = vmatpush1.bf16.msra.mxu0 %v7346_v33  ;;  %v6493_v33 = vcombine.high %v865_v31, %v869_v32 }
  0xbe   :  { %695 = vmatprep.subr.bf16.mxu0 %v7351_v34  ;;  %v6492_v34 = vcombine.low %v865_v31, %v869_v32  ;;  %v810_v31 = vld [vmem:[#allocation7 + $0x108] sm:$0xff] }
  0xbf   :  { %2374 = vmatpush1.bf16.msra.mxu1 %v6476_v26  ;;  %v6423_v26 = vcombine.high %v794_v23, %v798_v24  ;;  %v814_v32 = vld [vmem:[#allocation7 + $0x128] sm:$0xff] }
  0xc0   :  { %2375 = vmatprep.subr.bf16.mxu1 %v6485_v29  ;;  %v6422_v29 = vcombine.low %v794_v23, %v798_v24  ;;  %v886_v23 = vld [vmem:[#allocation7 + $0x368] sm:$0xff] }
  0xc1   :  { %696 = vmatpush1.bf16.msra.mxu0 %v7349_v35  ;;  %v873_v35 = vld [vmem:[#allocation7 + $0x300] sm:$0xff] }
  0xc2   :  { %697 = vmatprep.subr.bf16.mxu0 %v7354_v36  ;;  %v877_v36 = vld [vmem:[#allocation7 + $0x320] sm:$0xff] }
  0xc3   :  { %2376 = vmatpush1.bf16.msra.mxu1 %v6484_v30  ;;  %v6431_v30 = vcombine.high %v802_v27, %v806_v28 }
  0xc4   :  { %2377 = vmatprep.subr.bf16.mxu1 %v6493_v33  ;;  %v6430_v33 = vcombine.low %v802_v27, %v806_v28  ;;  %v894_v27 = vld [vmem:[#allocation7 + $0x3a8] sm:$0xff] }
  0xc5   :  { %698 = vmatpush1.bf16.msra.mxu0 %v7352_v37  ;;  %v6501_v37 = vcombine.high %v873_v35, %v877_v36 }
  0xc6   :  { %699 = vmatprep.subr.bf16.mxu0 %v7357_v38  ;;  %v6500_v38 = vcombine.low %v873_v35, %v877_v36  ;;  %v818_v35 = vld [vmem:[#allocation7 + $0x148] sm:$0xff] }
  0xc7   :  { %2378 = vmatpush1.bf16.msra.mxu1 %v6492_v34  ;;  %v6439_v34 = vcombine.high %v810_v31, %v814_v32  ;;  %v822_v36 = vld [vmem:[#allocation7 + $0x168] sm:$0xff] }
  0xc8   :  { %2379 = vmatprep.subr.bf16.mxu1 %v6501_v37  ;;  %v6438_v37 = vcombine.low %v810_v31, %v814_v32  ;;  %v902_v31 = vld [vmem:[#allocation7 + $0x3e8] sm:$0xff] }
  0xc9   :  { %700 = vmatpush1.bf16.msra.mxu0 %v7355_v39 }
  0xca   :  { %701 = vmatprep.subr.bf16.mxu0 %v7360_v40 }
  0xcb   :  { %2380 = vmatpush1.bf16.msra.mxu1 %v6500_v38  ;;  %v6447_v38 = vcombine.high %v818_v35, %v822_v36 }
  0xcd   :  { %702 = vmatpush1.bf16.msra.mxu0 %v7358_v41 }
  0xce   :  { %703 = vmatprep.subr.bf16.mxu0 %v7363_v42 }
  0xd1   :  { %704 = vmatpush1.bf16.msra.mxu0 %v7361_v43 }
  0xd2   :  { %705 = vmatprep.subr.bf16.mxu0 %v7366_v44 }
  0xd5   :  { %706 = vmatpush1.bf16.msra.mxu0 %v7364_v45 }
  0xd6   :  { %707 = vmatprep.subr.bf16.mxu0 %v7369_v46 }
  0xd9   :  { %708 = vmatpush1.bf16.msra.mxu0 %v7367_v47 }
  0xda   :  { %709 = vmatprep.subr.bf16.mxu0 %v7372_v48  ;;  %v7373_v48 = vld [vmem:[#allocation4 + $0x8] ss:$16 sps:$4 sm:$0xff]  }
  0xdd   :  { %710 = vmatpush1.bf16.msra.mxu0 %v7370_v49 }
  0xde   :  { %722 = vmatprep.subr.bf16.mxu0 %v7375_v50  ;;  %v7378_v50 = vld [vmem:[#allocation4 + $0x2c] ss:$16 sps:$4 sm:$0xff]  }
 0x173   :  { %v258_v39 = vpop.f32.mrb[0].mxu0 }
 0x174   :  { %v260_v40 = vpop.f32.mrb[1].mxu0 }
 0x175   :  { %v262_v41 = vpop.f32.mrb[2].mxu0 }
 0x176   :  { %v267_v42 = vpack.c.bf16 %v262_v41, %v258_v39  ;;  %v264_v43 = vpop.f32.mrb[3].mxu0  ;;  %v826_v39 = vld [vmem:[#allocation7 + $0x188] sm:$0xff]  ;;  %v6446_v41 = vcombine.low %v818_v35, %v822_v36  ;;  %v339_v36 = vlaneseq }
 0x177   :  { %v268_v44 = vpack.c.bf16 %v264_v43, %v260_v40  ;;  %v830_v40 = vld [vmem:[#allocation7 + $0x1a8] sm:$0xff]  ;;  %v885_v43 = vld [vmem:[#allocation7 + $0x360] sm:$0xff] }
 0x178   :  { %v269_v45 = vmul.bf16 1045249613, %v267_v42 }
 0x179   :  { %v270_v46 = vmul.bf16 1045249613, %v268_v44 }
 0x17a   :  { %v8385_v49 = vmax.bf16 %v269_v45, %v267_v42  ;;  %v881_v42 = vld [vmem:[#allocation7 + $0x340] sm:$0xff] }
 0x17b   :  { %v272_v47 = vmax.bf16 %v270_v46, %v268_v44  ;;  %v6455_v44 = vcombine.high %v826_v39, %v830_v40  ;;  %v6509_v45 = vcombine.high %v881_v42, %v885_v43  ;;  %v834_v46 = vld [vmem:[#allocation7 + $0x1c8] sm:$0xff] }
 0x17d   :  { %711 = vmatprep.mubr.bf16.mxu0 %v272_v47  ;;  %2381 = vmatprep.subr.bf16.mxu1 %v6509_v45 }
 0x17e   :  { %712 = vmatmul.mubr.bf16.vlgmr.msra.gmra.mrb[4].mxu0 %v8385_v49 }
 0x17f   :  { %723 = vmatpush1.bf16.msra.mxu0 %v7373_v48  ;;  %754 = vmatprep.mubr.bf16.mxu0 %v272_v47  ;;  %v838_v47 = vld [vmem:[#allocation7 + $0x1e8] sm:$0xff]  ;;  %v6508_v48 = vcombine.low %v881_v42, %v885_v43 }
 0x180   :  { %724 = vmatprep.subr.bf16.mxu0 %v7378_v50  ;;  %v889_v50 = vld [vmem:[#allocation7 + $0x380] sm:$0xff] }
 0x181   :  { %2382 = vmatpush1.bf16.msra.mxu1 %v6508_v48 }
 0x183   :  { %725 = vmatpush1.bf16.msra.mxu0 %v7376_v51  ;;  %v893_v51 = vld [vmem:[#allocation7 + $0x3a0] sm:$0xff] }
 0x184   :  { %726 = vmatprep.subr.bf16.mxu0 %v7381_v52  ;;  %v6463_v52 = vcombine.high %v834_v46, %v838_v47 }
 0x187   :  { %727 = vmatpush1.bf16.msra.mxu0 %v7379_v53  ;;  %v6517_v53 = vcombine.high %v889_v50, %v893_v51 }
 0x188   :  { %728 = vmatprep.subr.bf16.mxu0 %v7384_v54  ;;  %v842_v54 = vld [vmem:[#allocation7 + $0x208] sm:$0xff] }
 0x189   :  { %2383 = vmatprep.subr.bf16.mxu1 %v6517_v53 }
 0x18b   :  { %729 = vmatpush1.bf16.msra.mxu0 %v7382_v55  ;;  %v846_v55 = vld [vmem:[#allocation7 + $0x228] sm:$0xff] }
 0x18c   :  { %730 = vmatprep.subr.bf16.mxu0 %v7387_v56  ;;  %v6516_v56 = vcombine.low %v889_v50, %v893_v51 }
 0x18e   :  { %2384 = vmatpush1.bf16.msra.mxu1 %v6516_v56  ;;  %v917_v56 = vld [vmem:[#allocation7 + $0x460] sm:$0xff] }
 0x18f   :  { %731 = vmatpush1.bf16.msra.mxu0 %v7385_v57  ;;  %v6462_v57 = vcombine.low %v834_v46, %v838_v47 }
 0x190   :  { %732 = vmatprep.subr.bf16.mxu0 %v7390_v58  ;;  %v897_v58 = vld [vmem:[#allocation7 + $0x3c0] sm:$0xff] }
 0x193   :  { %733 = vmatpush1.bf16.msra.mxu0 %v7388_v59  ;;  %v901_v59 = vld [vmem:[#allocation7 + $0x3e0] sm:$0xff] }
 0x194   :  { %734 = vmatprep.subr.bf16.mxu0 %v7393_v60  ;;  %v6471_v60 = vcombine.high %v842_v54, %v846_v55 }
 0x197   :  { %735 = vmatpush1.bf16.msra.mxu0 %v7391_v61  ;;  %v6525_v61 = vcombine.high %v897_v58, %v901_v59 }
 0x198   :  { %736 = vmatprep.subr.bf16.mxu0 %v7396_v62  ;;  %v850_v62 = vld [vmem:[#allocation7 + $0x248] sm:$0xff] }
 0x199   :  { %2385 = vmatprep.subr.bf16.mxu1 %v6525_v61 }
 0x19b   :  { %737 = vmatpush1.bf16.msra.mxu0 %v7394_v63  ;;  %v854_v63 = vld [vmem:[#allocation7 + $0x268] sm:$0xff] }
 0x19c   :  { %738 = vmatprep.subr.bf16.mxu0 %v7399_v0  ;;  %v6524_v0 = vcombine.low %v897_v58, %v901_v59  ;;  %v918_v58 = vld [vmem:[#allocation7 + $0x468] sm:$0xff] }
 0x19e   :  { %2386 = vmatpush1.bf16.msra.mxu1 %v6524_v0  ;;  %v925_v0 = vld [vmem:[#allocation7 + $0x4a0] sm:$0xff] }
 0x19f   :  { %739 = vmatpush1.bf16.msra.mxu0 %v7397_v1  ;;  %v6470_v1 = vcombine.low %v842_v54, %v846_v55  ;;  %v913_v54 = vld [vmem:[#allocation7 + $0x440] sm:$0xff] }
 0x1a0   :  { %740 = vmatprep.subr.bf16.mxu0 %v7402_v2  ;;  %v8389_v2 = vld [vmem:[#allocation7 + $0x400] sm:$0xff]  ;;  %v6541_v61 = vcombine.high %v913_v54, %v917_v56 }
 0x1a3   :  { %741 = vmatpush1.bf16.msra.mxu0 %v7400_v3  ;;  %v8391_v3 = vld [vmem:[#allocation7 + $0x420] sm:$0xff] }
 0x1a4   :  { %742 = vmatprep.subr.bf16.mxu0 %v7405_v4  ;;  %v8393_v4 = vld [vmem:[#allocation7 + $0x408] sm:$0xff] }
 0x1a7   :  { %743 = vmatpush1.bf16.msra.mxu0 %v7403_v5  ;;  %v6479_v5 = vcombine.high %v850_v62, %v854_v63 }
 0x1a8   :  { %744 = vmatprep.subr.bf16.mxu0 %v7408_v6  ;;  %v6533_v6 = vcombine.high %v8389_v2, %v8391_v3 }
 0x1aa   :  { %2398 = vmatprep.subr.bf16.mxu1 %v6533_v6  ;;  %v6540_v6 = vcombine.low %v913_v54, %v917_v56  ;;  %v974_v54 = vld [vmem:[#allocation7 + $0x628] sm:$0xff] }
 0x1ab   :  { %745 = vmatpush1.bf16.msra.mxu0 %v7406_v7  ;;  %v8397_v7 = vld [vmem:[#allocation7 + $0x428] sm:$0xff] }
 0x1ac   :  { %746 = vmatprep.subr.bf16.mxu0 %v7411_v8  ;;  %v858_v8 = vld [vmem:[#allocation7 + $0x288] sm:$0xff]  ;;  %v6535_v35 = vcombine.high %v8393_v4, %v8397_v7 }
 0x1af   :  { %747 = vmatpush1.bf16.msra.mxu0 %v7409_v9  ;;  %v862_v9 = vld [vmem:[#allocation7 + $0x2a8] sm:$0xff] }
 0x1b0   :  { %748 = vmatprep.subr.bf16.mxu0 %v7414_v10  ;;  %v6532_v10 = vcombine.low %v8389_v2, %v8391_v3  ;;  %v6486_v16 = vcombine.low %v858_v8, %v862_v9 }
 0x1b3   :  { %749 = vmatpush1.bf16.msra.mxu0 %v7412_v11  ;;  %v6534_v11 = vcombine.low %v8393_v4, %v8397_v7  ;;  %v937_v4 = vld [vmem:[#allocation7 + $0x500] sm:$0xff] }
 0x1b4   :  { %750 = vmatprep.subr.bf16.mxu0 %v7417_v12  ;;  %v6478_v12 = vcombine.low %v850_v62, %v854_v63  ;;  %v921_v63 = vld [vmem:[#allocation7 + $0x480] sm:$0xff] }
 0x1b5   :  { %v941_v7 = vld [vmem:[#allocation7 + $0x520] sm:$0xff] }
 0x1b7   :  { %751 = vmatpush1.bf16.msra.mxu0 %v7415_v13  ;;  %v6487_v13 = vcombine.high %v858_v8, %v862_v9  ;;  %v6549_v9 = vcombine.high %v921_v63, %v925_v0 }
 0x1b8   :  { %752 = vmatprep.subr.bf16.mxu0 %v7420_v14  ;;  %v866_v14 = vld [vmem:[#allocation7 + $0x2c8] sm:$0xff] }
 0x1b9   :  { %v6494_v20 = vcombine.low %v866_v14, %v870_v15 }
 0x1bb   :  { %753 = vmatpush1.bf16.msra.mxu0 %v7418_v17  ;;  %v6495_v17 = vcombine.high %v866_v14, %v870_v15  ;;  %v933_v14 = vld [vmem:[#allocation7 + $0x4e0] sm:$0xff]  ;;  %v930_v15 = vld [vmem:[#allocation7 + $0x4c8] sm:$0xff] }
 0x1bc   :  { %2441 = vmatprep.subr.bf16.mxu0 %v6407_v18  ;;  %v874_v18 = vld [vmem:[#allocation7 + $0x308] sm:$0xff] }
 0x1bd   :  { %v6502_v24 = vcombine.low %v874_v18, %v878_v19 }
 0x1be   :  { %755 = vmatmul.mubr.bf16.vlgmr.msra.gmra.mrb[8].mxu0 %v8385_v49  ;;  %v6454_v49 = vcombine.low %v826_v39, %v830_v40  ;;  %v8410_v39 = vld [vmem:[#allocation6] sm:$0xf] }
 0x1bf   :  { %2442 = vmatpush1.bf16.msra.mxu0 %v6406_v21  ;;  %v6503_v21 = vcombine.high %v874_v18, %v878_v19 }
 0x1c0   :  { %2443 = vmatprep.subr.bf16.mxu0 %v6415_v22  ;;  %v882_v22 = vld [vmem:[#allocation7 + $0x348] sm:$0xff] }
 0x1c1   :  { %v6510_v28 = vcombine.low %v882_v22, %v886_v23 }
 0x1c3   :  { %2444 = vmatpush1.bf16.msra.mxu0 %v6414_v25  ;;  %v6511_v25 = vcombine.high %v882_v22, %v886_v23  ;;  %v945_v23 = vld [vmem:[#allocation7 + $0x540] sm:$0xff] }
 0x1c4   :  { %2445 = vmatprep.subr.bf16.mxu0 %v6423_v26  ;;  %v890_v26 = vld [vmem:[#allocation7 + $0x388] sm:$0xff] }
 0x1c5   :  { %v6518_v32 = vcombine.low %v890_v26, %v894_v27 }
 0x1c7   :  { %2446 = vmatpush1.bf16.msra.mxu0 %v6422_v29  ;;  %v6519_v29 = vcombine.high %v890_v26, %v894_v27  ;;  %v950_v26 = vld [vmem:[#allocation7 + $0x568] sm:$0xff]  ;;  %v6564_v27 = vcombine.low %v937_v4, %v941_v7 }
 0x1c8   :  { %2447 = vmatprep.subr.bf16.mxu0 %v6431_v30  ;;  %v898_v30 = vld [vmem:[#allocation7 + $0x3c8] sm:$0xff] }
 0x1cb   :  { %2448 = vmatpush1.bf16.msra.mxu0 %v6430_v33  ;;  %v6527_v33 = vcombine.high %v898_v30, %v902_v31 }
 0x1cc   :  { %2449 = vmatprep.subr.bf16.mxu0 %v6439_v34  ;;  %v6526_v34 = vcombine.low %v898_v30, %v902_v31  ;;  %v953_v31 = vld [vmem:[#allocation7 + $0x580] sm:$0xff] }
 0x1cf   :  { %2450 = vmatpush1.bf16.msra.mxu0 %v6438_v37  ;;  %v8405_v37 = vshrl.u32 %v339_v36, 7 }
 0x1d0   :  { %2451 = vmatprep.subr.bf16.mxu0 %v6447_v38 }
 0x1d1   :  { %v8408_v38 = vsub.s32 0, %v8405_v37  ;;  %v8413_v40 = vsub.s32 1, %v8405_v37 }
 0x1d3   :  { %2452 = vmatpush1.bf16.msra.mxu0 %v6446_v41  ;;  %v342_v41 = vrot.slane %v8410_v39, %v8408_v38  ;;  %v346_v43 = vrot.slane %v8410_v39, %v8413_v40 }
 0x1d4   :  { %2453 = vmatprep.subr.bf16.mxu0 %v6455_v44 }
 0x1d7   :  { %2454 = vmatpush1.bf16.msra.mxu0 %v6454_v49 }
 0x1d8   :  { %2455 = vmatprep.subr.bf16.mxu0 %v6463_v52 }
 0x1db   :  { %2456 = vmatpush1.bf16.msra.mxu0 %v6462_v57  ;;  %v914_v57 = vld [vmem:[#allocation7 + $0x448] sm:$0xff] }
 0x1dc   :  { %2457 = vmatprep.subr.bf16.mxu0 %v6471_v60  ;;  %v6543_v62 = vcombine.high %v914_v57, %v918_v58  ;;  %v6542_v8 = vcombine.low %v914_v57, %v918_v58 }
 0x1df   :  { %2458 = vmatpush1.bf16.msra.mxu0 %v6470_v1  ;;  %v922_v1 = vld [vmem:[#allocation7 + $0x488] sm:$0xff] }
 0x1e0   :  { %2459 = vmatprep.subr.bf16.mxu0 %v6479_v5  ;;  %v926_v5 = vld [vmem:[#allocation7 + $0x4a8] sm:$0xff] }
 0x1e1   :  { %v6550_v18 = vcombine.low %v922_v1, %v926_v5 }
 0x1e3   :  { %2460 = vmatpush1.bf16.msra.mxu0 %v6478_v12  ;;  %v6551_v12 = vcombine.high %v922_v1, %v926_v5 }
 0x1e4   :  { %2461 = vmatprep.subr.bf16.mxu0 %v6487_v13  ;;  %v929_v13 = vld [vmem:[#allocation7 + $0x4c0] sm:$0xff] }
 0x1e5   :  { %v6557_v2 = vcombine.high %v929_v13, %v933_v14  ;;  %v6556_v19 = vcombine.low %v929_v13, %v933_v14  ;;  %v986_v13 = vld [vmem:[#allocation7 + $0x688] sm:$0xff] }
 0x1e6   :  { %v990_v14 = vld [vmem:[#allocation7 + $0x6a8] sm:$0xff] }
 0x1e7   :  { %2462 = vmatpush1.bf16.msra.mxu0 %v6486_v16  ;;  %v934_v16 = vld [vmem:[#allocation7 + $0x4e8] sm:$0xff] }
 0x1e8   :  { %2463 = vmatprep.subr.bf16.mxu0 %v6495_v17  ;;  %v6548_v17 = vcombine.low %v921_v63, %v925_v0  ;;  %v6559_v3 = vcombine.high %v930_v15, %v934_v16  ;;  %v978_v63 = vld [vmem:[#allocation7 + $0x648] sm:$0xff] }
 0x1e9   :  { %v982_v0 = vld [vmem:[#allocation7 + $0x668] sm:$0xff] }
 0x1eb   :  { %2464 = vmatpush1.bf16.msra.mxu0 %v6494_v20  ;;  %v6558_v20 = vcombine.low %v930_v15, %v934_v16  ;;  %v6606_v16 = vcombine.low %v978_v63, %v982_v0 }
 0x1ec   :  { %2465 = vmatprep.subr.bf16.mxu0 %v6503_v21  ;;  %v6565_v21 = vcombine.high %v937_v4, %v941_v7  ;;  %v994_v4 = vld [vmem:[#allocation7 + $0x6c8] sm:$0xff] }
 0x1ed   :  { %v998_v7 = vld [vmem:[#allocation7 + $0x6e8] sm:$0xff] }
 0x1ef   :  { %2466 = vmatpush1.bf16.msra.mxu0 %v6502_v24  ;;  %v949_v24 = vld [vmem:[#allocation7 + $0x560] sm:$0xff] }
 0x1f0   :  { %2467 = vmatprep.subr.bf16.mxu0 %v6511_v25  ;;  %v946_v25 = vld [vmem:[#allocation7 + $0x548] sm:$0xff] }
 0x1f1   :  { %v6575_v30 = vcombine.high %v946_v25, %v950_v26  ;;  %v6574_v36 = vcombine.low %v946_v25, %v950_v26  ;;  %v6622_v26 = vcombine.low %v994_v4, %v998_v7 }
 0x1f3   :  { %2468 = vmatpush1.bf16.msra.mxu0 %v6510_v28 }
 0x1f4   :  { %2469 = vmatprep.subr.bf16.mxu0 %v6519_v29  ;;  %v6573_v29 = vcombine.high %v945_v23, %v949_v24 }
 0x1f7   :  { %2470 = vmatpush1.bf16.msra.mxu0 %v6518_v32  ;;  %v957_v32 = vld [vmem:[#allocation7 + $0x5a0] sm:$0xff] }
 0x1f8   :  { %2471 = vmatprep.subr.bf16.mxu0 %v6527_v33  ;;  %v954_v33 = vld [vmem:[#allocation7 + $0x588] sm:$0xff] }
 0x1fb   :  { %2472 = vmatpush1.bf16.msra.mxu0 %v6526_v34  ;;  %v958_v34 = vld [vmem:[#allocation7 + $0x5a8] sm:$0xff] }
 0x1fc   :  { %2484 = vmatprep.subr.bf16.mxu0 %v6535_v35  ;;  %v6572_v35 = vcombine.low %v945_v23, %v949_v24  ;;  %v1002_v23 = vld [vmem:[#allocation7 + $0x708] sm:$0xff] }
 0x1fd   :  { %v1006_v24 = vld [vmem:[#allocation7 + $0x728] sm:$0xff] }
 0x251   :  { %v713_v42 = vpop.f32.mrb[4].mxu0 }
 0x252   :  { %v715_v44 = vpop.f32.mrb[5].mxu0  ;;  %v714_v46 = vadd.f32 %v713_v42, %v342_v41  ;;  %v6583_v42 = vcombine.high %v954_v33, %v958_v34 }
 0x253   :  { %v717_v45 = vpop.f32.mrb[6].mxu0  ;;  %v716_v49 = vadd.f32 %v715_v44, %v346_v43  ;;  %v965_v44 = vld [vmem:[#allocation7 + $0x5e0] sm:$0xff] }
 0x254   :  { %v718_v47 = vadd.f32 %v717_v45, %v342_v41  ;;  %v719_v48 = vpop.f32.mrb[7].mxu0  ;;  %v6581_v41 = vcombine.high %v953_v31, %v957_v32  ;;  %v962_v45 = vld [vmem:[#allocation7 + $0x5c8] sm:$0xff] }
 0x255   :  { %v720_v50 = vadd.f32 %v719_v48, %v346_v43  ;;  %v961_v43 = vld [vmem:[#allocation7 + $0x5c0] sm:$0xff]  ;;  %v6582_v48 = vcombine.low %v954_v33, %v958_v34  ;;  %v6630_v34 = vcombine.low %v1002_v23, %v1006_v24 }
 0x256   :  { %v765_v51 = vpack.c.bf16 %v718_v47, %v714_v46  ;;  %v966_v46 = vld [vmem:[#allocation7 + $0x5e8] sm:$0xff]  ;;  %v6580_v47 = vcombine.low %v953_v31, %v957_v32 }
 0x257   :  { %v766_v52 = vpack.c.bf16 %v720_v50, %v716_v49  ;;  %v6589_v49 = vcombine.high %v961_v43, %v965_v44  ;;  %v6591_v50 = vcombine.high %v962_v45, %v966_v46  ;;  %v6590_v56 = vcombine.low %v962_v45, %v966_v46  ;;  %v1010_v31 = vld [vmem:[#allocation7 + $0x748] sm:$0xff] }
 0x258   :  { %v769_v53 = vmul.bf16 1045249613, %v765_v51  ;;  %v1014_v32 = vld [vmem:[#allocation7 + $0x768] sm:$0xff] }
 0x259   :  { %v770_v55 = vmul.bf16 1045249613, %v766_v52  ;;  %v1018_v45 = vld [vmem:[#allocation7 + $0x788] sm:$0xff] }
 0x25a   :  { %v8421_v60 = vmax.bf16 %v769_v53, %v765_v51  ;;  %v969_v51 = vld [vmem:[#allocation7 + $0x600] sm:$0xff]  ;;  %v970_v53 = vld [vmem:[#allocation7 + $0x608] sm:$0xff] }
 0x25b   :  { %v8419_v59 = vmax.bf16 %v770_v55, %v766_v52  ;;  %v973_v52 = vld [vmem:[#allocation7 + $0x620] sm:$0xff]  ;;  %v6588_v55 = vcombine.low %v961_v43, %v965_v44  ;;  %v6599_v58 = vcombine.high %v970_v53, %v974_v54  ;;  %v6598_v5 = vcombine.low %v970_v53, %v974_v54  ;;  %v1022_v46 = vld [vmem:[#allocation7 + $0x7a8] sm:$0xff] }
 0x25c   :  { %v6597_v57 = vcombine.high %v969_v51, %v973_v52  ;;  %v6596_v1 = vcombine.low %v969_v51, %v973_v52  ;;  %v8437_v43 = vsub.s32 3, %v8405_v37  ;;  %v1021_v44 = vld [vmem:[#allocation7 + $0x7a0] sm:$0xff]  ;;  %v6647_v51 = vcombine.high %v1018_v45, %v1022_v46 }
 0x25d   :  { %2387 = vmatprep.mubr.bf16.mxu1 %v8419_v59  ;;  %2473 = vmatprep.mubr.bf16.mxu0 %v8419_v59  ;;  %v1025_v52 = vld [vmem:[#allocation7 + $0x7c0] sm:$0xff] }
 0x25e   :  { %2388 = vmatmul.mubr.bf16.vlgmr.msra.gmra.mrb[0].mxu1 %v8421_v60  ;;  %2474 = vmatmul.mubr.bf16.vlgmr.msra.gmra.mrb[12].mxu0 %v8421_v60  ;;  %v1029_v53 = vld [vmem:[#allocation7 + $0x7e0] sm:$0xff] }
 0x25f   :  { %2399 = vmatpush1.bf16.msra.mxu1 %v6532_v10  ;;  %2485 = vmatpush1.bf16.msra.mxu0 %v6534_v11  ;;  %v938_v10 = vld [vmem:[#allocation7 + $0x508] sm:$0xff] }
 0x260   :  { %2400 = vmatprep.subr.bf16.mxu1 %v6541_v61  ;;  %2486 = vmatprep.subr.bf16.mxu0 %v6543_v62  ;;  %v942_v11 = vld [vmem:[#allocation7 + $0x528] sm:$0xff]  ;;  %v977_v61 = vld [vmem:[#allocation7 + $0x640] sm:$0xff] }
 0x261   :  { %v6567_v22 = vcombine.high %v938_v10, %v942_v11  ;;  %v6566_v28 = vcombine.low %v938_v10, %v942_v11  ;;  %v981_v62 = vld [vmem:[#allocation7 + $0x660] sm:$0xff]  ;;  %v6614_v11 = vcombine.low %v986_v13, %v990_v14 }
 0x262   :  { %v6604_v15 = vcombine.low %v977_v61, %v981_v62 }
 0x263   :  { %2401 = vmatpush1.bf16.msra.mxu1 %v6540_v6  ;;  %2487 = vmatpush1.bf16.msra.mxu0 %v6542_v8  ;;  %v6605_v6 = vcombine.high %v977_v61, %v981_v62  ;;  %v6607_v8 = vcombine.high %v978_v63, %v982_v0  ;;  %v6646_v63 = vcombine.low %v1018_v45, %v1022_v46  ;;  %v808_v45 = vld [vmem:[#allocation7 + $0xf8] sm:$0xff] }
 0x264   :  { %2402 = vmatprep.subr.bf16.mxu1 %v6549_v9  ;;  %2488 = vmatprep.subr.bf16.mxu0 %v6551_v12  ;;  %v985_v9 = vld [vmem:[#allocation7 + $0x680] sm:$0xff]  ;;  %v6653_v0 = vcombine.high %v1025_v52, %v1029_v53 }
 0x265   :  { %v989_v12 = vld [vmem:[#allocation7 + $0x6a0] sm:$0xff] }
 0x266   :  { %v6612_v10 = vcombine.low %v985_v9, %v989_v12 }
 0x267   :  { %2403 = vmatpush1.bf16.msra.mxu1 %v6548_v17  ;;  %2489 = vmatpush1.bf16.msra.mxu0 %v6550_v18  ;;  %v6613_v17 = vcombine.high %v985_v9, %v989_v12  ;;  %v6615_v18 = vcombine.high %v986_v13, %v990_v14  ;;  %v779_v9 = vld [vmem:[#allocation7 + $0x10] sm:$0xff] }
 0x268   :  { %2404 = vmatprep.subr.bf16.mxu1 %v6557_v2  ;;  %2490 = vmatprep.subr.bf16.mxu0 %v6559_v3  ;;  %v993_v2 = vld [vmem:[#allocation7 + $0x6c0] sm:$0xff]  ;;  %v783_v14 = vld [vmem:[#allocation7 + $0x30] sm:$0xff] }
 0x269   :  { %v997_v3 = vld [vmem:[#allocation7 + $0x6e0] sm:$0xff] }
 0x26a   :  { %v6620_v25 = vcombine.low %v993_v2, %v997_v3 }
 0x26b   :  { %2405 = vmatpush1.bf16.msra.mxu1 %v6556_v19  ;;  %2491 = vmatpush1.bf16.msra.mxu0 %v6558_v20  ;;  %v6621_v19 = vcombine.high %v993_v2, %v997_v3  ;;  %v6623_v20 = vcombine.high %v994_v4, %v998_v7  ;;  %v6409_v4 = vcombine.high %v779_v9, %v783_v14 }
 0x26c   :  { %2406 = vmatprep.subr.bf16.mxu1 %v6565_v21  ;;  %2492 = vmatprep.subr.bf16.mxu0 %v6567_v22  ;;  %v1001_v21 = vld [vmem:[#allocation7 + $0x700] sm:$0xff] }
 0x26d   :  { %v1005_v22 = vld [vmem:[#allocation7 + $0x720] sm:$0xff] }
 0x26e   :  { %v6628_v33 = vcombine.low %v1001_v21, %v1005_v22 }
 0x26f   :  { %2407 = vmatpush1.bf16.msra.mxu1 %v6564_v27  ;;  %2493 = vmatpush1.bf16.msra.mxu0 %v6566_v28  ;;  %v6629_v27 = vcombine.high %v1001_v21, %v1005_v22  ;;  %v6631_v28 = vcombine.high %v1002_v23, %v1006_v24  ;;  %v792_v21 = vld [vmem:[#allocation7 + $0x78] sm:$0xff]  ;;  %v6408_v23 = vcombine.low %v779_v9, %v783_v14 }
 0x270   :  { %2408 = vmatprep.subr.bf16.mxu1 %v6573_v29  ;;  %2494 = vmatprep.subr.bf16.mxu0 %v6575_v30  ;;  %v1009_v29 = vld [vmem:[#allocation7 + $0x740] sm:$0xff]  ;;  %v828_v9 = vld [vmem:[#allocation7 + $0x198] sm:$0xff] }
 0x271   :  { %v1013_v30 = vld [vmem:[#allocation7 + $0x760] sm:$0xff] }
 0x273   :  { %2409 = vmatpush1.bf16.msra.mxu1 %v6572_v35  ;;  %2495 = vmatpush1.bf16.msra.mxu0 %v6574_v36  ;;  %v8434_v35 = vsub.s32 2, %v8405_v37  ;;  %v6637_v36 = vcombine.high %v1009_v29, %v1013_v30 }
 0x274   :  { %2410 = vmatprep.subr.bf16.mxu1 %v6581_v41  ;;  %2496 = vmatprep.subr.bf16.mxu0 %v6583_v42  ;;  %v6639_v41 = vcombine.high %v1010_v31, %v1014_v32  ;;  %v1017_v42 = vld [vmem:[#allocation7 + $0x780] sm:$0xff] }
 0x275   :  { %v6644_v62 = vcombine.low %v1017_v42, %v1021_v44 }
 0x277   :  { %2411 = vmatpush1.bf16.msra.mxu1 %v6580_v47  ;;  %2497 = vmatpush1.bf16.msra.mxu0 %v6582_v48  ;;  %v6636_v47 = vcombine.low %v1009_v29, %v1013_v30  ;;  %v6638_v48 = vcombine.low %v1010_v31, %v1014_v32  ;;  %v799_v29 = vld [vmem:[#allocation7 + $0xb0] sm:$0xff]  ;;  %v796_v30 = vld [vmem:[#allocation7 + $0x98] sm:$0xff] }
 0x278   :  { %2412 = vmatprep.subr.bf16.mxu1 %v6589_v49  ;;  %2498 = vmatprep.subr.bf16.mxu0 %v6591_v50  ;;  %v350_v49 = vrot.slane %v8410_v39, %v8434_v35  ;;  %v6645_v50 = vcombine.high %v1017_v42, %v1021_v44  ;;  %v800_v31 = vld [vmem:[#allocation7 + $0xb8] sm:$0xff]  ;;  %v807_v42 = vld [vmem:[#allocation7 + $0xf0] sm:$0xff] }
 0x279   :  { %v804_v44 = vld [vmem:[#allocation7 + $0xd8] sm:$0xff] }
 0x27b   :  { %2413 = vmatpush1.bf16.msra.mxu1 %v6588_v55  ;;  %2499 = vmatpush1.bf16.msra.mxu0 %v6590_v56  ;;  %v354_v55 = vrot.slane %v8410_v39, %v8437_v43  ;;  %v1026_v56 = vld [vmem:[#allocation7 + $0x7c8] sm:$0xff]  ;;  %v780_v39 = vld [vmem:[#allocation7 + $0x18] sm:$0xff] }
 0x27c   :  { %2414 = vmatprep.subr.bf16.mxu1 %v6597_v57  ;;  %2500 = vmatprep.subr.bf16.mxu0 %v6599_v58  ;;  %v1030_v57 = vld [vmem:[#allocation7 + $0x7e8] sm:$0xff] }
 0x27d   :  { %v6654_v2 = vcombine.low %v1026_v56, %v1030_v57 }
 0x27f   :  { %2415 = vmatpush1.bf16.msra.mxu1 %v6596_v1  ;;  %2501 = vmatpush1.bf16.msra.mxu0 %v6598_v5 }
 0x280   :  { %2416 = vmatprep.subr.bf16.mxu1 %v6605_v6  ;;  %2502 = vmatprep.subr.bf16.mxu0 %v6607_v8  ;;  %v6655_v8 = vcombine.high %v1026_v56, %v1030_v57  ;;  %v819_v57 = vld [vmem:[#allocation7 + $0x150] sm:$0xff] }
 0x283   :  { %2417 = vmatpush1.bf16.msra.mxu1 %v6604_v15  ;;  %2503 = vmatpush1.bf16.msra.mxu0 %v6606_v16  ;;  %v784_v15 = vld [vmem:[#allocation7 + $0x38] sm:$0xff] }
 0x284   :  { %2418 = vmatprep.subr.bf16.mxu1 %v6613_v17  ;;  %2504 = vmatprep.subr.bf16.mxu0 %v6615_v18  ;;  %v6652_v18 = vcombine.low %v1025_v52, %v1029_v53  ;;  %v6411_v7 = vcombine.high %v780_v39, %v784_v15  ;;  %v816_v52 = vld [vmem:[#allocation7 + $0x138] sm:$0xff] }
 0x287   :  { %2419 = vmatpush1.bf16.msra.mxu1 %v6612_v10  ;;  %2505 = vmatpush1.bf16.msra.mxu0 %v6614_v11  ;;  %v787_v11 = vld [vmem:[#allocation7 + $0x50] sm:$0xff] }
 0x288   :  { %2420 = vmatprep.subr.bf16.mxu1 %v6621_v19  ;;  %2506 = vmatprep.subr.bf16.mxu0 %v6623_v20  ;;  %v791_v19 = vld [vmem:[#allocation7 + $0x70] sm:$0xff]  ;;  %v788_v20 = vld [vmem:[#allocation7 + $0x58] sm:$0xff] }
 0x289   :  { %v6416_v32 = vcombine.low %v787_v11, %v791_v19 }
 0x28b   :  { %2421 = vmatpush1.bf16.msra.mxu1 %v6620_v25  ;;  %2507 = vmatpush1.bf16.msra.mxu0 %v6622_v26  ;;  %v6410_v25 = vcombine.low %v780_v39, %v784_v15  ;;  %v6417_v26 = vcombine.high %v787_v11, %v791_v19  ;;  %v843_v11 = vld [vmem:[#allocation7 + $0x210] sm:$0xff] }
 0x28c   :  { %2422 = vmatprep.subr.bf16.mxu1 %v6629_v27  ;;  %2508 = vmatprep.subr.bf16.mxu0 %v6631_v28  ;;  %v6419_v27 = vcombine.high %v788_v20, %v792_v21  ;;  %v795_v28 = vld [vmem:[#allocation7 + $0x90] sm:$0xff] }
 0x28d   :  { %v6424_v46 = vcombine.low %v795_v28, %v799_v29  ;;  %v847_v19 = vld [vmem:[#allocation7 + $0x230] sm:$0xff] }
 0x28f   :  { %2423 = vmatpush1.bf16.msra.mxu1 %v6628_v33  ;;  %2509 = vmatpush1.bf16.msra.mxu0 %v6630_v34  ;;  %v6418_v33 = vcombine.low %v788_v20, %v792_v21  ;;  %v6425_v34 = vcombine.high %v795_v28, %v799_v29  ;;  %v844_v20 = vld [vmem:[#allocation7 + $0x218] sm:$0xff]  ;;  %v851_v28 = vld [vmem:[#allocation7 + $0x250] sm:$0xff] }
 0x290   :  { %2424 = vmatprep.subr.bf16.mxu1 %v6637_v36  ;;  %2510 = vmatprep.subr.bf16.mxu0 %v6639_v41  ;;  %v6427_v36 = vcombine.high %v796_v30, %v800_v31  ;;  %v803_v41 = vld [vmem:[#allocation7 + $0xd0] sm:$0xff]  ;;  %v848_v21 = vld [vmem:[#allocation7 + $0x238] sm:$0xff] }
 0x291   :  { %v756_v54 = vpop.f32.mrb[8].mxu0  ;;  %v6432_v53 = vcombine.low %v803_v41, %v807_v42  ;;  %v855_v29 = vld [vmem:[#allocation7 + $0x270] sm:$0xff] }
 0x292   :  { %v758_v58 = vpop.f32.mrb[9].mxu0  ;;  %v757_v1 = vadd.f32 %v756_v54, %v350_v49  ;;  %v6434_v54 = vcombine.low %v804_v44, %v808_v45 }
 0x293   :  { %v760_v61 = vpop.f32.mrb[10].mxu0  ;;  %2425 = vmatpush1.bf16.msra.mxu1 %v6636_v47  ;;  %2511 = vmatpush1.bf16.msra.mxu0 %v6638_v48  ;;  %v759_v12 = vadd.f32 %v758_v58, %v354_v55  ;;  %v6426_v47 = vcombine.low %v796_v30, %v800_v31  ;;  %v6433_v48 = vcombine.high %v803_v41, %v807_v42  ;;  %v823_v58 = vld [vmem:[#allocation7 + $0x170] sm:$0xff]  ;;  %v852_v30 = vld [vmem:[#allocation7 + $0x258] sm:$0xff] }
 0x294   :  { %v761_v5 = vadd.f32 %v760_v61, %v350_v49  ;;  %v762_v6 = vpop.f32.mrb[11].mxu0  ;;  %2426 = vmatprep.subr.bf16.mxu1 %v6645_v50  ;;  %2512 = vmatprep.subr.bf16.mxu0 %v6647_v51  ;;  %v6435_v49 = vcombine.high %v804_v44, %v808_v45  ;;  %v811_v50 = vld [vmem:[#allocation7 + $0x110] sm:$0xff]  ;;  %v820_v61 = vld [vmem:[#allocation7 + $0x158] sm:$0xff] }
 0x295   :  { %v763_v13 = vadd.f32 %v762_v6, %v354_v55  ;;  %v815_v51 = vld [vmem:[#allocation7 + $0x130] sm:$0xff]  ;;  %v856_v31 = vld [vmem:[#allocation7 + $0x278] sm:$0xff] }
 0x296   :  { %v767_v16 = vpack.c.bf16 %v761_v5, %v757_v1  ;;  %v6441_v55 = vcombine.high %v811_v50, %v815_v51  ;;  %v6449_v1 = vcombine.high %v819_v57, %v823_v58  ;;  %v827_v6 = vld [vmem:[#allocation7 + $0x190] sm:$0xff]  ;;  %v860_v44 = vld [vmem:[#allocation7 + $0x298] sm:$0xff] }
 0x297   :  { %v768_v17 = vpack.c.bf16 %v763_v13, %v759_v12  ;;  %2427 = vmatpush1.bf16.msra.mxu1 %v6644_v62  ;;  %2513 = vmatpush1.bf16.msra.mxu0 %v6646_v63  ;;  %v824_v62 = vld [vmem:[#allocation7 + $0x178] sm:$0xff]  ;;  %v6440_v63 = vcombine.low %v811_v50, %v815_v51  ;;  %v6448_v13 = vcombine.low %v819_v57, %v823_v58  ;;  %v859_v41 = vld [vmem:[#allocation7 + $0x290] sm:$0xff] }
 0x298   :  { %v771_v3 = vmul.bf16 1045249613, %v767_v16  ;;  %2428 = vmatprep.subr.bf16.mxu1 %v6653_v0  ;;  %2514 = vmatprep.subr.bf16.mxu0 %v6655_v8  ;;  %v6451_v5 = vcombine.high %v820_v61, %v824_v62  ;;  %v831_v8 = vld [vmem:[#allocation7 + $0x1b0] sm:$0xff]  ;;  %v832_v12 = vld [vmem:[#allocation7 + $0x1b8] sm:$0xff]  ;;  %v6450_v14 = vcombine.low %v820_v61, %v824_v62 }
 0x299   :  { %v772_v10 = vmul.bf16 1045249613, %v768_v17  ;;  %v6457_v39 = vcombine.high %v827_v6, %v831_v8  ;;  %v6459_v15 = vcombine.high %v828_v9, %v832_v12  ;;  %v863_v42 = vld [vmem:[#allocation7 + $0x2b0] sm:$0xff]  ;;  %v864_v45 = vld [vmem:[#allocation7 + $0x2b8] sm:$0xff] }
 0x29a   :  { %v8445_v24 = vmax.bf16 %v771_v3, %v767_v16  ;;  %v835_v16 = vld [vmem:[#allocation7 + $0x1d0] sm:$0xff]  ;;  %v6456_v3 = vcombine.low %v827_v6, %v831_v8  ;;  %v876_v61 = vld [vmem:[#allocation7 + $0x318] sm:$0xff] }
 0x29b   :  { %v8443_v22 = vmax.bf16 %v772_v10, %v768_v17  ;;  %2429 = vmatpush1.bf16.msra.mxu1 %v6652_v18  ;;  %2515 = vmatpush1.bf16.msra.mxu0 %v6654_v2  ;;  %v839_v17 = vld [vmem:[#allocation7 + $0x1f0] sm:$0xff]  ;;  %v836_v18 = vld [vmem:[#allocation7 + $0x1d8] sm:$0xff] }
 0x29c   :  { %2527 = vmatprep.subr.bf16.mxu1 %v6409_v4  ;;  %2613 = vmatprep.subr.bf16.mxu0 %v6411_v7  ;;  %v840_v2 = vld [vmem:[#allocation7 + $0x1f8] sm:$0xff]  ;;  %v6458_v4 = vcombine.low %v828_v9, %v832_v12  ;;  %v6465_v7 = vcombine.high %v835_v16, %v839_v17  ;;  %v867_v50 = vld [vmem:[#allocation7 + $0x2d0] sm:$0xff] }
 0x29d   :  { %2430 = vmatprep.mubr.bf16.mxu1 %v8443_v22  ;;  %2516 = vmatprep.mubr.bf16.mxu0 %v8443_v22  ;;  %v6467_v10 = vcombine.high %v836_v18, %v840_v2  ;;  %v871_v51 = vld [vmem:[#allocation7 + $0x2f0] sm:$0xff]  ;;  %v880_v62 = vld [vmem:[#allocation7 + $0x338] sm:$0xff] }
 0x29e   :  { %2431 = vmatmul.mubr.bf16.vlgmr.msra.gmra.mrb[0].mxu1 %v8445_v24  ;;  %2517 = vmatmul.mubr.bf16.vlgmr.msra.gmra.mrb[12].mxu0 %v8445_v24  ;;  %v875_v57 = vld [vmem:[#allocation7 + $0x310] sm:$0xff]  ;;  %v884_v9 = vld [vmem:[#allocation7 + $0x358] sm:$0xff] }
 0x29f   :  { %2528 = vmatpush1.bf16.msra.mxu1 %v6408_v23  ;;  %2559 = vmatprep.mubr.bf16.mxu1 %v8419_v59  ;;  %v6464_v23 = vcombine.low %v835_v16, %v839_v17  ;;  %v879_v58 = vld [vmem:[#allocation7 + $0x330] sm:$0xff]  ;;  %v888_v12 = vld [vmem:[#allocation7 + $0x378] sm:$0xff] }
 0x2a0   :  { %2614 = vmatpush1.bf16.msra.mxu0 %v6410_v25  ;;  %2645 = vmatprep.mubr.bf16.mxu0 %v8419_v59  ;;  %v812_v59 = vld [vmem:[#allocation7 + $0x118] sm:$0xff]  ;;  %v6466_v25 = vcombine.low %v836_v18, %v840_v2  ;;  %v883_v6 = vld [vmem:[#allocation7 + $0x350] sm:$0xff] }
 0x2a1   :  { %2529 = vmatprep.subr.bf16.mxu1 %v6417_v26  ;;  %2615 = vmatprep.subr.bf16.mxu0 %v6419_v27  ;;  %v6443_v56 = vcombine.high %v812_v59, %v816_v52  ;;  %v6442_v0 = vcombine.low %v812_v59, %v816_v52  ;;  %v6473_v26 = vcombine.high %v843_v11, %v847_v19  ;;  %v868_v59 = vld [vmem:[#allocation7 + $0x2d8] sm:$0xff]  ;;  %v887_v8 = vld [vmem:[#allocation7 + $0x370] sm:$0xff] }
 0x2a2   :  { %v6475_v27 = vcombine.high %v844_v20, %v848_v21  ;;  %v872_v52 = vld [vmem:[#allocation7 + $0x2f8] sm:$0xff]  ;;  %v891_v16 = vld [vmem:[#allocation7 + $0x390] sm:$0xff] }
 0x2a3   :  { %2530 = vmatpush1.bf16.msra.mxu1 %v6416_v32  ;;  %v6472_v32 = vcombine.low %v843_v11, %v847_v19  ;;  %v895_v17 = vld [vmem:[#allocation7 + $0x3b0] sm:$0xff]  ;;  %v892_v18 = vld [vmem:[#allocation7 + $0x398] sm:$0xff] }
 0x2a4   :  { %2616 = vmatpush1.bf16.msra.mxu0 %v6418_v33  ;;  %2531 = vmatprep.subr.bf16.mxu1 %v6425_v34  ;;  %v6474_v33 = vcombine.low %v844_v20, %v848_v21  ;;  %v6481_v34 = vcombine.high %v851_v28, %v855_v29  ;;  %v896_v2 = vld [vmem:[#allocation7 + $0x3b8] sm:$0xff]  ;;  %v899_v11 = vld [vmem:[#allocation7 + $0x3d0] sm:$0xff] }
 0x2a5   :  { %2617 = vmatprep.subr.bf16.mxu0 %v6427_v36  ;;  %v6483_v36 = vcombine.high %v852_v30, %v856_v31  ;;  %v903_v19 = vld [vmem:[#allocation7 + $0x3f0] sm:$0xff]  ;;  %v900_v20 = vld [vmem:[#allocation7 + $0x3d8] sm:$0xff] }
 0x2a6   :  { %v904_v21 = vld [vmem:[#allocation7 + $0x3f8] sm:$0xff] }
 0x2a7   :  { %2532 = vmatpush1.bf16.msra.mxu1 %v6424_v46  ;;  %v6480_v46 = vcombine.low %v851_v28, %v855_v29  ;;  %v907_v28 = vld [vmem:[#allocation7 + $0x410] sm:$0xff] }
 0x2a8   :  { %2618 = vmatpush1.bf16.msra.mxu0 %v6426_v47  ;;  %2533 = vmatprep.subr.bf16.mxu1 %v6433_v48  ;;  %v6482_v47 = vcombine.low %v852_v30, %v856_v31  ;;  %v6489_v48 = vcombine.high %v859_v41, %v863_v42  ;;  %v911_v29 = vld [vmem:[#allocation7 + $0x430] sm:$0xff]  ;;  %v908_v30 = vld [vmem:[#allocation7 + $0x418] sm:$0xff] }
 0x2a9   :  { %2619 = vmatprep.subr.bf16.mxu0 %v6435_v49  ;;  %v6491_v49 = vcombine.high %v860_v44, %v864_v45  ;;  %v912_v31 = vld [vmem:[#allocation7 + $0x438] sm:$0xff] }
 0x2ab   :  { %2534 = vmatpush1.bf16.msra.mxu1 %v6432_v53  ;;  %v6488_v53 = vcombine.low %v859_v41, %v863_v42  ;;  %v915_v41 = vld [vmem:[#allocation7 + $0x450] sm:$0xff] }
 0x2ac   :  { %2620 = vmatpush1.bf16.msra.mxu0 %v6434_v54  ;;  %2535 = vmatprep.subr.bf16.mxu1 %v6441_v55  ;;  %v6490_v54 = vcombine.low %v860_v44, %v864_v45  ;;  %v6497_v55 = vcombine.high %v867_v50, %v871_v51  ;;  %v919_v42 = vld [vmem:[#allocation7 + $0x470] sm:$0xff]  ;;  %v6536_v44 = vcombine.low %v907_v28, %v911_v29  ;;  %v916_v45 = vld [vmem:[#allocation7 + $0x458] sm:$0xff] }
 0x2ad   :  { %2621 = vmatprep.subr.bf16.mxu0 %v6443_v56  ;;  %v6499_v56 = vcombine.high %v868_v59, %v872_v52 }
 0x2af   :  { %2536 = vmatpush1.bf16.msra.mxu1 %v6440_v63  ;;  %v6496_v63 = vcombine.low %v867_v50, %v871_v51  ;;  %v927_v50 = vld [vmem:[#allocation7 + $0x4b0] sm:$0xff] }
 0x2b0   :  { %2622 = vmatpush1.bf16.msra.mxu0 %v6442_v0  ;;  %2537 = vmatprep.subr.bf16.mxu1 %v6449_v1  ;;  %v6498_v0 = vcombine.low %v868_v59, %v872_v52  ;;  %v6505_v1 = vcombine.high %v875_v57, %v879_v58  ;;  %v924_v59 = vld [vmem:[#allocation7 + $0x498] sm:$0xff] }
 0x2b1   :  { %2623 = vmatprep.subr.bf16.mxu0 %v6451_v5  ;;  %v6507_v5 = vcombine.high %v876_v61, %v880_v62  ;;  %v928_v52 = vld [vmem:[#allocation7 + $0x4b8] sm:$0xff] }
 0x2b3   :  { %2538 = vmatpush1.bf16.msra.mxu1 %v6448_v13  ;;  %v6504_v13 = vcombine.low %v875_v57, %v879_v58  ;;  %v931_v57 = vld [vmem:[#allocation7 + $0x4d0] sm:$0xff] }
 0x2b4   :  { %2624 = vmatpush1.bf16.msra.mxu0 %v6450_v14  ;;  %2539 = vmatprep.subr.bf16.mxu1 %v6457_v39  ;;  %v6506_v14 = vcombine.low %v876_v61, %v880_v62  ;;  %v6513_v39 = vcombine.high %v883_v6, %v887_v8  ;;  %v935_v58 = vld [vmem:[#allocation7 + $0x4f0] sm:$0xff]  ;;  %v932_v61 = vld [vmem:[#allocation7 + $0x4d8] sm:$0xff] }
 0x2b5   :  { %2625 = vmatprep.subr.bf16.mxu0 %v6459_v15  ;;  %v6515_v15 = vcombine.high %v884_v9, %v888_v12  ;;  %v936_v62 = vld [vmem:[#allocation7 + $0x4f8] sm:$0xff] }
 0x2b7   :  { %2540 = vmatpush1.bf16.msra.mxu1 %v6456_v3  ;;  %v6512_v3 = vcombine.low %v883_v6, %v887_v8  ;;  %v943_v6 = vld [vmem:[#allocation7 + $0x530] sm:$0xff]  ;;  %v940_v8 = vld [vmem:[#allocation7 + $0x518] sm:$0xff] }
 0x2b8   :  { %2626 = vmatpush1.bf16.msra.mxu0 %v6458_v4  ;;  %2541 = vmatprep.subr.bf16.mxu1 %v6465_v7  ;;  %v6514_v4 = vcombine.low %v884_v9, %v888_v12  ;;  %v6521_v7 = vcombine.high %v891_v16, %v895_v17  ;;  %v944_v9 = vld [vmem:[#allocation7 + $0x538] sm:$0xff]  ;;  %v6562_v12 = vcombine.low %v932_v61, %v936_v62 }
 0x2b9   :  { %2627 = vmatprep.subr.bf16.mxu0 %v6467_v10  ;;  %v6523_v10 = vcombine.high %v892_v18, %v896_v2 }
 0x2bb   :  { %2542 = vmatpush1.bf16.msra.mxu1 %v6464_v23  ;;  %v6520_v23 = vcombine.low %v891_v16, %v895_v17  ;;  %v948_v16 = vld [vmem:[#allocation7 + $0x558] sm:$0xff] }
 0x2bc   :  { %2628 = vmatpush1.bf16.msra.mxu0 %v6466_v25  ;;  %2543 = vmatprep.subr.bf16.mxu1 %v6473_v26  ;;  %v6522_v25 = vcombine.low %v892_v18, %v896_v2  ;;  %v6529_v26 = vcombine.high %v899_v11, %v903_v19  ;;  %v952_v17 = vld [vmem:[#allocation7 + $0x578] sm:$0xff]  ;;  %v6570_v2 = vcombine.low %v940_v8, %v944_v9 }
 0x2bd   :  { %2629 = vmatprep.subr.bf16.mxu0 %v6475_v27  ;;  %v6531_v27 = vcombine.high %v900_v20, %v904_v21 }
 0x2bf   :  { %2544 = vmatpush1.bf16.msra.mxu1 %v6472_v32  ;;  %v6528_v32 = vcombine.low %v899_v11, %v903_v19  ;;  %v956_v11 = vld [vmem:[#allocation7 + $0x598] sm:$0xff] }
 0x2c0   :  { %2630 = vmatpush1.bf16.msra.mxu0 %v6474_v33  ;;  %2545 = vmatprep.subr.bf16.mxu1 %v6481_v34  ;;  %v6530_v33 = vcombine.low %v900_v20, %v904_v21  ;;  %v6537_v34 = vcombine.high %v907_v28, %v911_v29  ;;  %v960_v19 = vld [vmem:[#allocation7 + $0x5b8] sm:$0xff]  ;;  %v6578_v21 = vcombine.low %v948_v16, %v952_v17 }
 0x2c1   :  { %2631 = vmatprep.subr.bf16.mxu0 %v6483_v36  ;;  %v6539_v36 = vcombine.high %v908_v30, %v912_v31  ;;  %v964_v28 = vld [vmem:[#allocation7 + $0x5d8] sm:$0xff] }
 0x2c2   :  { %v968_v29 = vld [vmem:[#allocation7 + $0x5f8] sm:$0xff] }
 0x2c3   :  { %2546 = vmatpush1.bf16.msra.mxu1 %v6480_v46  ;;  %v920_v46 = vld [vmem:[#allocation7 + $0x478] sm:$0xff] }
 0x2c4   :  { %2632 = vmatpush1.bf16.msra.mxu0 %v6482_v47  ;;  %2547 = vmatprep.subr.bf16.mxu1 %v6489_v48  ;;  %v6538_v47 = vcombine.low %v908_v30, %v912_v31  ;;  %v6545_v48 = vcombine.high %v915_v41, %v919_v42  ;;  %v6547_v51 = vcombine.high %v916_v45, %v920_v46 }
 0x2c5   :  { %2633 = vmatprep.subr.bf16.mxu0 %v6491_v49  ;;  %v923_v49 = vld [vmem:[#allocation7 + $0x490] sm:$0xff]  ;;  %v6586_v31 = vcombine.low %v956_v11, %v960_v19 }
 0x2c7   :  { %2548 = vmatpush1.bf16.msra.mxu1 %v6488_v53  ;;  %v6544_v53 = vcombine.low %v915_v41, %v919_v42  ;;  %v972_v41 = vld [vmem:[#allocation7 + $0x618] sm:$0xff] }
 0x2c8   :  { %2634 = vmatpush1.bf16.msra.mxu0 %v6490_v54  ;;  %2549 = vmatprep.subr.bf16.mxu1 %v6497_v55  ;;  %v6546_v54 = vcombine.low %v916_v45, %v920_v46  ;;  %v6553_v55 = vcombine.high %v923_v49, %v927_v50  ;;  %v976_v42 = vld [vmem:[#allocation7 + $0x638] sm:$0xff]  ;;  %v6594_v45 = vcombine.low %v964_v28, %v968_v29 }
 0x2c9   :  { %2635 = vmatprep.subr.bf16.mxu0 %v6499_v56  ;;  %v6555_v56 = vcombine.high %v924_v59, %v928_v52 }
 0x2cb   :  { %2550 = vmatpush1.bf16.msra.mxu1 %v6496_v63  ;;  %v6552_v63 = vcombine.low %v923_v49, %v927_v50  ;;  %v983_v49 = vld [vmem:[#allocation7 + $0x670] sm:$0xff]  ;;  %v980_v50 = vld [vmem:[#allocation7 + $0x658] sm:$0xff] }
 0x2cc   :  { %2636 = vmatpush1.bf16.msra.mxu0 %v6498_v0  ;;  %2551 = vmatprep.subr.bf16.mxu1 %v6505_v1  ;;  %v6561_v0 = vcombine.high %v931_v57, %v935_v58  ;;  %v6563_v1 = vcombine.high %v932_v61, %v936_v62 }
 0x2cd   :  { %2637 = vmatprep.subr.bf16.mxu0 %v6507_v5  ;;  %v939_v5 = vld [vmem:[#allocation7 + $0x510] sm:$0xff] }
 0x2ce   :  { %v6568_v18 = vcombine.low %v939_v5, %v943_v6 }
 0x2cf   :  { %2552 = vmatpush1.bf16.msra.mxu1 %v6504_v13  ;;  %v6569_v13 = vcombine.high %v939_v5, %v943_v6  ;;  %v996_v5 = vld [vmem:[#allocation7 + $0x6d8] sm:$0xff] }
 0x2d0   :  { %2638 = vmatpush1.bf16.msra.mxu0 %v6506_v14  ;;  %2553 = vmatprep.subr.bf16.mxu1 %v6513_v39  ;;  %v6571_v14 = vcombine.high %v940_v8, %v944_v9  ;;  %v947_v39 = vld [vmem:[#allocation7 + $0x550] sm:$0xff]  ;;  %v1000_v6 = vld [vmem:[#allocation7 + $0x6f8] sm:$0xff] }
 0x2d1   :  { %2639 = vmatprep.subr.bf16.mxu0 %v6515_v15  ;;  %v951_v15 = vld [vmem:[#allocation7 + $0x570] sm:$0xff] }
 0x2d2   :  { %v6576_v20 = vcombine.low %v947_v39, %v951_v15 }
 0x2d3   :  { %2554 = vmatpush1.bf16.msra.mxu1 %v6512_v3  ;;  %v6577_v3 = vcombine.high %v947_v39, %v951_v15  ;;  %v1004_v39 = vld [vmem:[#allocation7 + $0x718] sm:$0xff] }
 0x2d4   :  { %2640 = vmatpush1.bf16.msra.mxu0 %v6514_v4  ;;  %2555 = vmatprep.subr.bf16.mxu1 %v6521_v7  ;;  %v6579_v4 = vcombine.high %v948_v16, %v952_v17  ;;  %v955_v7 = vld [vmem:[#allocation7 + $0x590] sm:$0xff]  ;;  %v1008_v15 = vld [vmem:[#allocation7 + $0x738] sm:$0xff]  ;;  %v6626_v17 = vcombine.low %v996_v5, %v1000_v6 }
 0x2d5   :  { %2641 = vmatprep.subr.bf16.mxu0 %v6523_v10  ;;  %v959_v10 = vld [vmem:[#allocation7 + $0x5b0] sm:$0xff] }
 0x2d6   :  { %v6584_v30 = vcombine.low %v955_v7, %v959_v10 }
 0x2d7   :  { %2556 = vmatpush1.bf16.msra.mxu1 %v6520_v23  ;;  %v6585_v23 = vcombine.high %v955_v7, %v959_v10  ;;  %v1012_v7 = vld [vmem:[#allocation7 + $0x758] sm:$0xff] }
 0x2d8   :  { %2642 = vmatpush1.bf16.msra.mxu0 %v6522_v25  ;;  %2557 = vmatprep.subr.bf16.mxu1 %v6529_v26  ;;  %v6587_v25 = vcombine.high %v956_v11, %v960_v19  ;;  %v963_v26 = vld [vmem:[#allocation7 + $0x5d0] sm:$0xff]  ;;  %v1016_v10 = vld [vmem:[#allocation7 + $0x778] sm:$0xff]  ;;  %v6634_v19 = vcombine.low %v1004_v39, %v1008_v15 }
 0x2d9   :  { %2643 = vmatprep.subr.bf16.mxu0 %v6531_v27  ;;  %v967_v27 = vld [vmem:[#allocation7 + $0x5f0] sm:$0xff] }
 0x2db   :  { %2558 = vmatpush1.bf16.msra.mxu1 %v6528_v32  ;;  %v6593_v32 = vcombine.high %v963_v26, %v967_v27 }
 0x2dc   :  { %2644 = vmatpush1.bf16.msra.mxu0 %v6530_v33  ;;  %2570 = vmatprep.subr.bf16.mxu1 %v6537_v34  ;;  %v6595_v33 = vcombine.high %v964_v28, %v968_v29  ;;  %v971_v34 = vld [vmem:[#allocation7 + $0x610] sm:$0xff]  ;;  %v6642_v29 = vcombine.low %v1012_v7, %v1016_v10 }
 0x2dd   :  { %2656 = vmatprep.subr.bf16.mxu0 %v6539_v36  ;;  %v975_v36 = vld [vmem:[#allocation7 + $0x630] sm:$0xff] }
 0x2de   :  { %2560 = vmatmul.mubr.bf16.vlgmr.msra.gmra.mrb[4].mxu1 %v8421_v60  ;;  %v6601_v46 = vcombine.high %v971_v34, %v975_v36 }
 0x2df   :  { %2646 = vmatmul.mubr.bf16.vlgmr.msra.gmra.mrb[16].mxu0 %v8421_v60  ;;  %2571 = vmatpush1.bf16.msra.mxu1 %v6536_v44  ;;  %v6554_v60 = vcombine.low %v924_v59, %v928_v52  ;;  %v6592_v44 = vcombine.low %v963_v26, %v967_v27  ;;  %v6600_v59 = vcombine.low %v971_v34, %v975_v36  ;;  %v1020_v26 = vld [vmem:[#allocation7 + $0x798] sm:$0xff] }
 0x2e0   :  { %2602 = vmatprep.mubr.bf16.mxu1 %v8443_v22  ;;  %2657 = vmatpush1.bf16.msra.mxu0 %v6538_v47  ;;  %v6603_v47 = vcombine.high %v972_v41, %v976_v42  ;;  %v6602_v52 = vcombine.low %v972_v41, %v976_v42  ;;  %v1024_v27 = vld [vmem:[#allocation7 + $0x7b8] sm:$0xff] }
 0x2e1   :  { %2688 = vmatprep.mubr.bf16.mxu0 %v8443_v22  ;;  %2572 = vmatprep.subr.bf16.mxu1 %v6545_v48  ;;  %v6560_v22 = vcombine.low %v931_v57, %v935_v58  ;;  %v979_v48 = vld [vmem:[#allocation7 + $0x650] sm:$0xff]  ;;  %v988_v57 = vld [vmem:[#allocation7 + $0x698] sm:$0xff]  ;;  %v6650_v42 = vcombine.low %v1020_v26, %v1024_v27 }
 0x2e2   :  { %2658 = vmatprep.subr.bf16.mxu0 %v6547_v51  ;;  %v984_v51 = vld [vmem:[#allocation7 + $0x678] sm:$0xff]  ;;  %v6608_v61 = vcombine.low %v979_v48, %v983_v49 }
 0x2e3   :  { %2573 = vmatpush1.bf16.msra.mxu1 %v6544_v53  ;;  %v6609_v53 = vcombine.high %v979_v48, %v983_v49  ;;  %v992_v58 = vld [vmem:[#allocation7 + $0x6b8] sm:$0xff]  ;;  %v6610_v62 = vcombine.low %v980_v50, %v984_v51  ;;  %v7423_v48 = vld [vmem:[#allocation10 + $0x4] ss:$28 sps:$4 sm:$0xff]   ;;  %v7426_v49 = vld [vmem:[#allocation10 + $0xc] ss:$28 sps:$4 sm:$0xff]  }
 0x2e4   :  { %2659 = vmatpush1.bf16.msra.mxu0 %v6546_v54  ;;  %2574 = vmatprep.subr.bf16.mxu1 %v6553_v55  ;;  %v6611_v54 = vcombine.high %v980_v50, %v984_v51  ;;  %v987_v55 = vld [vmem:[#allocation7 + $0x690] sm:$0xff]  ;;  %v6618_v9 = vcombine.low %v988_v57, %v992_v58  ;;  %v1028_v34 = vld [vmem:[#allocation7 + $0x7d8] sm:$0xff]  ;;  %v7421_v50 = vld [vmem:[#allocation10] ss:$28 sps:$4 sm:$0xff]  }
 0x2e5   :  { %2660 = vmatprep.subr.bf16.mxu0 %v6555_v56  ;;  %v991_v56 = vld [vmem:[#allocation7 + $0x6b0] sm:$0xff]  ;;  %v1032_v36 = vld [vmem:[#allocation7 + $0x7f8] sm:$0xff] }
 0x2e6   :  { %v6616_v8 = vcombine.low %v987_v55, %v991_v56  ;;  %v7424_v51 = vld [vmem:[#allocation10 + $0x8] ss:$28 sps:$4 sm:$0xff]  }
 0x2e7   :  { %2575 = vmatpush1.bf16.msra.mxu1 %v6552_v63  ;;  %v6617_v63 = vcombine.high %v987_v55, %v991_v56  ;;  %v7435_v55 = vld [vmem:[#allocation10 + $0x74] ss:$28 sps:$4 sm:$0xff]   ;;  %v7438_v56 = vld [vmem:[#allocation10 + $0x7c] ss:$28 sps:$4 sm:$0xff]  }
 0x2e8   :  { %2661 = vmatpush1.bf16.msra.mxu0 %v6554_v60  ;;  %2576 = vmatprep.subr.bf16.mxu1 %v6561_v0  ;;  %v6619_v60 = vcombine.high %v988_v57, %v992_v58  ;;  %v995_v0 = vld [vmem:[#allocation7 + $0x6d0] sm:$0xff]  ;;  %v7436_v58 = vld [vmem:[#allocation10 + $0x78] ss:$28 sps:$4 sm:$0xff]  }
 0x2e9   :  { %2662 = vmatprep.subr.bf16.mxu0 %v6563_v1  ;;  %v999_v1 = vld [vmem:[#allocation7 + $0x6f0] sm:$0xff] }
 0x2ea   :  { %v6624_v16 = vcombine.low %v995_v0, %v999_v1  ;;  %v7433_v57 = vld [vmem:[#allocation10 + $0x70] ss:$28 sps:$4 sm:$0xff]  }
 0x2eb   :  { %2577 = vmatpush1.bf16.msra.mxu1 %v6560_v22  ;;  %v6625_v22 = vcombine.high %v995_v0, %v999_v1  ;;  %v7450_v0 = vld [vmem:[#allocation10 + $0xec] ss:$28 sps:$4 sm:$0xff]   ;;  %v7445_v1 = vld [vmem:[#allocation10 + $0xe0] ss:$28 sps:$4 sm:$0xff]  }
 0x2ec   :  { %2663 = vmatpush1.bf16.msra.mxu0 %v6562_v12  ;;  %2578 = vmatprep.subr.bf16.mxu1 %v6569_v13  ;;  %v6627_v12 = vcombine.high %v996_v5, %v1000_v6  ;;  %v1003_v13 = vld [vmem:[#allocation7 + $0x710] sm:$0xff]  ;;  %v7453_v6 = vld [vmem:[#allocation10 + $0x11c] ss:$28 sps:$4 sm:$0xff]  }
 0x2ed   :  { %2664 = vmatprep.subr.bf16.mxu0 %v6571_v14  ;;  %v1007_v14 = vld [vmem:[#allocation7 + $0x730] sm:$0xff] }
 0x2ee   :  { %v6632_v11 = vcombine.low %v1003_v13, %v1007_v14  ;;  %v7448_v5 = vld [vmem:[#allocation10 + $0xe8] ss:$28 sps:$4 sm:$0xff]  }
 0x2ef   :  { %2579 = vmatpush1.bf16.msra.mxu1 %v6568_v18  ;;  %v6633_v18 = vcombine.high %v1003_v13, %v1007_v14  ;;  %v7462_v13 = vld [vmem:[#allocation10 + $0x15c] ss:$28 sps:$4 sm:$0xff]   ;;  %v7457_v14 = vld [vmem:[#allocation10 + $0x150] ss:$28 sps:$4 sm:$0xff]  }
 0x2f0   :  { %2665 = vmatpush1.bf16.msra.mxu0 %v6570_v2  ;;  %2580 = vmatprep.subr.bf16.mxu1 %v6577_v3  ;;  %v6635_v2 = vcombine.high %v1004_v39, %v1008_v15  ;;  %v1011_v3 = vld [vmem:[#allocation7 + $0x750] sm:$0xff]  ;;  %v7460_v39 = vld [vmem:[#allocation10 + $0x158] ss:$28 sps:$4 sm:$0xff]  }
 0x2f1   :  { %2666 = vmatprep.subr.bf16.mxu0 %v6579_v4  ;;  %v1015_v4 = vld [vmem:[#allocation7 + $0x770] sm:$0xff] }
 0x2f2   :  { %v6640_v28 = vcombine.low %v1011_v3, %v1015_v4  ;;  %v7465_v15 = vld [vmem:[#allocation10 + $0x18c] ss:$28 sps:$4 sm:$0xff]  }
 0x2f3   :  { %2581 = vmatpush1.bf16.msra.mxu1 %v6576_v20  ;;  %v6641_v20 = vcombine.high %v1011_v3, %v1015_v4  ;;  %v7474_v3 = vld [vmem:[#allocation10 + $0x1cc] ss:$28 sps:$4 sm:$0xff]   ;;  %v7469_v4 = vld [vmem:[#allocation10 + $0x1c0] ss:$28 sps:$4 sm:$0xff]  }
 0x2f4   :  { %2667 = vmatpush1.bf16.msra.mxu0 %v6578_v21  ;;  %2582 = vmatprep.subr.bf16.mxu1 %v6585_v23  ;;  %v6643_v21 = vcombine.high %v1012_v7, %v1016_v10  ;;  %v1019_v23 = vld [vmem:[#allocation7 + $0x790] sm:$0xff]  ;;  %v7477_v10 = vld [vmem:[#allocation10 + $0x1fc] ss:$28 sps:$4 sm:$0xff]  }
 0x2f5   :  { %2668 = vmatprep.subr.bf16.mxu0 %v6587_v25  ;;  %v1023_v25 = vld [vmem:[#allocation7 + $0x7b0] sm:$0xff] }
 0x2f6   :  { %v6648_v41 = vcombine.low %v1019_v23, %v1023_v25  ;;  %v7472_v7 = vld [vmem:[#allocation10 + $0x1c8] ss:$28 sps:$4 sm:$0xff]  }
 0x2f7   :  { %2583 = vmatpush1.bf16.msra.mxu1 %v6584_v30  ;;  %v6649_v30 = vcombine.high %v1019_v23, %v1023_v25  ;;  %v7486_v23 = vld [vmem:[#allocation10 + $0x23c] ss:$28 sps:$4 sm:$0xff]   ;;  %v7481_v25 = vld [vmem:[#allocation10 + $0x230] ss:$28 sps:$4 sm:$0xff]  }
 0x2f8   :  { %2669 = vmatpush1.bf16.msra.mxu0 %v6586_v31  ;;  %2584 = vmatprep.subr.bf16.mxu1 %v6593_v32  ;;  %v6651_v31 = vcombine.high %v1020_v26, %v1024_v27  ;;  %v1027_v32 = vld [vmem:[#allocation7 + $0x7d0] sm:$0xff]  ;;  %v7484_v26 = vld [vmem:[#allocation10 + $0x238] ss:$28 sps:$4 sm:$0xff]  }
 0x2f9   :  { %2670 = vmatprep.subr.bf16.mxu0 %v6595_v33  ;;  %v1031_v33 = vld [vmem:[#allocation7 + $0x7f0] sm:$0xff] }
 0x2fa   :  { %v7489_v27 = vld [vmem:[#allocation10 + $0x26c] ss:$28 sps:$4 sm:$0xff]  }
 0x2fb   :  { %2585 = vmatpush1.bf16.msra.mxu1 %v6592_v44  ;;  %v6657_v44 = vcombine.high %v1027_v32, %v1031_v33 }
 0x2fc   :  { %2671 = vmatpush1.bf16.msra.mxu0 %v6594_v45  ;;  %2586 = vmatprep.subr.bf16.mxu1 %v6601_v46  ;;  %v6659_v45 = vcombine.high %v1028_v34, %v1032_v36  ;;  %v6656_v46 = vcombine.low %v1027_v32, %v1031_v33  ;;  %v7498_v32 = vld [vmem:[#allocation10 + $0x2ac] ss:$28 sps:$4 sm:$0xff]   ;;  %v7493_v33 = vld [vmem:[#allocation10 + $0x2a0] ss:$28 sps:$4 sm:$0xff]  }
 0x2fd   :  { %2672 = vmatprep.subr.bf16.mxu0 %v6603_v47  ;;  %v6658_v47 = vcombine.low %v1028_v34, %v1032_v36  ;;  %v7496_v34 = vld [vmem:[#allocation10 + $0x2a8] ss:$28 sps:$4 sm:$0xff]   ;;  %v7501_v36 = vld [vmem:[#allocation10 + $0x2dc] ss:$28 sps:$4 sm:$0xff]  }
 0x2ff   :  { %2587 = vmatpush1.bf16.msra.mxu1 %v6600_v59  ;;  %v7429_v59 = vld [vmem:[#allocation10 + $0x3c] ss:$28 sps:$4 sm:$0xff]  }
 0x300   :  { %2673 = vmatpush1.bf16.msra.mxu0 %v6602_v52  ;;  %2588 = vmatprep.subr.bf16.mxu1 %v6609_v53  ;;  %v7432_v52 = vld [vmem:[#allocation10 + $0x44] ss:$28 sps:$4 sm:$0xff]   ;;  %v7427_v53 = vld [vmem:[#allocation10 + $0x38] ss:$28 sps:$4 sm:$0xff]  }
 0x301   :  { %2674 = vmatprep.subr.bf16.mxu0 %v6611_v54  ;;  %v7430_v54 = vld [vmem:[#allocation10 + $0x40] ss:$28 sps:$4 sm:$0xff]  }
 0x303   :  { %2589 = vmatpush1.bf16.msra.mxu1 %v6608_v61  ;;  %v7441_v61 = vld [vmem:[#allocation10 + $0xac] ss:$28 sps:$4 sm:$0xff]  }
 0x304   :  { %2675 = vmatpush1.bf16.msra.mxu0 %v6610_v62  ;;  %2590 = vmatprep.subr.bf16.mxu1 %v6617_v63  ;;  %v7444_v62 = vld [vmem:[#allocation10 + $0xb4] ss:$28 sps:$4 sm:$0xff]   ;;  %v7439_v63 = vld [vmem:[#allocation10 + $0xa8] ss:$28 sps:$4 sm:$0xff]  }
 0x305   :  { %2676 = vmatprep.subr.bf16.mxu0 %v6619_v60  ;;  %v7447_v60 = vld [vmem:[#allocation10 + $0xe4] ss:$28 sps:$4 sm:$0xff]  }
 0x307   :  { %2591 = vmatpush1.bf16.msra.mxu1 %v6616_v8  ;;  %v7456_v8 = vld [vmem:[#allocation10 + $0x124] ss:$28 sps:$4 sm:$0xff]  }
 0x308   :  { %2677 = vmatpush1.bf16.msra.mxu0 %v6618_v9  ;;  %2592 = vmatprep.subr.bf16.mxu1 %v6625_v22  ;;  %v7451_v9 = vld [vmem:[#allocation10 + $0x118] ss:$28 sps:$4 sm:$0xff]   ;;  %v7454_v22 = vld [vmem:[#allocation10 + $0x120] ss:$28 sps:$4 sm:$0xff]  }
 0x309   :  { %2678 = vmatprep.subr.bf16.mxu0 %v6627_v12  ;;  %v7459_v12 = vld [vmem:[#allocation10 + $0x154] ss:$28 sps:$4 sm:$0xff]  }
 0x30b   :  { %2593 = vmatpush1.bf16.msra.mxu1 %v6624_v16  ;;  %v7468_v16 = vld [vmem:[#allocation10 + $0x194] ss:$28 sps:$4 sm:$0xff]  }
 0x30c   :  { %2679 = vmatpush1.bf16.msra.mxu0 %v6626_v17  ;;  %2594 = vmatprep.subr.bf16.mxu1 %v6633_v18  ;;  %v7463_v17 = vld [vmem:[#allocation10 + $0x188] ss:$28 sps:$4 sm:$0xff]   ;;  %v7466_v18 = vld [vmem:[#allocation10 + $0x190] ss:$28 sps:$4 sm:$0xff]  }
 0x30d   :  { %2680 = vmatprep.subr.bf16.mxu0 %v6635_v2  ;;  %v7471_v2 = vld [vmem:[#allocation10 + $0x1c4] ss:$28 sps:$4 sm:$0xff]  }
 0x30f   :  { %2595 = vmatpush1.bf16.msra.mxu1 %v6632_v11  ;;  %v7480_v11 = vld [vmem:[#allocation10 + $0x204] ss:$28 sps:$4 sm:$0xff]  }
 0x310   :  { %2681 = vmatpush1.bf16.msra.mxu0 %v6634_v19  ;;  %2596 = vmatprep.subr.bf16.mxu1 %v6641_v20  ;;  %v7475_v19 = vld [vmem:[#allocation10 + $0x1f8] ss:$28 sps:$4 sm:$0xff]   ;;  %v7478_v20 = vld [vmem:[#allocation10 + $0x200] ss:$28 sps:$4 sm:$0xff]  }
 0x311   :  { %2682 = vmatprep.subr.bf16.mxu0 %v6643_v21  ;;  %v7483_v21 = vld [vmem:[#allocation10 + $0x234] ss:$28 sps:$4 sm:$0xff]  }
 0x313   :  { %2597 = vmatpush1.bf16.msra.mxu1 %v6640_v28  ;;  %v7492_v28 = vld [vmem:[#allocation10 + $0x274] ss:$28 sps:$4 sm:$0xff]  }
 0x314   :  { %2683 = vmatpush1.bf16.msra.mxu0 %v6642_v29  ;;  %2598 = vmatprep.subr.bf16.mxu1 %v6649_v30  ;;  %v7487_v29 = vld [vmem:[#allocation10 + $0x268] ss:$28 sps:$4 sm:$0xff]   ;;  %v7490_v30 = vld [vmem:[#allocation10 + $0x270] ss:$28 sps:$4 sm:$0xff]  }
 0x315   :  { %2684 = vmatprep.subr.bf16.mxu0 %v6651_v31  ;;  %v7495_v31 = vld [vmem:[#allocation10 + $0x2a4] ss:$28 sps:$4 sm:$0xff]  }
 0x317   :  { %2599 = vmatpush1.bf16.msra.mxu1 %v6648_v41  ;;  %v7504_v41 = vld [vmem:[#allocation10 + $0x2e4] ss:$28 sps:$4 sm:$0xff]  }
 0x318   :  { %2685 = vmatpush1.bf16.msra.mxu0 %v6650_v42  ;;  %2600 = vmatprep.subr.bf16.mxu1 %v6657_v44  ;;  %v7499_v42 = vld [vmem:[#allocation10 + $0x2d8] ss:$28 sps:$4 sm:$0xff]   ;;  %v7502_v44 = vld [vmem:[#allocation10 + $0x2e0] ss:$28 sps:$4 sm:$0xff]  }
 0x319   :  { %2686 = vmatprep.subr.bf16.mxu0 %v6659_v45  ;;  %v7507_v45 = vld [vmem:[#allocation10 + $0x314] ss:$28 sps:$4 sm:$0xff]  }
 0x31b   :  { %2601 = vmatpush1.bf16.msra.mxu1 %v6656_v46  ;;  %v7510_v46 = vld [vmem:[#allocation10 + $0x31c] ss:$28 sps:$4 sm:$0xff]  }
 0x31c   :  { %2687 = vmatpush1.bf16.msra.mxu0 %v6658_v47  ;;  %5576 = vmatprep.subr.bf16.mxu1 %v7423_v48  ;;  %v7505_v47 = vld [vmem:[#allocation10 + $0x310] ss:$28 sps:$4 sm:$0xff]   ;;  %v7508_v48 = vld [vmem:[#allocation10 + $0x318] ss:$28 sps:$4 sm:$0xff]  }
 0x31d   :  { %5748 = vmatprep.subr.bf16.mxu0 %v7426_v49  ;;  %v7513_v49 = vld [vmem:[#allocation10 + $0x34c] ss:$28 sps:$4 sm:$0xff]  }
 0x31e   :  { %2603 = vmatmul.mubr.bf16.vlgmr.msra.gmra.mrb[4].mxu1 %v8445_v24 }
 0x31f   :  { %2689 = vmatmul.mubr.bf16.vlgmr.msra.gmra.mrb[16].mxu0 %v8445_v24  ;;  %5577 = vmatpush1.bf16.msra.mxu1 %v7421_v50  ;;  %v7442_v24 = vld [vmem:[#allocation10 + $0xb0] ss:$28 sps:$4 sm:$0xff]  }
 0x320   :  { %5749 = vmatpush1.bf16.msra.mxu0 %v7424_v51  ;;  %5578 = vmatprep.subr.bf16.mxu1 %v7429_v59  ;;  %v7516_v50 = vld [vmem:[#allocation10 + $0x354] ss:$28 sps:$4 sm:$0xff]   ;;  %v7511_v51 = vld [vmem:[#allocation10 + $0x348] ss:$28 sps:$4 sm:$0xff]  }
 0x321   :  { %5750 = vmatprep.subr.bf16.mxu0 %v7432_v52  ;;  %v7514_v59 = vld [vmem:[#allocation10 + $0x350] ss:$28 sps:$4 sm:$0xff]   ;;  %v7519_v52 = vld [vmem:[#allocation10 + $0x384] ss:$28 sps:$4 sm:$0xff]  }
 0x323   :  { %5579 = vmatpush1.bf16.msra.mxu1 %v7427_v53  ;;  %v7522_v53 = vld [vmem:[#allocation10 + $0x38c] ss:$28 sps:$4 sm:$0xff]  }
 0x324   :  { %5751 = vmatpush1.bf16.msra.mxu0 %v7430_v54  ;;  %5580 = vmatprep.subr.bf16.mxu1 %v7435_v55  ;;  %v8459_v54 = vld [vmem:[#allocation9] sm:$0xff] }
 0x325   :  { %5752 = vmatprep.subr.bf16.mxu0 %v7438_v56  ;;  %v1038_v55 = vrot.slane %v8459_v54, %v8408_v38  ;;  %v1046_v56 = vrot.slane %v8459_v54, %v8434_v35 }
 0x327   :  { %5581 = vmatpush1.bf16.msra.mxu1 %v7433_v57 }
 0x328   :  { %5753 = vmatpush1.bf16.msra.mxu0 %v7436_v58  ;;  %5582 = vmatprep.subr.bf16.mxu1 %v7441_v61  ;;  %v1042_v61 = vrot.slane %v8459_v54, %v8413_v40 }
 0x329   :  { %5754 = vmatprep.subr.bf16.mxu0 %v7444_v62  ;;  %v1050_v62 = vrot.slane %v8459_v54, %v8437_v43 }
 0x32b   :  { %5583 = vmatpush1.bf16.msra.mxu1 %v7439_v63 }
 0x32c   :  { %5755 = vmatpush1.bf16.msra.mxu0 %v7442_v24  ;;  %5584 = vmatprep.subr.bf16.mxu1 %v7447_v60 }
 0x32d   :  { %5756 = vmatprep.subr.bf16.mxu0 %v7450_v0 }
 0x32f   :  { %5585 = vmatpush1.bf16.msra.mxu1 %v7445_v1 }
 0x330   :  { %5757 = vmatpush1.bf16.msra.mxu0 %v7448_v5  ;;  %5586 = vmatprep.subr.bf16.mxu1 %v7453_v6 }
 0x331   :  { %5758 = vmatprep.subr.bf16.mxu0 %v7456_v8 }
 0x333   :  { %5587 = vmatpush1.bf16.msra.mxu1 %v7451_v9 }
 0x334   :  { %5759 = vmatpush1.bf16.msra.mxu0 %v7454_v22  ;;  %5588 = vmatprep.subr.bf16.mxu1 %v7459_v12 }
 0x335   :  { %5760 = vmatprep.subr.bf16.mxu0 %v7462_v13 }
 0x337   :  { %5589 = vmatpush1.bf16.msra.mxu1 %v7457_v14 }
 0x338   :  { %5761 = vmatpush1.bf16.msra.mxu0 %v7460_v39  ;;  %5590 = vmatprep.subr.bf16.mxu1 %v7465_v15 }
 0x339   :  { %5762 = vmatprep.subr.bf16.mxu0 %v7468_v16 }
 0x33b   :  { %5591 = vmatpush1.bf16.msra.mxu1 %v7463_v17 }
 0x33c   :  { %5763 = vmatpush1.bf16.msra.mxu0 %v7466_v18  ;;  %5592 = vmatprep.subr.bf16.mxu1 %v7471_v2 }
 0x33d   :  { %5764 = vmatprep.subr.bf16.mxu0 %v7474_v3 }
 0x33f   :  { %5593 = vmatpush1.bf16.msra.mxu1 %v7469_v4 }
 0x340   :  { %5765 = vmatpush1.bf16.msra.mxu0 %v7472_v7  ;;  %5594 = vmatprep.subr.bf16.mxu1 %v7477_v10  ;;  %v7517_v10 = vld [vmem:[#allocation10 + $0x380] ss:$28 sps:$4 sm:$0xff]  }
 0x341   :  { %5766 = vmatprep.subr.bf16.mxu0 %v7480_v11  ;;  %v7520_v11 = vld [vmem:[#allocation10 + $0x388] ss:$28 sps:$4 sm:$0xff]  }
 0x343   :  { %5595 = vmatpush1.bf16.msra.mxu1 %v7475_v19 }
 0x344   :  { %5767 = vmatpush1.bf16.msra.mxu0 %v7478_v20  ;;  %5596 = vmatprep.subr.bf16.mxu1 %v7483_v21  ;;  %v7525_v20 = vld [vmem:[#allocation10 + $0x3bc] ss:$28 sps:$4 sm:$0xff]   ;;  %v7528_v21 = vld [vmem:[#allocation10 + $0x3c4] ss:$28 sps:$4 sm:$0xff]  }
 0x345   :  { %5768 = vmatprep.subr.bf16.mxu0 %v7486_v23 }
 0x347   :  { %5597 = vmatpush1.bf16.msra.mxu1 %v7481_v25  ;;  %v7523_v25 = vld [vmem:[#allocation10 + $0x3b8] ss:$28 sps:$4 sm:$0xff]  }
 0x348   :  { %5769 = vmatpush1.bf16.msra.mxu0 %v7484_v26  ;;  %5598 = vmatprep.subr.bf16.mxu1 %v7489_v27  ;;  %v7526_v26 = vld [vmem:[#allocation10 + $0x3c0] ss:$28 sps:$4 sm:$0xff]   ;;  %v7531_v27 = vld [vmem:[#allocation10 + $0x3f4] ss:$28 sps:$4 sm:$0xff]  }
 0x349   :  { %5770 = vmatprep.subr.bf16.mxu0 %v7492_v28  ;;  %v7534_v28 = vld [vmem:[#allocation10 + $0x3fc] ss:$28 sps:$4 sm:$0xff]  }
 0x34b   :  { %5599 = vmatpush1.bf16.msra.mxu1 %v7487_v29  ;;  %v7529_v29 = vld [vmem:[#allocation10 + $0x3f0] ss:$28 sps:$4 sm:$0xff]  }
 0x34c   :  { %5771 = vmatpush1.bf16.msra.mxu0 %v7490_v30  ;;  %5600 = vmatprep.subr.bf16.mxu1 %v7495_v31  ;;  %v7532_v30 = vld [vmem:[#allocation10 + $0x3f8] ss:$28 sps:$4 sm:$0xff]   ;;  %v7537_v31 = vld [vmem:[#allocation10 + $0x42c] ss:$28 sps:$4 sm:$0xff]  }
 0x34d   :  { %5772 = vmatprep.subr.bf16.mxu0 %v7498_v32  ;;  %v7540_v32 = vld [vmem:[#allocation10 + $0x434] ss:$28 sps:$4 sm:$0xff]  }
 0x34f   :  { %5601 = vmatpush1.bf16.msra.mxu1 %v7493_v33  ;;  %v7535_v33 = vld [vmem:[#allocation10 + $0x428] ss:$28 sps:$4 sm:$0xff]  }
 0x350   :  { %5773 = vmatpush1.bf16.msra.mxu0 %v7496_v34  ;;  %5602 = vmatprep.subr.bf16.mxu1 %v7501_v36  ;;  %v7538_v34 = vld [vmem:[#allocation10 + $0x430] ss:$28 sps:$4 sm:$0xff]   ;;  %v7543_v36 = vld [vmem:[#allocation10 + $0x464] ss:$28 sps:$4 sm:$0xff]  }
 0x351   :  { %5774 = vmatprep.subr.bf16.mxu0 %v7504_v41  ;;  %v7546_v41 = vld [vmem:[#allocation10 + $0x46c] ss:$28 sps:$4 sm:$0xff]  }
 0x353   :  { %5603 = vmatpush1.bf16.msra.mxu1 %v7499_v42  ;;  %v7541_v42 = vld [vmem:[#allocation10 + $0x460] ss:$28 sps:$4 sm:$0xff]  }
 0x354   :  { %5775 = vmatpush1.bf16.msra.mxu0 %v7502_v44  ;;  %5604 = vmatprep.subr.bf16.mxu1 %v7507_v45  ;;  %v7544_v44 = vld [vmem:[#allocation10 + $0x468] ss:$28 sps:$4 sm:$0xff]   ;;  %v7549_v45 = vld [vmem:[#allocation10 + $0x49c] ss:$28 sps:$4 sm:$0xff]  }
 0x355   :  { %5776 = vmatprep.subr.bf16.mxu0 %v7510_v46  ;;  %v7552_v46 = vld [vmem:[#allocation10 + $0x4a4] ss:$28 sps:$4 sm:$0xff]  }
 0x357   :  { %5605 = vmatpush1.bf16.msra.mxu1 %v7505_v47  ;;  %v7547_v47 = vld [vmem:[#allocation10 + $0x498] ss:$28 sps:$4 sm:$0xff]  }
 0x358   :  { %5777 = vmatpush1.bf16.msra.mxu0 %v7508_v48  ;;  %5606 = vmatprep.subr.bf16.mxu1 %v7513_v49  ;;  %v7550_v48 = vld [vmem:[#allocation10 + $0x4a0] ss:$28 sps:$4 sm:$0xff]   ;;  %v7555_v49 = vld [vmem:[#allocation10 + $0x4d4] ss:$28 sps:$4 sm:$0xff]  }
 0x359   :  { %5778 = vmatprep.subr.bf16.mxu0 %v7516_v50  ;;  %v7558_v50 = vld [vmem:[#allocation10 + $0x4dc] ss:$28 sps:$4 sm:$0xff]  }
 0x35b   :  { %5607 = vmatpush1.bf16.msra.mxu1 %v7511_v51  ;;  %v7553_v51 = vld [vmem:[#allocation10 + $0x4d0] ss:$28 sps:$4 sm:$0xff]  }
 0x35c   :  { %5779 = vmatpush1.bf16.msra.mxu0 %v7514_v59  ;;  %5619 = vmatprep.subr.bf16.mxu1 %v7519_v52  ;;  %v7556_v59 = vld [vmem:[#allocation10 + $0x4d8] ss:$28 sps:$4 sm:$0xff]   ;;  %v7561_v52 = vld [vmem:[#allocation10 + $0x50c] ss:$28 sps:$4 sm:$0xff]  }
 0x35d   :  { %5791 = vmatprep.subr.bf16.mxu0 %v7522_v53  ;;  %v7564_v53 = vld [vmem:[#allocation10 + $0x514] ss:$28 sps:$4 sm:$0xff]  }
 0x371   :  { %v2432_v57 = vpop.f32.mrb[0].mxu1  ;;  %v2518_v58 = vpop.f32.mrb[12].mxu0 }
 0x372   :  { %v2434_v63 = vpop.f32.mrb[1].mxu1  ;;  %v2520_v24 = vpop.f32.mrb[13].mxu0  ;;  %v7204_v1 = vadd.f32 %v2432_v57, %v1038_v55  ;;  %v7208_v5 = vadd.f32 %v2518_v58, %v1046_v56  ;;  %v7567_v57 = vld [vmem:[#allocation10 + $0x544] ss:$28 sps:$4 sm:$0xff]   ;;  %v7570_v58 = vld [vmem:[#allocation10 + $0x54c] ss:$28 sps:$4 sm:$0xff]  }
 0x373   :  { %v2436_v60 = vpop.f32.mrb[2].mxu1  ;;  %v2522_v0 = vpop.f32.mrb[14].mxu0  ;;  %v7205_v12 = vadd.f32 %v2434_v63, %v1042_v61  ;;  %v7209_v13 = vadd.f32 %v2520_v24, %v1050_v62  ;;  %v7573_v63 = vld [vmem:[#allocation10 + $0x57c] ss:$28 sps:$4 sm:$0xff]   ;;  %v7576_v24 = vld [vmem:[#allocation10 + $0x584] ss:$28 sps:$4 sm:$0xff]  }
 0x374   :  { %v7206_v6 = vadd.f32 %v2436_v60, %v1038_v55  ;;  %v7210_v8 = vadd.f32 %v2522_v0, %v1046_v56  ;;  %v2438_v9 = vpop.f32.mrb[3].mxu1  ;;  %v2524_v22 = vpop.f32.mrb[15].mxu0  ;;  %v7559_v55 = vld [vmem:[#allocation10 + $0x508] ss:$28 sps:$4 sm:$0xff]   ;;  %v7562_v56 = vld [vmem:[#allocation10 + $0x510] ss:$28 sps:$4 sm:$0xff]  }
 0x375   :  { %v7207_v14 = vadd.f32 %v2438_v9, %v1042_v61  ;;  %v7211_v39 = vadd.f32 %v2524_v22, %v1050_v62  ;;  %v7565_v61 = vld [vmem:[#allocation10 + $0x540] ss:$28 sps:$4 sm:$0xff]   ;;  %v7568_v62 = vld [vmem:[#allocation10 + $0x548] ss:$28 sps:$4 sm:$0xff]   ;;  %v7571_v60 = vld [vmem:[#allocation10 + $0x578] ss:$28 sps:$4 sm:$0xff]  }
 0x376   :  { %v2699_v15 = vpack.c.bf16 %v7206_v6, %v7204_v1  ;;  %v8469_v16 = vpack.c.bf16 %v7210_v8, %v7208_v5  ;;  %v7574_v0 = vld [vmem:[#allocation10 + $0x580] ss:$28 sps:$4 sm:$0xff]   ;;  %v7579_v1 = vld [vmem:[#allocation10 + $0x5b4] ss:$28 sps:$4 sm:$0xff]   ;;  %v7585_v9 = vld [vmem:[#allocation10 + $0x5ec] ss:$28 sps:$4 sm:$0xff]  }
 0x377   :  { %v2700_v17 = vpack.c.bf16 %v7207_v14, %v7205_v12  ;;  %v2702_v18 = vpack.c.bf16 %v7211_v39, %v7209_v13  ;;  %v7582_v5 = vld [vmem:[#allocation10 + $0x5bc] ss:$28 sps:$4 sm:$0xff]   ;;  %v7577_v6 = vld [vmem:[#allocation10 + $0x5b0] ss:$28 sps:$4 sm:$0xff]   ;;  %v7583_v12 = vld [vmem:[#allocation10 + $0x5e8] ss:$28 sps:$4 sm:$0xff]  }
 0x378   :  { %v2707_v2 = vmul.bf16 1045249613, %v2699_v15  ;;  %v7580_v8 = vld [vmem:[#allocation10 + $0x5b8] ss:$28 sps:$4 sm:$0xff]   ;;  %v7586_v13 = vld [vmem:[#allocation10 + $0x5f0] ss:$28 sps:$4 sm:$0xff]  }
 0x379   :  { %v2708_v3 = vmul.bf16 1045249613, %v2700_v17  ;;  %v2710_v4 = vmul.bf16 1045249613, %v2702_v18  ;;  %v7588_v22 = vld [vmem:[#allocation10 + $0x5f4] ss:$28 sps:$4 sm:$0xff]  }
 0x37a   :  { %v8473_v19 = vmax.bf16 %v2707_v2, %v2699_v15  ;;  %v7591_v14 = vld [vmem:[#allocation10 + $0x624] ss:$28 sps:$4 sm:$0xff]   ;;  %v7594_v39 = vld [vmem:[#allocation10 + $0x62c] ss:$28 sps:$4 sm:$0xff]  }
 0x37b   :  { %v8471_v7 = vmax.bf16 %v2708_v3, %v2700_v17  ;;  %v8477_v23 = vmax.bf16 %v2710_v4, %v2702_v18  ;;  %v7589_v15 = vld [vmem:[#allocation10 + $0x620] ss:$28 sps:$4 sm:$0xff]   ;;  %v7592_v17 = vld [vmem:[#allocation10 + $0x628] ss:$28 sps:$4 sm:$0xff]   ;;  %v7595_v3 = vld [vmem:[#allocation10 + $0x658] ss:$28 sps:$4 sm:$0xff]  }
 0x37c   :  { %v7597_v18 = vld [vmem:[#allocation10 + $0x65c] ss:$28 sps:$4 sm:$0xff]   ;;  %v7600_v2 = vld [vmem:[#allocation10 + $0x664] ss:$28 sps:$4 sm:$0xff]  }
 0x37d   :  { %5608 = vmatprep.mubr.bf16.mxu1 %v8471_v7  ;;  %5780 = vmatprep.mubr.bf16.mxu0 %v8471_v7  ;;  %v7598_v4 = vld [vmem:[#allocation10 + $0x660] ss:$28 sps:$4 sm:$0xff]  }
 0x37e   :  { %5609 = vmatmul.mubr.bf16.vlgmr.msra.gmra.mrb[8].mxu1 %v8473_v19  ;;  %5781 = vmatmul.mubr.bf16.vlgmr.msra.gmra.mrb[20].mxu0 %v8473_v19 }
 0x37f   :  { %5620 = vmatpush1.bf16.msra.mxu1 %v7517_v10  ;;  %5792 = vmatpush1.bf16.msra.mxu0 %v7520_v11  ;;  %v7603_v10 = vld [vmem:[#allocation10 + $0x694] ss:$28 sps:$4 sm:$0xff]   ;;  %v7606_v11 = vld [vmem:[#allocation10 + $0x69c] ss:$28 sps:$4 sm:$0xff]  }
 0x380   :  { %5651 = vmatprep.mubr.bf16.mxu1 %v8477_v23  ;;  %5823 = vmatprep.mubr.bf16.mxu0 %v8477_v23 }
 0x381   :  { %5621 = vmatprep.subr.bf16.mxu1 %v7525_v20  ;;  %5793 = vmatprep.subr.bf16.mxu0 %v7528_v21  ;;  %v7601_v20 = vld [vmem:[#allocation10 + $0x690] ss:$28 sps:$4 sm:$0xff]   ;;  %v7604_v21 = vld [vmem:[#allocation10 + $0x698] ss:$28 sps:$4 sm:$0xff]  }
 0x383   :  { %5622 = vmatpush1.bf16.msra.mxu1 %v7523_v25  ;;  %5794 = vmatpush1.bf16.msra.mxu0 %v7526_v26  ;;  %v7609_v25 = vld [vmem:[#allocation10 + $0x6cc] ss:$28 sps:$4 sm:$0xff]   ;;  %v7612_v26 = vld [vmem:[#allocation10 + $0x6d4] ss:$28 sps:$4 sm:$0xff]  }
 0x384   :  { %5623 = vmatprep.subr.bf16.mxu1 %v7531_v27  ;;  %5795 = vmatprep.subr.bf16.mxu0 %v7534_v28  ;;  %v7607_v27 = vld [vmem:[#allocation10 + $0x6c8] ss:$28 sps:$4 sm:$0xff]   ;;  %v7610_v28 = vld [vmem:[#allocation10 + $0x6d0] ss:$28 sps:$4 sm:$0xff]  }
 0x387   :  { %5624 = vmatpush1.bf16.msra.mxu1 %v7529_v29  ;;  %5796 = vmatpush1.bf16.msra.mxu0 %v7532_v30  ;;  %v2709_v29 = vmul.bf16 1045249613, %v8469_v16  ;;  %v7615_v30 = vld [vmem:[#allocation10 + $0x704] ss:$28 sps:$4 sm:$0xff]  }
 0x388   :  { %5625 = vmatprep.subr.bf16.mxu1 %v7537_v31  ;;  %5797 = vmatprep.subr.bf16.mxu0 %v7540_v32  ;;  %v7618_v31 = vld [vmem:[#allocation10 + $0x70c] ss:$28 sps:$4 sm:$0xff]   ;;  %v7613_v32 = vld [vmem:[#allocation10 + $0x700] ss:$28 sps:$4 sm:$0xff]  }
 0x38b   :  { %5626 = vmatpush1.bf16.msra.mxu1 %v7535_v33  ;;  %5798 = vmatpush1.bf16.msra.mxu0 %v7538_v34  ;;  %v7616_v33 = vld [vmem:[#allocation10 + $0x708] ss:$28 sps:$4 sm:$0xff]   ;;  %v8485_v34 = vmax.bf16 %v2709_v29, %v8469_v16  ;;  %v7625_v16 = vld [vmem:[#allocation10 + $0x770] ss:$28 sps:$4 sm:$0xff]   ;;  %v7693_v29 = vld [vmem:[#allocation10 + $0x9dc] ss:$28 sps:$4 sm:$0xff]  }
 0x38c   :  { %5627 = vmatprep.subr.bf16.mxu1 %v7543_v36  ;;  %5799 = vmatprep.subr.bf16.mxu0 %v7546_v41  ;;  %v7621_v36 = vld [vmem:[#allocation10 + $0x73c] ss:$28 sps:$4 sm:$0xff]   ;;  %v7624_v41 = vld [vmem:[#allocation10 + $0x744] ss:$28 sps:$4 sm:$0xff]  }
 0x38f   :  { %5628 = vmatpush1.bf16.msra.mxu1 %v7541_v42  ;;  %5800 = vmatpush1.bf16.msra.mxu0 %v7544_v44  ;;  %v7619_v42 = vld [vmem:[#allocation10 + $0x738] ss:$28 sps:$4 sm:$0xff]   ;;  %v7622_v44 = vld [vmem:[#allocation10 + $0x740] ss:$28 sps:$4 sm:$0xff]  }
 0x390   :  { %5629 = vmatprep.subr.bf16.mxu1 %v7549_v45  ;;  %5801 = vmatprep.subr.bf16.mxu0 %v7552_v46  ;;  %v7627_v45 = vld [vmem:[#allocation10 + $0x774] ss:$28 sps:$4 sm:$0xff]   ;;  %v7630_v46 = vld [vmem:[#allocation10 + $0x77c] ss:$28 sps:$4 sm:$0xff]  }
 0x393   :  { %5630 = vmatpush1.bf16.msra.mxu1 %v7547_v47  ;;  %5802 = vmatpush1.bf16.msra.mxu0 %v7550_v48  ;;  %v7628_v47 = vld [vmem:[#allocation10 + $0x778] ss:$28 sps:$4 sm:$0xff]   ;;  %v7633_v48 = vld [vmem:[#allocation10 + $0x7ac] ss:$28 sps:$4 sm:$0xff]  }
 0x394   :  { %5631 = vmatprep.subr.bf16.mxu1 %v7555_v49  ;;  %5803 = vmatprep.subr.bf16.mxu0 %v7558_v50  ;;  %v7636_v49 = vld [vmem:[#allocation10 + $0x7b4] ss:$28 sps:$4 sm:$0xff]   ;;  %v7631_v50 = vld [vmem:[#allocation10 + $0x7a8] ss:$28 sps:$4 sm:$0xff]  }
 0x397   :  { %5632 = vmatpush1.bf16.msra.mxu1 %v7553_v51  ;;  %5804 = vmatpush1.bf16.msra.mxu0 %v7556_v59  ;;  %v7634_v51 = vld [vmem:[#allocation10 + $0x7b0] ss:$28 sps:$4 sm:$0xff]   ;;  %v7639_v59 = vld [vmem:[#allocation10 + $0x7e4] ss:$28 sps:$4 sm:$0xff]  }
 0x398   :  { %5633 = vmatprep.subr.bf16.mxu1 %v7561_v52  ;;  %5805 = vmatprep.subr.bf16.mxu0 %v7564_v53  ;;  %v7642_v52 = vld [vmem:[#allocation10 + $0x7ec] ss:$28 sps:$4 sm:$0xff]   ;;  %v7637_v53 = vld [vmem:[#allocation10 + $0x7e0] ss:$28 sps:$4 sm:$0xff]  }
 0x39b   :  { %5634 = vmatpush1.bf16.msra.mxu1 %v7559_v55  ;;  %5806 = vmatpush1.bf16.msra.mxu0 %v7562_v56  ;;  %v7640_v55 = vld [vmem:[#allocation10 + $0x7e8] ss:$28 sps:$4 sm:$0xff]   ;;  %v7645_v56 = vld [vmem:[#allocation10 + $0x81c] ss:$28 sps:$4 sm:$0xff]  }
 0x39c   :  { %5635 = vmatprep.subr.bf16.mxu1 %v7567_v57  ;;  %5807 = vmatprep.subr.bf16.mxu0 %v7570_v58  ;;  %v7648_v57 = vld [vmem:[#allocation10 + $0x824] ss:$28 sps:$4 sm:$0xff]   ;;  %v7643_v58 = vld [vmem:[#allocation10 + $0x818] ss:$28 sps:$4 sm:$0xff]  }
 0x39f   :  { %5636 = vmatpush1.bf16.msra.mxu1 %v7565_v61  ;;  %5808 = vmatpush1.bf16.msra.mxu0 %v7568_v62  ;;  %v7646_v61 = vld [vmem:[#allocation10 + $0x820] ss:$28 sps:$4 sm:$0xff]   ;;  %v7651_v62 = vld [vmem:[#allocation10 + $0x854] ss:$28 sps:$4 sm:$0xff]  }
 0x3a0   :  { %5637 = vmatprep.subr.bf16.mxu1 %v7573_v63  ;;  %5809 = vmatprep.subr.bf16.mxu0 %v7576_v24  ;;  %v7654_v63 = vld [vmem:[#allocation10 + $0x85c] ss:$28 sps:$4 sm:$0xff]   ;;  %v7649_v24 = vld [vmem:[#allocation10 + $0x850] ss:$28 sps:$4 sm:$0xff]  }
 0x3a3   :  { %5638 = vmatpush1.bf16.msra.mxu1 %v7571_v60  ;;  %5810 = vmatpush1.bf16.msra.mxu0 %v7574_v0  ;;  %v7652_v60 = vld [vmem:[#allocation10 + $0x858] ss:$28 sps:$4 sm:$0xff]   ;;  %v7657_v0 = vld [vmem:[#allocation10 + $0x88c] ss:$28 sps:$4 sm:$0xff]  }
 0x3a4   :  { %5639 = vmatprep.subr.bf16.mxu1 %v7579_v1  ;;  %5811 = vmatprep.subr.bf16.mxu0 %v7582_v5  ;;  %v7660_v1 = vld [vmem:[#allocation10 + $0x894] ss:$28 sps:$4 sm:$0xff]   ;;  %v7655_v5 = vld [vmem:[#allocation10 + $0x888] ss:$28 sps:$4 sm:$0xff]  }
 0x3a7   :  { %5640 = vmatpush1.bf16.msra.mxu1 %v7577_v6  ;;  %5812 = vmatpush1.bf16.msra.mxu0 %v7580_v8  ;;  %v7658_v6 = vld [vmem:[#allocation10 + $0x890] ss:$28 sps:$4 sm:$0xff]   ;;  %v7663_v8 = vld [vmem:[#allocation10 + $0x8c4] ss:$28 sps:$4 sm:$0xff]  }
 0x3a8   :  { %5641 = vmatprep.subr.bf16.mxu1 %v7585_v9  ;;  %5813 = vmatprep.subr.bf16.mxu0 %v7588_v22  ;;  %v7666_v9 = vld [vmem:[#allocation10 + $0x8cc] ss:$28 sps:$4 sm:$0xff]   ;;  %v7661_v22 = vld [vmem:[#allocation10 + $0x8c0] ss:$28 sps:$4 sm:$0xff]  }
 0x3ab   :  { %5642 = vmatpush1.bf16.msra.mxu1 %v7583_v12  ;;  %5814 = vmatpush1.bf16.msra.mxu0 %v7586_v13  ;;  %v7664_v12 = vld [vmem:[#allocation10 + $0x8c8] ss:$28 sps:$4 sm:$0xff]   ;;  %v7669_v13 = vld [vmem:[#allocation10 + $0x8fc] ss:$28 sps:$4 sm:$0xff]  }
 0x3ac   :  { %5643 = vmatprep.subr.bf16.mxu1 %v7591_v14  ;;  %5815 = vmatprep.subr.bf16.mxu0 %v7594_v39  ;;  %v7672_v14 = vld [vmem:[#allocation10 + $0x904] ss:$28 sps:$4 sm:$0xff]   ;;  %v7667_v39 = vld [vmem:[#allocation10 + $0x8f8] ss:$28 sps:$4 sm:$0xff]  }
 0x3af   :  { %5644 = vmatpush1.bf16.msra.mxu1 %v7589_v15  ;;  %5816 = vmatpush1.bf16.msra.mxu0 %v7592_v17  ;;  %v7670_v15 = vld [vmem:[#allocation10 + $0x900] ss:$28 sps:$4 sm:$0xff]   ;;  %v7675_v17 = vld [vmem:[#allocation10 + $0x934] ss:$28 sps:$4 sm:$0xff]  }
 0x3b0   :  { %5645 = vmatprep.subr.bf16.mxu1 %v7597_v18  ;;  %5817 = vmatprep.subr.bf16.mxu0 %v7600_v2  ;;  %v7678_v18 = vld [vmem:[#allocation10 + $0x93c] ss:$28 sps:$4 sm:$0xff]   ;;  %v7673_v2 = vld [vmem:[#allocation10 + $0x930] ss:$28 sps:$4 sm:$0xff]  }
 0x3b3   :  { %5646 = vmatpush1.bf16.msra.mxu1 %v7595_v3  ;;  %5818 = vmatpush1.bf16.msra.mxu0 %v7598_v4  ;;  %v7676_v3 = vld [vmem:[#allocation10 + $0x938] ss:$28 sps:$4 sm:$0xff]   ;;  %v7681_v4 = vld [vmem:[#allocation10 + $0x96c] ss:$28 sps:$4 sm:$0xff]  }
 0x3b4   :  { %5647 = vmatprep.subr.bf16.mxu1 %v7603_v10  ;;  %5819 = vmatprep.subr.bf16.mxu0 %v7606_v11  ;;  %v7684_v10 = vld [vmem:[#allocation10 + $0x974] ss:$28 sps:$4 sm:$0xff]   ;;  %v7679_v11 = vld [vmem:[#allocation10 + $0x968] ss:$28 sps:$4 sm:$0xff]  }
 0x3b7   :  { %5648 = vmatpush1.bf16.msra.mxu1 %v7601_v20  ;;  %5820 = vmatpush1.bf16.msra.mxu0 %v7604_v21  ;;  %v7682_v20 = vld [vmem:[#allocation10 + $0x970] ss:$28 sps:$4 sm:$0xff]   ;;  %v7687_v21 = vld [vmem:[#allocation10 + $0x9a4] ss:$28 sps:$4 sm:$0xff]  }
 0x3b8   :  { %5649 = vmatprep.subr.bf16.mxu1 %v7609_v25  ;;  %5821 = vmatprep.subr.bf16.mxu0 %v7612_v26  ;;  %v7690_v25 = vld [vmem:[#allocation10 + $0x9ac] ss:$28 sps:$4 sm:$0xff]   ;;  %v7685_v26 = vld [vmem:[#allocation10 + $0x9a0] ss:$28 sps:$4 sm:$0xff]  }
 0x3bb   :  { %5650 = vmatpush1.bf16.msra.mxu1 %v7607_v27  ;;  %5822 = vmatpush1.bf16.msra.mxu0 %v7610_v28  ;;  %v7688_v27 = vld [vmem:[#allocation10 + $0x9a8] ss:$28 sps:$4 sm:$0xff]   ;;  %v1053_v28 = vsub.s32 4, %v8405_v37 }
 0x3bc   :  { %5662 = vmatprep.subr.bf16.mxu1 %v7615_v30  ;;  %5834 = vmatprep.subr.bf16.mxu0 %v7618_v31  ;;  %v7696_v30 = vld [vmem:[#allocation10 + $0x9e4] ss:$28 sps:$4 sm:$0xff]   ;;  %v1061_v31 = vsub.s32 6, %v8405_v37 }
 0x3be   :  { %5652 = vmatmul.mubr.bf16.vlgmr.msra.gmra.mrb[8].mxu1 %v8485_v34  ;;  %5824 = vmatmul.mubr.bf16.vlgmr.msra.gmra.mrb[20].mxu0 %v8485_v34 }
 0x3bf   :  { %5663 = vmatpush1.bf16.msra.mxu1 %v7613_v32  ;;  %5835 = vmatpush1.bf16.msra.mxu0 %v7616_v33  ;;  %v1057_v32 = vsub.s32 5, %v8405_v37  ;;  %v1065_v33 = vsub.s32 7, %v8405_v37 }
 0x3c0   :  { %5664 = vmatprep.subr.bf16.mxu1 %v7621_v36  ;;  %5836 = vmatprep.subr.bf16.mxu0 %v7624_v41  ;;  %v7691_v36 = vld [vmem:[#allocation10 + $0x9d8] ss:$28 sps:$4 sm:$0xff]   ;;  %v7694_v41 = vld [vmem:[#allocation10 + $0x9e0] ss:$28 sps:$4 sm:$0xff]  }
 0x3c3   :  { %5665 = vmatpush1.bf16.msra.mxu1 %v7619_v42  ;;  %5837 = vmatpush1.bf16.msra.mxu0 %v7622_v44  ;;  %v1054_v42 = vrot.slane %v8459_v54, %v1053_v28  ;;  %v7699_v44 = vld [vmem:[#allocation10 + $0xa14] ss:$28 sps:$4 sm:$0xff]  }
 0x3c4   :  { %5666 = vmatprep.subr.bf16.mxu1 %v7627_v45  ;;  %5838 = vmatprep.subr.bf16.mxu0 %v7630_v46  ;;  %v7702_v45 = vld [vmem:[#allocation10 + $0xa1c] ss:$28 sps:$4 sm:$0xff]  }
 0x3c7   :  { %5667 = vmatpush1.bf16.msra.mxu1 %v7625_v16  ;;  %5839 = vmatpush1.bf16.msra.mxu0 %v7628_v47  ;;  %v1062_v16 = vrot.slane %v8459_v54, %v1061_v31  ;;  %v1058_v47 = vrot.slane %v8459_v54, %v1057_v32 }
 0x3c8   :  { %5668 = vmatprep.subr.bf16.mxu1 %v7633_v48  ;;  %5840 = vmatprep.subr.bf16.mxu0 %v7636_v49 }
 0x3cb   :  { %5669 = vmatpush1.bf16.msra.mxu1 %v7631_v50  ;;  %5841 = vmatpush1.bf16.msra.mxu0 %v7634_v51  ;;  %v1066_v50 = vrot.slane %v8459_v54, %v1065_v33  ;;  %v7724_v33 = vld [vmem:[#allocation10 + $0xaf8] ss:$28 sps:$4 sm:$0xff]  }
 0x3cc   :  { %5670 = vmatprep.subr.bf16.mxu1 %v7639_v59  ;;  %5842 = vmatprep.subr.bf16.mxu0 %v7642_v52  ;;  %v7697_v52 = vld [vmem:[#allocation10 + $0xa10] ss:$28 sps:$4 sm:$0xff]  }
 0x3cf   :  { %5671 = vmatpush1.bf16.msra.mxu1 %v7637_v53  ;;  %5843 = vmatpush1.bf16.msra.mxu0 %v7640_v55  ;;  %v7700_v53 = vld [vmem:[#allocation10 + $0xa18] ss:$28 sps:$4 sm:$0xff]  }
 0x3d0   :  { %5672 = vmatprep.subr.bf16.mxu1 %v7645_v56  ;;  %5844 = vmatprep.subr.bf16.mxu0 %v7648_v57 }
 0x3d3   :  { %5673 = vmatpush1.bf16.msra.mxu1 %v7643_v58  ;;  %5845 = vmatpush1.bf16.msra.mxu0 %v7646_v61  ;;  %v7705_v61 = vld [vmem:[#allocation10 + $0xa4c] ss:$28 sps:$4 sm:$0xff]  }
 0x3d4   :  { %5674 = vmatprep.subr.bf16.mxu1 %v7651_v62  ;;  %5846 = vmatprep.subr.bf16.mxu0 %v7654_v63  ;;  %v7708_v62 = vld [vmem:[#allocation10 + $0xa54] ss:$28 sps:$4 sm:$0xff]  }
 0x3d7   :  { %5675 = vmatpush1.bf16.msra.mxu1 %v7649_v24  ;;  %5847 = vmatpush1.bf16.msra.mxu0 %v7652_v60 }
 0x3d8   :  { %5676 = vmatprep.subr.bf16.mxu1 %v7657_v0  ;;  %5848 = vmatprep.subr.bf16.mxu0 %v7660_v1 }
 0x3db   :  { %5677 = vmatpush1.bf16.msra.mxu1 %v7655_v5  ;;  %5849 = vmatpush1.bf16.msra.mxu0 %v7658_v6 }
 0x3dc   :  { %5678 = vmatprep.subr.bf16.mxu1 %v7663_v8  ;;  %5850 = vmatprep.subr.bf16.mxu0 %v7666_v9 }
 0x3df   :  { %5679 = vmatpush1.bf16.msra.mxu1 %v7661_v22  ;;  %5851 = vmatpush1.bf16.msra.mxu0 %v7664_v12  ;;  %v7703_v22 = vld [vmem:[#allocation10 + $0xa48] ss:$28 sps:$4 sm:$0xff]   ;;  %v7706_v12 = vld [vmem:[#allocation10 + $0xa50] ss:$28 sps:$4 sm:$0xff]  }
 0x3e0   :  { %5680 = vmatprep.subr.bf16.mxu1 %v7669_v13  ;;  %5852 = vmatprep.subr.bf16.mxu0 %v7672_v14 }
 0x3e3   :  { %5681 = vmatpush1.bf16.msra.mxu1 %v7667_v39  ;;  %5853 = vmatpush1.bf16.msra.mxu0 %v7670_v15  ;;  %v7711_v39 = vld [vmem:[#allocation10 + $0xa84] ss:$28 sps:$4 sm:$0xff]   ;;  %v7714_v15 = vld [vmem:[#allocation10 + $0xa8c] ss:$28 sps:$4 sm:$0xff]  }
 0x3e4   :  { %5682 = vmatprep.subr.bf16.mxu1 %v7675_v17  ;;  %5854 = vmatprep.subr.bf16.mxu0 %v7678_v18 }
 0x3e7   :  { %5683 = vmatpush1.bf16.msra.mxu1 %v7673_v2  ;;  %5855 = vmatpush1.bf16.msra.mxu0 %v7676_v3  ;;  %v7709_v3 = vld [vmem:[#allocation10 + $0xa80] ss:$28 sps:$4 sm:$0xff]  }
 0x3e8   :  { %5684 = vmatprep.subr.bf16.mxu1 %v7681_v4  ;;  %5856 = vmatprep.subr.bf16.mxu0 %v7684_v10  ;;  %v7712_v4 = vld [vmem:[#allocation10 + $0xa88] ss:$28 sps:$4 sm:$0xff]  }
 0x3eb   :  { %5685 = vmatpush1.bf16.msra.mxu1 %v7679_v11  ;;  %5857 = vmatpush1.bf16.msra.mxu0 %v7682_v20  ;;  %v7717_v11 = vld [vmem:[#allocation10 + $0xabc] ss:$28 sps:$4 sm:$0xff]   ;;  %v7720_v20 = vld [vmem:[#allocation10 + $0xac4] ss:$28 sps:$4 sm:$0xff]  }
 0x3ec   :  { %5686 = vmatprep.subr.bf16.mxu1 %v7687_v21  ;;  %5858 = vmatprep.subr.bf16.mxu0 %v7690_v25  ;;  %v7715_v25 = vld [vmem:[#allocation10 + $0xab8] ss:$28 sps:$4 sm:$0xff]  }
 0x3ef   :  { %5687 = vmatpush1.bf16.msra.mxu1 %v7685_v26  ;;  %5859 = vmatpush1.bf16.msra.mxu0 %v7688_v27  ;;  %v7718_v26 = vld [vmem:[#allocation10 + $0xac0] ss:$28 sps:$4 sm:$0xff]   ;;  %v7723_v27 = vld [vmem:[#allocation10 + $0xaf4] ss:$28 sps:$4 sm:$0xff]  }
 0x3f0   :  { %5688 = vmatprep.subr.bf16.mxu1 %v7693_v29  ;;  %5860 = vmatprep.subr.bf16.mxu0 %v7696_v30  ;;  %v7726_v29 = vld [vmem:[#allocation10 + $0xafc] ss:$28 sps:$4 sm:$0xff]   ;;  %v7721_v30 = vld [vmem:[#allocation10 + $0xaf0] ss:$28 sps:$4 sm:$0xff]  }
 0x3f1   :  { %v2604_v46 = vpop.f32.mrb[4].mxu1 }
 0x3f2   :  { %v2690_v48 = vpop.f32.mrb[16].mxu0  ;;  %v2606_v49 = vpop.f32.mrb[5].mxu1  ;;  %v7212_v55 = vadd.f32 %v2604_v46, %v1054_v42  ;;  %v7738_v46 = vld [vmem:[#allocation10 + $0xb6c] ss:$28 sps:$4 sm:$0xff]  }
 0x3f3   :  { %v2692_v51 = vpop.f32.mrb[17].mxu0  ;;  %5689 = vmatpush1.bf16.msra.mxu1 %v7691_v36  ;;  %5861 = vmatpush1.bf16.msra.mxu0 %v7694_v41  ;;  %v2608_v59 = vpop.f32.mrb[6].mxu1  ;;  %v7216_v63 = vadd.f32 %v2690_v48, %v1062_v16  ;;  %v7213_v24 = vadd.f32 %v2606_v49, %v1058_v47  ;;  %v7729_v36 = vld [vmem:[#allocation10 + $0xb2c] ss:$28 sps:$4 sm:$0xff]   ;;  %v7732_v41 = vld [vmem:[#allocation10 + $0xb34] ss:$28 sps:$4 sm:$0xff]  }
 0x3f4   :  { %v7214_v56 = vadd.f32 %v2608_v59, %v1054_v42  ;;  %v2694_v57 = vpop.f32.mrb[18].mxu0  ;;  %v2610_v58 = vpop.f32.mrb[7].mxu1  ;;  %5690 = vmatprep.subr.bf16.mxu1 %v7699_v44  ;;  %5862 = vmatprep.subr.bf16.mxu0 %v7702_v45  ;;  %v7217_v54 = vadd.f32 %v2692_v51, %v1066_v50  ;;  %v7727_v42 = vld [vmem:[#allocation10 + $0xb28] ss:$28 sps:$4 sm:$0xff]   ;;  %v7730_v44 = vld [vmem:[#allocation10 + $0xb30] ss:$28 sps:$4 sm:$0xff]  }
 0x3f5   :  { %v7218_v60 = vadd.f32 %v2694_v57, %v1062_v16  ;;  %v7215_v0 = vadd.f32 %v2610_v58, %v1058_v47  ;;  %v2696_v1 = vpop.f32.mrb[19].mxu0  ;;  %v7735_v45 = vld [vmem:[#allocation10 + $0xb64] ss:$28 sps:$4 sm:$0xff]   ;;  %v7741_v48 = vld [vmem:[#allocation10 + $0xb9c] ss:$28 sps:$4 sm:$0xff]  }
 0x3f6   :  { %v2703_v5 = vpack.c.bf16 %v7214_v56, %v7212_v55  ;;  %v7219_v6 = vadd.f32 %v2696_v1, %v1066_v50  ;;  %v7733_v16 = vld [vmem:[#allocation10 + $0xb60] ss:$28 sps:$4 sm:$0xff]   ;;  %v7736_v47 = vld [vmem:[#allocation10 + $0xb68] ss:$28 sps:$4 sm:$0xff]   ;;  %v7739_v50 = vld [vmem:[#allocation10 + $0xb98] ss:$28 sps:$4 sm:$0xff]  }
 0x3f7   :  { %v8503_v8 = vpack.c.bf16 %v7218_v60, %v7216_v63  ;;  %v2704_v9 = vpack.c.bf16 %v7215_v0, %v7213_v24  ;;  %5691 = vmatpush1.bf16.msra.mxu1 %v7697_v52  ;;  %5863 = vmatpush1.bf16.msra.mxu0 %v7700_v53  ;;  %v7744_v49 = vld [vmem:[#allocation10 + $0xba4] ss:$28 sps:$4 sm:$0xff]   ;;  %v7747_v59 = vld [vmem:[#allocation10 + $0xbd4] ss:$28 sps:$4 sm:$0xff]   ;;  %v7750_v52 = vld [vmem:[#allocation10 + $0xbdc] ss:$28 sps:$4 sm:$0xff]  }
 0x3f8   :  { %v2711_v13 = vmul.bf16 1045249613, %v2703_v5  ;;  %v2706_v14 = vpack.c.bf16 %v7219_v6, %v7217_v54  ;;  %5692 = vmatprep.subr.bf16.mxu1 %v7705_v61  ;;  %5864 = vmatprep.subr.bf16.mxu0 %v7708_v62  ;;  %v7742_v51 = vld [vmem:[#allocation10 + $0xba0] ss:$28 sps:$4 sm:$0xff]   ;;  %v7745_v53 = vld [vmem:[#allocation10 + $0xbd0] ss:$28 sps:$4 sm:$0xff]  }
 0x3f9   :  { %v2712_v17 = vmul.bf16 1045249613, %v2704_v9  ;;  %v7748_v55 = vld [vmem:[#allocation10 + $0xbd8] ss:$28 sps:$4 sm:$0xff]   ;;  %v7753_v56 = vld [vmem:[#allocation10 + $0xc0c] ss:$28 sps:$4 sm:$0xff]  }
 0x3fa   :  { %v2714_v18 = vmul.bf16 1045249613, %v2706_v14  ;;  %v8507_v10 = vmax.bf16 %v2711_v13, %v2703_v5  ;;  %v7756_v57 = vld [vmem:[#allocation10 + $0xc14] ss:$28 sps:$4 sm:$0xff]   ;;  %v7751_v58 = vld [vmem:[#allocation10 + $0xc08] ss:$28 sps:$4 sm:$0xff]  }
 0x3fb   :  { %v8505_v2 = vmax.bf16 %v2712_v17, %v2704_v9  ;;  %5693 = vmatpush1.bf16.msra.mxu1 %v7703_v22  ;;  %5865 = vmatpush1.bf16.msra.mxu0 %v7706_v12  ;;  %v7754_v61 = vld [vmem:[#allocation10 + $0xc10] ss:$28 sps:$4 sm:$0xff]   ;;  %v7759_v62 = vld [vmem:[#allocation10 + $0xc44] ss:$28 sps:$4 sm:$0xff]   ;;  %v7765_v0 = vld [vmem:[#allocation10 + $0xc7c] ss:$28 sps:$4 sm:$0xff]  }
 0x3fc   :  { %5705 = vmatprep.subr.bf16.mxu1 %v7711_v39  ;;  %5877 = vmatprep.subr.bf16.mxu0 %v7714_v15  ;;  %v8511_v21 = vmax.bf16 %v2714_v18, %v2706_v14  ;;  %v7762_v63 = vld [vmem:[#allocation10 + $0xc4c] ss:$28 sps:$4 sm:$0xff]   ;;  %v7757_v24 = vld [vmem:[#allocation10 + $0xc40] ss:$28 sps:$4 sm:$0xff]   ;;  %v7763_v54 = vld [vmem:[#allocation10 + $0xc78] ss:$28 sps:$4 sm:$0xff]  }
 0x3fd   :  { %5694 = vmatprep.mubr.bf16.mxu1 %v8505_v2  ;;  %5866 = vmatprep.mubr.bf16.mxu0 %v8505_v2  ;;  %v7760_v60 = vld [vmem:[#allocation10 + $0xc48] ss:$28 sps:$4 sm:$0xff]   ;;  %v7766_v5 = vld [vmem:[#allocation10 + $0xc80] ss:$28 sps:$4 sm:$0xff]   ;;  %v7771_v6 = vld [vmem:[#allocation10 + $0xcb4] ss:$28 sps:$4 sm:$0xff]  }
 0x3fe   :  { %5695 = vmatmul.mubr.bf16.vlgmr.msra.gmra.mrb[8].mxu1 %v8507_v10  ;;  %5867 = vmatmul.mubr.bf16.vlgmr.msra.gmra.mrb[20].mxu0 %v8507_v10  ;;  %v7768_v1 = vld [vmem:[#allocation10 + $0xc84] ss:$28 sps:$4 sm:$0xff]   ;;  %v7774_v9 = vld [vmem:[#allocation10 + $0xcbc] ss:$28 sps:$4 sm:$0xff]   ;;  %v7769_v22 = vld [vmem:[#allocation10 + $0xcb0] ss:$28 sps:$4 sm:$0xff]  }
 0x3ff   :  { %5706 = vmatpush1.bf16.msra.mxu1 %v7709_v3  ;;  %5878 = vmatpush1.bf16.msra.mxu0 %v7712_v4  ;;  %v7772_v12 = vld [vmem:[#allocation10 + $0xcb8] ss:$28 sps:$4 sm:$0xff]   ;;  %v7777_v13 = vld [vmem:[#allocation10 + $0xcec] ss:$28 sps:$4 sm:$0xff]   ;;  %v7783_v17 = vld [vmem:[#allocation10 + $0xd24] ss:$28 sps:$4 sm:$0xff]  }
 0x400   :  { %5737 = vmatprep.mubr.bf16.mxu1 %v8511_v21  ;;  %5909 = vmatprep.mubr.bf16.mxu0 %v8511_v21  ;;  %v7780_v14 = vld [vmem:[#allocation10 + $0xcf4] ss:$28 sps:$4 sm:$0xff]   ;;  %v7775_v39 = vld [vmem:[#allocation10 + $0xce8] ss:$28 sps:$4 sm:$0xff]   ;;  %v7781_v3 = vld [vmem:[#allocation10 + $0xd20] ss:$28 sps:$4 sm:$0xff]  }
 0x401   :  { %5707 = vmatprep.subr.bf16.mxu1 %v7717_v11  ;;  %5879 = vmatprep.subr.bf16.mxu0 %v7720_v20  ;;  %v7778_v15 = vld [vmem:[#allocation10 + $0xcf0] ss:$28 sps:$4 sm:$0xff]   ;;  %v7784_v4 = vld [vmem:[#allocation10 + $0xd28] ss:$28 sps:$4 sm:$0xff]   ;;  %v7789_v11 = vld [vmem:[#allocation10 + $0xd5c] ss:$28 sps:$4 sm:$0xff]  }
 0x402   :  { %v7786_v18 = vld [vmem:[#allocation10 + $0xd2c] ss:$28 sps:$4 sm:$0xff]   ;;  %v7792_v20 = vld [vmem:[#allocation10 + $0xd64] ss:$28 sps:$4 sm:$0xff]  }
 0x403   :  { %5708 = vmatpush1.bf16.msra.mxu1 %v7715_v25  ;;  %5880 = vmatpush1.bf16.msra.mxu0 %v7718_v26  ;;  %v7787_v25 = vld [vmem:[#allocation10 + $0xd58] ss:$28 sps:$4 sm:$0xff]   ;;  %v7790_v26 = vld [vmem:[#allocation10 + $0xd60] ss:$28 sps:$4 sm:$0xff]  }
 0x404   :  { %5709 = vmatprep.subr.bf16.mxu1 %v7723_v27  ;;  %5881 = vmatprep.subr.bf16.mxu0 %v7726_v29  ;;  %v7795_v27 = vld [vmem:[#allocation10 + $0xd94] ss:$28 sps:$4 sm:$0xff]   ;;  %v7798_v29 = vld [vmem:[#allocation10 + $0xd9c] ss:$28 sps:$4 sm:$0xff]  }
 0x407   :  { %5710 = vmatpush1.bf16.msra.mxu1 %v7721_v30  ;;  %5882 = vmatpush1.bf16.msra.mxu0 %v7724_v33  ;;  %v7793_v30 = vld [vmem:[#allocation10 + $0xd90] ss:$28 sps:$4 sm:$0xff]   ;;  %v7796_v33 = vld [vmem:[#allocation10 + $0xd98] ss:$28 sps:$4 sm:$0xff]  }
 0x408   :  { %5711 = vmatprep.subr.bf16.mxu1 %v7729_v36  ;;  %5883 = vmatprep.subr.bf16.mxu0 %v7732_v41  ;;  %v7801_v36 = vld [vmem:[#allocation10 + $0xdcc] ss:$28 sps:$4 sm:$0xff]   ;;  %v7804_v41 = vld [vmem:[#allocation10 + $0xdd4] ss:$28 sps:$4 sm:$0xff]  }
 0x40b   :  { %5712 = vmatpush1.bf16.msra.mxu1 %v7727_v42  ;;  %5884 = vmatpush1.bf16.msra.mxu0 %v7730_v44  ;;  %v7799_v42 = vld [vmem:[#allocation10 + $0xdc8] ss:$28 sps:$4 sm:$0xff]   ;;  %v7802_v44 = vld [vmem:[#allocation10 + $0xdd0] ss:$28 sps:$4 sm:$0xff]  }
 0x40c   :  { %5713 = vmatprep.subr.bf16.mxu1 %v7735_v45  ;;  %5885 = vmatprep.subr.bf16.mxu0 %v7738_v46  ;;  %v2713_v45 = vmul.bf16 1045249613, %v8503_v8  ;;  %v7807_v46 = vld [vmem:[#allocation10 + $0x14] ss:$28 sps:$4 sm:$0xff]  }
 0x40f   :  { %5714 = vmatpush1.bf16.msra.mxu1 %v7733_v16  ;;  %5886 = vmatpush1.bf16.msra.mxu0 %v7736_v47  ;;  %v7808_v16 = vld [vmem:[#allocation10 + $0x1d8] ss:$28 sps:$4 sm:$0xff]   ;;  %v7805_v47 = vld [vmem:[#allocation10 + $0x10] ss:$28 sps:$4 sm:$0xff]  }
 0x410   :  { %5715 = vmatprep.subr.bf16.mxu1 %v7741_v48  ;;  %5887 = vmatprep.subr.bf16.mxu0 %v7744_v49  ;;  %v8519_v48 = vmax.bf16 %v2713_v45, %v8503_v8  ;;  %v7809_v49 = vld [vmem:[#allocation10 + $0x18] ss:$28 sps:$4 sm:$0xff]   ;;  %v7818_v8 = vld [vmem:[#allocation10 + $0x248] ss:$28 sps:$4 sm:$0xff]  }
 0x411   :  { %v7867_v45 = vld [vmem:[#allocation10 + $0x2b4] ss:$28 sps:$4 sm:$0xff]  }
 0x413   :  { %5716 = vmatpush1.bf16.msra.mxu1 %v7739_v50  ;;  %5888 = vmatpush1.bf16.msra.mxu0 %v7742_v51  ;;  %v7812_v50 = vld [vmem:[#allocation10 + $0x4c] ss:$28 sps:$4 sm:$0xff]  }
 0x414   :  { %5717 = vmatprep.subr.bf16.mxu1 %v7747_v59  ;;  %5889 = vmatprep.subr.bf16.mxu0 %v7750_v52  ;;  %v7813_v51 = vld [vmem:[#allocation10 + $0x210] ss:$28 sps:$4 sm:$0xff]   ;;  %v7810_v59 = vld [vmem:[#allocation10 + $0x48] ss:$28 sps:$4 sm:$0xff]  }
 0x415   :  { %v7814_v52 = vld [vmem:[#allocation10 + $0x50] ss:$28 sps:$4 sm:$0xff]  }
 0x417   :  { %5718 = vmatpush1.bf16.msra.mxu1 %v7745_v53  ;;  %5890 = vmatpush1.bf16.msra.mxu0 %v7748_v55  ;;  %v7817_v53 = vld [vmem:[#allocation10 + $0x84] ss:$28 sps:$4 sm:$0xff]  }
 0x418   :  { %5719 = vmatprep.subr.bf16.mxu1 %v7753_v56  ;;  %5891 = vmatprep.subr.bf16.mxu0 %v7756_v57  ;;  %v7815_v55 = vld [vmem:[#allocation10 + $0x80] ss:$28 sps:$4 sm:$0xff]   ;;  %v7819_v56 = vld [vmem:[#allocation10 + $0x88] ss:$28 sps:$4 sm:$0xff]  }
 0x419   :  { %v7822_v57 = vld [vmem:[#allocation10 + $0xbc] ss:$28 sps:$4 sm:$0xff]  }
 0x41b   :  { %5720 = vmatpush1.bf16.msra.mxu1 %v7751_v58  ;;  %5892 = vmatpush1.bf16.msra.mxu0 %v7754_v61  ;;  %v7823_v58 = vld [vmem:[#allocation10 + $0x280] ss:$28 sps:$4 sm:$0xff]   ;;  %v7820_v61 = vld [vmem:[#allocation10 + $0xb8] ss:$28 sps:$4 sm:$0xff]  }
 0x41c   :  { %5721 = vmatprep.subr.bf16.mxu1 %v7759_v62  ;;  %5893 = vmatprep.subr.bf16.mxu0 %v7762_v63  ;;  %v7824_v62 = vld [vmem:[#allocation10 + $0xc0] ss:$28 sps:$4 sm:$0xff]   ;;  %v7827_v63 = vld [vmem:[#allocation10 + $0xf4] ss:$28 sps:$4 sm:$0xff]  }
 0x41f   :  { %5722 = vmatpush1.bf16.msra.mxu1 %v7757_v24  ;;  %5894 = vmatpush1.bf16.msra.mxu0 %v7760_v60  ;;  %v7825_v24 = vld [vmem:[#allocation10 + $0xf0] ss:$28 sps:$4 sm:$0xff]   ;;  %v7829_v60 = vld [vmem:[#allocation10 + $0xf8] ss:$28 sps:$4 sm:$0xff]  }
 0x420   :  { %5723 = vmatprep.subr.bf16.mxu1 %v7765_v0  ;;  %5895 = vmatprep.subr.bf16.mxu0 %v7768_v1  ;;  %v7832_v0 = vld [vmem:[#allocation10 + $0x12c] ss:$28 sps:$4 sm:$0xff]  }
 0x421   :  { %v7833_v1 = vld [vmem:[#allocation10 + $0x2f0] ss:$28 sps:$4 sm:$0xff]  }
 0x423   :  { %5724 = vmatpush1.bf16.msra.mxu1 %v7763_v54  ;;  %5896 = vmatpush1.bf16.msra.mxu0 %v7766_v5  ;;  %v7830_v54 = vld [vmem:[#allocation10 + $0x128] ss:$28 sps:$4 sm:$0xff]   ;;  %v7834_v5 = vld [vmem:[#allocation10 + $0x130] ss:$28 sps:$4 sm:$0xff]  }
 0x424   :  { %5725 = vmatprep.subr.bf16.mxu1 %v7771_v6  ;;  %5897 = vmatprep.subr.bf16.mxu0 %v7774_v9  ;;  %v7837_v6 = vld [vmem:[#allocation10 + $0x164] ss:$28 sps:$4 sm:$0xff]  }
 0x425   :  { %v7838_v9 = vld [vmem:[#allocation10 + $0x328] ss:$28 sps:$4 sm:$0xff]  }
 0x427   :  { %5726 = vmatpush1.bf16.msra.mxu1 %v7769_v22  ;;  %5898 = vmatpush1.bf16.msra.mxu0 %v7772_v12  ;;  %v7835_v22 = vld [vmem:[#allocation10 + $0x160] ss:$28 sps:$4 sm:$0xff]   ;;  %v7839_v12 = vld [vmem:[#allocation10 + $0x168] ss:$28 sps:$4 sm:$0xff]  }
 0x428   :  { %5727 = vmatprep.subr.bf16.mxu1 %v7777_v13  ;;  %5899 = vmatprep.subr.bf16.mxu0 %v7780_v14  ;;  %v7842_v13 = vld [vmem:[#allocation10 + $0x19c] ss:$28 sps:$4 sm:$0xff]  }
 0x429   :  { %v7843_v14 = vld [vmem:[#allocation10 + $0x360] ss:$28 sps:$4 sm:$0xff]  }
 0x42b   :  { %5728 = vmatpush1.bf16.msra.mxu1 %v7775_v39  ;;  %5900 = vmatpush1.bf16.msra.mxu0 %v7778_v15  ;;  %v7840_v39 = vld [vmem:[#allocation10 + $0x198] ss:$28 sps:$4 sm:$0xff]   ;;  %v7844_v15 = vld [vmem:[#allocation10 + $0x1a0] ss:$28 sps:$4 sm:$0xff]  }
 0x42c   :  { %5729 = vmatprep.subr.bf16.mxu1 %v7783_v17  ;;  %5901 = vmatprep.subr.bf16.mxu0 %v7786_v18  ;;  %v7847_v17 = vld [vmem:[#allocation10 + $0x1d4] ss:$28 sps:$4 sm:$0xff]  }
 0x42d   :  { %v7848_v18 = vld [vmem:[#allocation10 + $0x558] ss:$28 sps:$4 sm:$0xff]  }
 0x42f   :  { %5730 = vmatpush1.bf16.msra.mxu1 %v7781_v3  ;;  %5902 = vmatpush1.bf16.msra.mxu0 %v7784_v4  ;;  %v7845_v3 = vld [vmem:[#allocation10 + $0x1d0] ss:$28 sps:$4 sm:$0xff]   ;;  %v7849_v4 = vld [vmem:[#allocation10 + $0x398] ss:$28 sps:$4 sm:$0xff]  }
 0x430   :  { %5731 = vmatprep.subr.bf16.mxu1 %v7789_v11  ;;  %5903 = vmatprep.subr.bf16.mxu0 %v7792_v20  ;;  %v7852_v11 = vld [vmem:[#allocation10 + $0x20c] ss:$28 sps:$4 sm:$0xff]  }
 0x431   :  { %v7853_v20 = vld [vmem:[#allocation10 + $0x590] ss:$28 sps:$4 sm:$0xff]  }
 0x433   :  { %5732 = vmatpush1.bf16.msra.mxu1 %v7787_v25  ;;  %5904 = vmatpush1.bf16.msra.mxu0 %v7790_v26  ;;  %v7850_v25 = vld [vmem:[#allocation10 + $0x208] ss:$28 sps:$4 sm:$0xff]   ;;  %v7854_v26 = vld [vmem:[#allocation10 + $0x3d0] ss:$28 sps:$4 sm:$0xff]  }
 0x434   :  { %5733 = vmatprep.subr.bf16.mxu1 %v7795_v27  ;;  %5905 = vmatprep.subr.bf16.mxu0 %v7798_v29  ;;  %v7857_v27 = vld [vmem:[#allocation10 + $0x244] ss:$28 sps:$4 sm:$0xff]  }
 0x435   :  { %v7858_v29 = vld [vmem:[#allocation10 + $0x5c8] ss:$28 sps:$4 sm:$0xff]  }
 0x437   :  { %5734 = vmatpush1.bf16.msra.mxu1 %v7793_v30  ;;  %5906 = vmatpush1.bf16.msra.mxu0 %v7796_v33  ;;  %v7855_v30 = vld [vmem:[#allocation10 + $0x240] ss:$28 sps:$4 sm:$0xff]   ;;  %v7859_v33 = vld [vmem:[#allocation10 + $0x408] ss:$28 sps:$4 sm:$0xff]  }
 0x438   :  { %5735 = vmatprep.subr.bf16.mxu1 %v7801_v36  ;;  %5907 = vmatprep.subr.bf16.mxu0 %v7804_v41  ;;  %v7862_v36 = vld [vmem:[#allocation10 + $0x27c] ss:$28 sps:$4 sm:$0xff]  }
 0x439   :  { %v7863_v41 = vld [vmem:[#allocation10 + $0x600] ss:$28 sps:$4 sm:$0xff]  }
 0x43b   :  { %5736 = vmatpush1.bf16.msra.mxu1 %v7799_v42  ;;  %5908 = vmatpush1.bf16.msra.mxu0 %v7802_v44  ;;  %v7860_v42 = vld [vmem:[#allocation10 + $0x278] ss:$28 sps:$4 sm:$0xff]   ;;  %v7864_v44 = vld [vmem:[#allocation10 + $0x440] ss:$28 sps:$4 sm:$0xff]  }
 0x43c   :  { %5920 = vmatprep.subr.bf16.mxu1 %v7807_v46  ;;  %7116 = vmatprep.subr.bf16.mxu0 %v7808_v16  ;;  %v7868_v46 = vld [vmem:[#allocation10 + $0x638] ss:$28 sps:$4 sm:$0xff]   ;;  %v7865_v16 = vld [vmem:[#allocation10 + $0x2b0] ss:$28 sps:$4 sm:$0xff]  }
 0x43e   :  { %5738 = vmatmul.mubr.bf16.vlgmr.msra.gmra.mrb[8].mxu1 %v8519_v48  ;;  %5910 = vmatmul.mubr.bf16.vlgmr.msra.gmra.mrb[20].mxu0 %v8519_v48 }
 0x43f   :  { %5921 = vmatpush1.bf16.msra.mxu1 %v7805_v47  ;;  %5952 = vmatprep.mubr.bf16.mxu1 %v8471_v7  ;;  %v7869_v47 = vld [vmem:[#allocation10 + $0x478] ss:$28 sps:$4 sm:$0xff]  }
 0x440   :  { %7117 = vmatpush3.bf16.msra.mxu0 %v7809_v49  ;;  %6124 = vmatprep.mubr.bf16.mxu0 %v8471_v7  ;;  %v7828_v7 = vld [vmem:[#allocation10 + $0x2b8] ss:$28 sps:$4 sm:$0xff]   ;;  %v7872_v49 = vld [vmem:[#allocation10 + $0x2ec] ss:$28 sps:$4 sm:$0xff]  }
 0x441   :  { %5922 = vmatprep.subr.bf16.mxu1 %v7812_v50  ;;  %7118 = vmatprep.subr.bf16.mxu0 %v7813_v51  ;;  %v7873_v50 = vld [vmem:[#allocation10 + $0x670] ss:$28 sps:$4 sm:$0xff]   ;;  %v7870_v51 = vld [vmem:[#allocation10 + $0x2e8] ss:$28 sps:$4 sm:$0xff]  }
 0x443   :  { %5923 = vmatpush1.bf16.msra.mxu1 %v7810_v59  ;;  %v7874_v59 = vld [vmem:[#allocation10 + $0x4b0] ss:$28 sps:$4 sm:$0xff]  }
 0x444   :  { %7119 = vmatpush3.bf16.msra.mxu0 %v7814_v52  ;;  %5924 = vmatprep.subr.bf16.mxu1 %v7817_v53  ;;  %v7877_v52 = vld [vmem:[#allocation10 + $0x324] ss:$28 sps:$4 sm:$0xff]  }
 0x445   :  { %7120 = vmatprep.subr.bf16.mxu0 %v7818_v8  ;;  %v7878_v53 = vld [vmem:[#allocation10 + $0x6a8] ss:$28 sps:$4 sm:$0xff]   ;;  %v7875_v8 = vld [vmem:[#allocation10 + $0x320] ss:$28 sps:$4 sm:$0xff]  }
 0x447   :  { %5925 = vmatpush1.bf16.msra.mxu1 %v7815_v55  ;;  %v7879_v55 = vld [vmem:[#allocation10 + $0x4e8] ss:$28 sps:$4 sm:$0xff]  }
 0x448   :  { %7121 = vmatpush3.bf16.msra.mxu0 %v7819_v56  ;;  %5926 = vmatprep.subr.bf16.mxu1 %v7822_v57  ;;  %v7882_v56 = vld [vmem:[#allocation10 + $0x35c] ss:$28 sps:$4 sm:$0xff]  }
 0x449   :  { %7122 = vmatprep.subr.bf16.mxu0 %v7823_v58  ;;  %v7883_v57 = vld [vmem:[#allocation10 + $0x6e0] ss:$28 sps:$4 sm:$0xff]   ;;  %v7880_v58 = vld [vmem:[#allocation10 + $0x358] ss:$28 sps:$4 sm:$0xff]  }
 0x44b   :  { %5927 = vmatpush1.bf16.msra.mxu1 %v7820_v61  ;;  %v7884_v61 = vld [vmem:[#allocation10 + $0x520] ss:$28 sps:$4 sm:$0xff]  }
 0x44c   :  { %7123 = vmatpush3.bf16.msra.mxu0 %v7824_v62  ;;  %5928 = vmatprep.subr.bf16.mxu1 %v7827_v63  ;;  %v7887_v62 = vld [vmem:[#allocation10 + $0x394] ss:$28 sps:$4 sm:$0xff]  }
 0x44d   :  { %7124 = vmatprep.subr.bf16.mxu0 %v7828_v7  ;;  %v7888_v63 = vld [vmem:[#allocation10 + $0x8d8] ss:$28 sps:$4 sm:$0xff]   ;;  %v7885_v7 = vld [vmem:[#allocation10 + $0x390] ss:$28 sps:$4 sm:$0xff]  }
 0x44f   :  { %5929 = vmatpush1.bf16.msra.mxu1 %v7825_v24  ;;  %v7889_v24 = vld [vmem:[#allocation10 + $0x718] ss:$28 sps:$4 sm:$0xff]  }
 0x450   :  { %7125 = vmatpush3.bf16.msra.mxu0 %v7829_v60  ;;  %5930 = vmatprep.subr.bf16.mxu1 %v7832_v0  ;;  %v7892_v60 = vld [vmem:[#allocation10 + $0x3cc] ss:$28 sps:$4 sm:$0xff]  }
 0x451   :  { %7126 = vmatprep.subr.bf16.mxu0 %v7833_v1  ;;  %v7893_v0 = vld [vmem:[#allocation10 + $0x910] ss:$28 sps:$4 sm:$0xff]   ;;  %v7890_v1 = vld [vmem:[#allocation10 + $0x3c8] ss:$28 sps:$4 sm:$0xff]  }
 0x453   :  { %5931 = vmatpush1.bf16.msra.mxu1 %v7830_v54  ;;  %v7894_v54 = vld [vmem:[#allocation10 + $0x750] ss:$28 sps:$4 sm:$0xff]  }
 0x454   :  { %7127 = vmatpush3.bf16.msra.mxu0 %v7834_v5  ;;  %5932 = vmatprep.subr.bf16.mxu1 %v7837_v6  ;;  %v7897_v5 = vld [vmem:[#allocation10 + $0x404] ss:$28 sps:$4 sm:$0xff]  }
 0x455   :  { %7128 = vmatprep.subr.bf16.mxu0 %v7838_v9  ;;  %v7898_v6 = vld [vmem:[#allocation10 + $0x948] ss:$28 sps:$4 sm:$0xff]   ;;  %v7895_v9 = vld [vmem:[#allocation10 + $0x400] ss:$28 sps:$4 sm:$0xff]  }
 0x457   :  { %5933 = vmatpush1.bf16.msra.mxu1 %v7835_v22  ;;  %v7902_v22 = vld [vmem:[#allocation10 + $0x43c] ss:$28 sps:$4 sm:$0xff]  }
 0x458   :  { %7129 = vmatpush3.bf16.msra.mxu0 %v7839_v12  ;;  %5934 = vmatprep.subr.bf16.mxu1 %v7842_v13  ;;  %v7903_v12 = vld [vmem:[#allocation10 + $0x980] ss:$28 sps:$4 sm:$0xff]   ;;  %v7900_v13 = vld [vmem:[#allocation10 + $0x438] ss:$28 sps:$4 sm:$0xff]  }
 0x459   :  { %7130 = vmatprep.subr.bf16.mxu0 %v7843_v14  ;;  %v7907_v14 = vld [vmem:[#allocation10 + $0x474] ss:$28 sps:$4 sm:$0xff]  }
 0x45b   :  { %5935 = vmatpush1.bf16.msra.mxu1 %v7840_v39  ;;  %v7908_v39 = vld [vmem:[#allocation10 + $0x9b8] ss:$28 sps:$4 sm:$0xff]  }
 0x45c   :  { %7131 = vmatpush3.bf16.msra.mxu0 %v7844_v15  ;;  %5936 = vmatprep.subr.bf16.mxu1 %v7847_v17  ;;  %v7905_v15 = vld [vmem:[#allocation10 + $0x470] ss:$28 sps:$4 sm:$0xff]   ;;  %v7909_v17 = vld [vmem:[#allocation10 + $0x7f8] ss:$28 sps:$4 sm:$0xff]  }
 0x45d   :  { %7138 = vmatprep.subr.bf16.mxu0 %v7848_v18  ;;  %v7912_v18 = vld [vmem:[#allocation10 + $0x4ac] ss:$28 sps:$4 sm:$0xff]  }
 0x45f   :  { %6125 = vmatmul.mubr.bf16.vlgmr.msra.gmra.mrb[24].mxu0 %v8473_v19  ;;  %5937 = vmatpush1.bf16.msra.mxu1 %v7845_v3  ;;  %v7913_v3 = vld [vmem:[#allocation10 + $0x9f0] ss:$28 sps:$4 sm:$0xff]  }
 0x460   :  { %7139 = vmatpush3.bf16.msra.mxu0 %v7849_v4  ;;  %6165 = vmatprep.mubr.bf16.mxu0 %v8477_v23  ;;  %v7910_v4 = vld [vmem:[#allocation10 + $0x4a8] ss:$28 sps:$4 sm:$0xff]  }
 0x461   :  { %5938 = vmatprep.subr.bf16.mxu1 %v7852_v11  ;;  %7140 = vmatprep.subr.bf16.mxu0 %v7853_v20  ;;  %v7914_v11 = vld [vmem:[#allocation10 + $0x830] ss:$28 sps:$4 sm:$0xff]   ;;  %v7917_v20 = vld [vmem:[#allocation10 + $0x4e4] ss:$28 sps:$4 sm:$0xff]  }
 0x463   :  { %5939 = vmatpush1.bf16.msra.mxu1 %v7850_v25  ;;  %v7918_v25 = vld [vmem:[#allocation10 + $0xa28] ss:$28 sps:$4 sm:$0xff]  }
 0x464   :  { %7141 = vmatpush3.bf16.msra.mxu0 %v7854_v26  ;;  %5940 = vmatprep.subr.bf16.mxu1 %v7857_v27  ;;  %v7915_v26 = vld [vmem:[#allocation10 + $0x4e0] ss:$28 sps:$4 sm:$0xff]   ;;  %v7919_v27 = vld [vmem:[#allocation10 + $0x868] ss:$28 sps:$4 sm:$0xff]  }
 0x465   :  { %7142 = vmatprep.subr.bf16.mxu0 %v7858_v29  ;;  %v7922_v29 = vld [vmem:[#allocation10 + $0x51c] ss:$28 sps:$4 sm:$0xff]  }
 0x467   :  { %5941 = vmatpush1.bf16.msra.mxu1 %v7855_v30  ;;  %v7923_v30 = vld [vmem:[#allocation10 + $0xa60] ss:$28 sps:$4 sm:$0xff]  }
 0x468   :  { %7143 = vmatpush3.bf16.msra.mxu0 %v7859_v33  ;;  %5942 = vmatprep.subr.bf16.mxu1 %v7862_v36  ;;  %v7920_v33 = vld [vmem:[#allocation10 + $0x518] ss:$28 sps:$4 sm:$0xff]   ;;  %v7924_v36 = vld [vmem:[#allocation10 + $0x8a0] ss:$28 sps:$4 sm:$0xff]  }
 0x469   :  { %7144 = vmatprep.subr.bf16.mxu0 %v7863_v41  ;;  %v7927_v41 = vld [vmem:[#allocation10 + $0x554] ss:$28 sps:$4 sm:$0xff]  }
 0x46b   :  { %5943 = vmatpush1.bf16.msra.mxu1 %v7860_v42  ;;  %v7928_v42 = vld [vmem:[#allocation10 + $0xc58] ss:$28 sps:$4 sm:$0xff]  }
 0x46c   :  { %7145 = vmatpush3.bf16.msra.mxu0 %v7864_v44  ;;  %5944 = vmatprep.subr.bf16.mxu1 %v7867_v45  ;;  %v7925_v44 = vld [vmem:[#allocation10 + $0x550] ss:$28 sps:$4 sm:$0xff]   ;;  %v7929_v45 = vld [vmem:[#allocation10 + $0xa98] ss:$28 sps:$4 sm:$0xff]  }
 0x46d   :  { %7146 = vmatprep.subr.bf16.mxu0 %v7868_v46  ;;  %v7932_v46 = vld [vmem:[#allocation10 + $0x58c] ss:$28 sps:$4 sm:$0xff]  }
 0x46f   :  { %5945 = vmatpush1.bf16.msra.mxu1 %v7865_v16  ;;  %v7933_v16 = vld [vmem:[#allocation10 + $0xc90] ss:$28 sps:$4 sm:$0xff]  }
 0x470   :  { %7147 = vmatpush3.bf16.msra.mxu0 %v7869_v47  ;;  %5946 = vmatprep.subr.bf16.mxu1 %v7872_v49  ;;  %v7930_v47 = vld [vmem:[#allocation10 + $0x588] ss:$28 sps:$4 sm:$0xff]   ;;  %v7934_v49 = vld [vmem:[#allocation10 + $0xad0] ss:$28 sps:$4 sm:$0xff]  }
 0x471   :  { %7148 = vmatprep.subr.bf16.mxu0 %v7873_v50  ;;  %v7937_v50 = vld [vmem:[#allocation10 + $0x5c4] ss:$28 sps:$4 sm:$0xff]  }
 0x473   :  { %5947 = vmatpush1.bf16.msra.mxu1 %v7870_v51  ;;  %v7938_v51 = vld [vmem:[#allocation10 + $0xcc8] ss:$28 sps:$4 sm:$0xff]  }
 0x474   :  { %7149 = vmatpush3.bf16.msra.mxu0 %v7874_v59  ;;  %5948 = vmatprep.subr.bf16.mxu1 %v7877_v52  ;;  %v7935_v59 = vld [vmem:[#allocation10 + $0x5c0] ss:$28 sps:$4 sm:$0xff]   ;;  %v7939_v52 = vld [vmem:[#allocation10 + $0xb08] ss:$28 sps:$4 sm:$0xff]  }
 0x475   :  { %7150 = vmatprep.subr.bf16.mxu0 %v7878_v53  ;;  %v7942_v53 = vld [vmem:[#allocation10 + $0x5fc] ss:$28 sps:$4 sm:$0xff]  }
 0x477   :  { %5949 = vmatpush1.bf16.msra.mxu1 %v7875_v8  ;;  %v7943_v8 = vld [vmem:[#allocation10 + $0xd00] ss:$28 sps:$4 sm:$0xff]  }
 0x478   :  { %7151 = vmatpush3.bf16.msra.mxu0 %v7879_v55  ;;  %5950 = vmatprep.subr.bf16.mxu1 %v7882_v56  ;;  %v7940_v55 = vld [vmem:[#allocation10 + $0x5f8] ss:$28 sps:$4 sm:$0xff]   ;;  %v7944_v56 = vld [vmem:[#allocation10 + $0xb40] ss:$28 sps:$4 sm:$0xff]  }
 0x479   :  { %7152 = vmatprep.subr.bf16.mxu0 %v7883_v57  ;;  %v7947_v57 = vld [vmem:[#allocation10 + $0x634] ss:$28 sps:$4 sm:$0xff]  }
 0x47b   :  { %5951 = vmatpush1.bf16.msra.mxu1 %v7880_v58  ;;  %v7948_v58 = vld [vmem:[#allocation10 + $0xd38] ss:$28 sps:$4 sm:$0xff]  }
 0x47c   :  { %7153 = vmatpush3.bf16.msra.mxu0 %v7884_v61  ;;  %5963 = vmatprep.subr.bf16.mxu1 %v7887_v62  ;;  %v7945_v61 = vld [vmem:[#allocation10 + $0x630] ss:$28 sps:$4 sm:$0xff]   ;;  %v7949_v62 = vld [vmem:[#allocation10 + $0xb78] ss:$28 sps:$4 sm:$0xff]  }
 0x47d   :  { %7160 = vmatprep.subr.bf16.mxu0 %v7888_v63  ;;  %v7952_v63 = vld [vmem:[#allocation10 + $0x66c] ss:$28 sps:$4 sm:$0xff]  }
 0x47e   :  { %5953 = vmatmul.mubr.bf16.vlgmr.msra.gmra.mrb[12].mxu1 %v8473_v19  ;;  %v7899_v19 = vld [vmem:[#allocation10 + $0x788] ss:$28 sps:$4 sm:$0xff]  }
 0x47f   :  { %6166 = vmatmul.mubr.bf16.vlgmr.msra.gmra.mrb[28].mxu0 %v8485_v34  ;;  %5964 = vmatpush1.bf16.msra.mxu1 %v7885_v7  ;;  %v7953_v7 = vld [vmem:[#allocation10 + $0xd70] ss:$28 sps:$4 sm:$0xff]  }
 0x480   :  { %5995 = vmatprep.mubr.bf16.mxu1 %v8477_v23  ;;  %7161 = vmatpush3.bf16.msra.mxu0 %v7889_v24  ;;  %v7904_v23 = vld [vmem:[#allocation10 + $0x7c0] ss:$28 sps:$4 sm:$0xff]   ;;  %v7950_v24 = vld [vmem:[#allocation10 + $0x668] ss:$28 sps:$4 sm:$0xff]  }
 0x481   :  { %6206 = vmatprep.mubr.bf16.mxu0 %v8505_v2  ;;  %5965 = vmatprep.subr.bf16.mxu1 %v7892_v60  ;;  %v7954_v60 = vld [vmem:[#allocation10 + $0xbb0] ss:$28 sps:$4 sm:$0xff]  }
 0x482   :  { %7162 = vmatprep.subr.bf16.mxu0 %v7893_v0  ;;  %v7957_v0 = vld [vmem:[#allocation10 + $0x6a4] ss:$28 sps:$4 sm:$0xff]  }
 0x483   :  { %5966 = vmatpush1.bf16.msra.mxu1 %v7890_v1  ;;  %v7958_v1 = vld [vmem:[#allocation10 + $0xda8] ss:$28 sps:$4 sm:$0xff]  }
 0x484   :  { %7163 = vmatpush3.bf16.msra.mxu0 %v7894_v54  ;;  %5967 = vmatprep.subr.bf16.mxu1 %v7897_v5  ;;  %v7955_v54 = vld [vmem:[#allocation10 + $0x6a0] ss:$28 sps:$4 sm:$0xff]   ;;  %v7959_v5 = vld [vmem:[#allocation10 + $0xbe8] ss:$28 sps:$4 sm:$0xff]  }
 0x485   :  { %7164 = vmatprep.subr.bf16.mxu0 %v7898_v6  ;;  %v7962_v6 = vld [vmem:[#allocation10 + $0x6dc] ss:$28 sps:$4 sm:$0xff]  }
 0x487   :  { %5968 = vmatpush1.bf16.msra.mxu1 %v7895_v9  ;;  %v7963_v9 = vld [vmem:[#allocation10 + $0xde0] ss:$28 sps:$4 sm:$0xff]  }
 0x488   :  { %7165 = vmatpush3.bf16.msra.mxu0 %v7899_v19  ;;  %5969 = vmatprep.subr.bf16.mxu1 %v7902_v22  ;;  %v7960_v19 = vld [vmem:[#allocation10 + $0x6d8] ss:$28 sps:$4 sm:$0xff]   ;;  %v7964_v22 = vld [vmem:[#allocation10 + $0xc20] ss:$28 sps:$4 sm:$0xff]  }
 0x489   :  { %7166 = vmatprep.subr.bf16.mxu0 %v7903_v12  ;;  %v7967_v12 = vld [vmem:[#allocation10 + $0x714] ss:$28 sps:$4 sm:$0xff]  }
 0x48b   :  { %5970 = vmatpush1.bf16.msra.mxu1 %v7900_v13  ;;  %v7965_v13 = vld [vmem:[#allocation10 + $0x710] ss:$28 sps:$4 sm:$0xff]  }
 0x48c   :  { %7167 = vmatpush3.bf16.msra.mxu0 %v7904_v23  ;;  %5971 = vmatprep.subr.bf16.mxu1 %v7907_v14  ;;  %v7970_v23 = vld [vmem:[#allocation10 + $0x74c] ss:$28 sps:$4 sm:$0xff]  }
 0x48d   :  { %7168 = vmatprep.subr.bf16.mxu0 %v7908_v39  ;;  %v7968_v14 = vld [vmem:[#allocation10 + $0x748] ss:$28 sps:$4 sm:$0xff]  }
 0x48e   :  { %v7973_v39 = vld [vmem:[#allocation10 + $0x784] ss:$28 sps:$4 sm:$0xff]  }
 0x48f   :  { %5972 = vmatpush1.bf16.msra.mxu1 %v7905_v15  ;;  %v7971_v15 = vld [vmem:[#allocation10 + $0x780] ss:$28 sps:$4 sm:$0xff]  }
 0x490   :  { %7169 = vmatpush3.bf16.msra.mxu0 %v7909_v17  ;;  %5973 = vmatprep.subr.bf16.mxu1 %v7912_v18  ;;  %v7976_v17 = vld [vmem:[#allocation10 + $0x7bc] ss:$28 sps:$4 sm:$0xff]  }
 0x491   :  { %7170 = vmatprep.subr.bf16.mxu0 %v7913_v3  ;;  %v7974_v18 = vld [vmem:[#allocation10 + $0x7b8] ss:$28 sps:$4 sm:$0xff]  }
 0x492   :  { %v7979_v3 = vld [vmem:[#allocation10 + $0x7f4] ss:$28 sps:$4 sm:$0xff]  }
 0x493   :  { %5974 = vmatpush1.bf16.msra.mxu1 %v7910_v4  ;;  %v7977_v4 = vld [vmem:[#allocation10 + $0x7f0] ss:$28 sps:$4 sm:$0xff]  }
 0x494   :  { %7171 = vmatpush3.bf16.msra.mxu0 %v7914_v11  ;;  %5975 = vmatprep.subr.bf16.mxu1 %v7917_v20  ;;  %v7980_v11 = vld [vmem:[#allocation10 + $0x828] ss:$28 sps:$4 sm:$0xff]  }
 0x495   :  { %7172 = vmatprep.subr.bf16.mxu0 %v7918_v25  ;;  %v7985_v20 = vld [vmem:[#allocation10 + $0x864] ss:$28 sps:$4 sm:$0xff]   ;;  %v7988_v25 = vld [vmem:[#allocation10 + $0x89c] ss:$28 sps:$4 sm:$0xff]  }
 0x497   :  { %5976 = vmatpush1.bf16.msra.mxu1 %v7915_v26  ;;  %v7986_v26 = vld [vmem:[#allocation10 + $0x898] ss:$28 sps:$4 sm:$0xff]  }
 0x498   :  { %7173 = vmatpush3.bf16.msra.mxu0 %v7919_v27  ;;  %5977 = vmatprep.subr.bf16.mxu1 %v7922_v29  ;;  %v7991_v27 = vld [vmem:[#allocation10 + $0x8d4] ss:$28 sps:$4 sm:$0xff]  }
 0x499   :  { %7174 = vmatprep.subr.bf16.mxu0 %v7923_v30  ;;  %v7989_v29 = vld [vmem:[#allocation10 + $0x8d0] ss:$28 sps:$4 sm:$0xff]  }
 0x49a   :  { %v7994_v30 = vld [vmem:[#allocation10 + $0x90c] ss:$28 sps:$4 sm:$0xff]  }
 0x49b   :  { %5978 = vmatpush1.bf16.msra.mxu1 %v7920_v33  ;;  %v7992_v33 = vld [vmem:[#allocation10 + $0x908] ss:$28 sps:$4 sm:$0xff]  }
 0x49c   :  { %7175 = vmatpush3.bf16.msra.mxu0 %v7924_v36  ;;  %5979 = vmatprep.subr.bf16.mxu1 %v7927_v41  ;;  %v7997_v36 = vld [vmem:[#allocation10 + $0x944] ss:$28 sps:$4 sm:$0xff]  }
 0x49d   :  { %7182 = vmatprep.subr.bf16.mxu0 %v7928_v42  ;;  %v7995_v41 = vld [vmem:[#allocation10 + $0x940] ss:$28 sps:$4 sm:$0xff]  }
 0x49e   :  { %v8000_v42 = vld [vmem:[#allocation10 + $0x97c] ss:$28 sps:$4 sm:$0xff]  }
 0x49f   :  { %6207 = vmatmul.mubr.bf16.vlgmr.msra.gmra.mrb[32].mxu0 %v8507_v10  ;;  %5980 = vmatpush1.bf16.msra.mxu1 %v7925_v44  ;;  %v7998_v44 = vld [vmem:[#allocation10 + $0x978] ss:$28 sps:$4 sm:$0xff]  }
 0x4a0   :  { %7183 = vmatpush3.bf16.msra.mxu0 %v7929_v45  ;;  %6247 = vmatprep.mubr.bf16.mxu0 %v8511_v21  ;;  %v8003_v45 = vld [vmem:[#allocation10 + $0x9b4] ss:$28 sps:$4 sm:$0xff]  }
 0x4a1   :  { %5981 = vmatprep.subr.bf16.mxu1 %v7932_v46  ;;  %7184 = vmatprep.subr.bf16.mxu0 %v7933_v16  ;;  %v8001_v46 = vld [vmem:[#allocation10 + $0x9b0] ss:$28 sps:$4 sm:$0xff]  }
 0x4a2   :  { %v8006_v16 = vld [vmem:[#allocation10 + $0x9ec] ss:$28 sps:$4 sm:$0xff]  }
 0x4a3   :  { %5982 = vmatpush1.bf16.msra.mxu1 %v7930_v47  ;;  %v8004_v47 = vld [vmem:[#allocation10 + $0x9e8] ss:$28 sps:$4 sm:$0xff]  }
 0x4a4   :  { %7185 = vmatpush3.bf16.msra.mxu0 %v7934_v49  ;;  %5983 = vmatprep.subr.bf16.mxu1 %v7937_v50  ;;  %v8009_v49 = vld [vmem:[#allocation10 + $0xa24] ss:$28 sps:$4 sm:$0xff]  }
 0x4a5   :  { %7186 = vmatprep.subr.bf16.mxu0 %v7938_v51  ;;  %v8007_v50 = vld [vmem:[#allocation10 + $0xa20] ss:$28 sps:$4 sm:$0xff]  }
 0x4a6   :  { %v8012_v51 = vld [vmem:[#allocation10 + $0xa5c] ss:$28 sps:$4 sm:$0xff]  }
 0x4a7   :  { %5984 = vmatpush1.bf16.msra.mxu1 %v7935_v59  ;;  %v8010_v59 = vld [vmem:[#allocation10 + $0xa58] ss:$28 sps:$4 sm:$0xff]  }
 0x4a8   :  { %7187 = vmatpush3.bf16.msra.mxu0 %v7939_v52  ;;  %5985 = vmatprep.subr.bf16.mxu1 %v7942_v53  ;;  %v8015_v52 = vld [vmem:[#allocation10 + $0xa94] ss:$28 sps:$4 sm:$0xff]  }
 0x4a9   :  { %7188 = vmatprep.subr.bf16.mxu0 %v7943_v8  ;;  %v8013_v53 = vld [vmem:[#allocation10 + $0xa90] ss:$28 sps:$4 sm:$0xff]  }
 0x4aa   :  { %v8018_v8 = vld [vmem:[#allocation10 + $0xacc] ss:$28 sps:$4 sm:$0xff]  }
 0x4ab   :  { %5986 = vmatpush1.bf16.msra.mxu1 %v7940_v55  ;;  %v8016_v55 = vld [vmem:[#allocation10 + $0xac8] ss:$28 sps:$4 sm:$0xff]  }
 0x4ac   :  { %7189 = vmatpush3.bf16.msra.mxu0 %v7944_v56  ;;  %5987 = vmatprep.subr.bf16.mxu1 %v7947_v57  ;;  %v8021_v56 = vld [vmem:[#allocation10 + $0xb04] ss:$28 sps:$4 sm:$0xff]  }
 0x4ad   :  { %7190 = vmatprep.subr.bf16.mxu0 %v7948_v58  ;;  %v8019_v57 = vld [vmem:[#allocation10 + $0xb00] ss:$28 sps:$4 sm:$0xff]  }
 0x4ae   :  { %v8024_v58 = vld [vmem:[#allocation10 + $0xb3c] ss:$28 sps:$4 sm:$0xff]  }
 0x4af   :  { %5988 = vmatpush1.bf16.msra.mxu1 %v7945_v61  ;;  %v8022_v61 = vld [vmem:[#allocation10 + $0xb38] ss:$28 sps:$4 sm:$0xff]  }
 0x4b0   :  { %7191 = vmatpush3.bf16.msra.mxu0 %v7949_v62  ;;  %5989 = vmatprep.subr.bf16.mxu1 %v7952_v63  ;;  %v8027_v62 = vld [vmem:[#allocation10 + $0xb74] ss:$28 sps:$4 sm:$0xff]  }
 0x4b1   :  { %7192 = vmatprep.subr.bf16.mxu0 %v7953_v7  ;;  %v8025_v63 = vld [vmem:[#allocation10 + $0xb70] ss:$28 sps:$4 sm:$0xff]  }
 0x4b2   :  { %v8030_v7 = vld [vmem:[#allocation10 + $0xbac] ss:$28 sps:$4 sm:$0xff]  }
 0x4b3   :  { %5990 = vmatpush1.bf16.msra.mxu1 %v7950_v24  ;;  %v8538_v24 = vld [vmem:[#allocation12] sm:$0xff] }
 0x4b4   :  { %7193 = vmatpush3.bf16.msra.mxu0 %v7954_v60  ;;  %5991 = vmatprep.subr.bf16.mxu1 %v7957_v0  ;;  %v3248_v60 = vrot.slane %v8538_v24, %v8434_v35  ;;  %v8033_v0 = vld [vmem:[#allocation10 + $0xbe4] ss:$28 sps:$4 sm:$0xff]  }
 0x4b5   :  { %7194 = vmatprep.subr.bf16.mxu0 %v7958_v1 }
 0x4b7   :  { %5992 = vmatpush1.bf16.msra.mxu1 %v7955_v54 }
 0x4b8   :  { %7195 = vmatpush3.bf16.msra.mxu0 %v7959_v5  ;;  %5993 = vmatprep.subr.bf16.mxu1 %v7962_v6  ;;  %v3244_v5 = vrot.slane %v8538_v24, %v8413_v40  ;;  %v3252_v6 = vrot.slane %v8538_v24, %v8437_v43 }
 0x4b9   :  { %7196 = vmatprep.subr.bf16.mxu0 %v7963_v9 }
 0x4bb   :  { %5994 = vmatpush1.bf16.msra.mxu1 %v7960_v19 }
 0x4bc   :  { %7197 = vmatpush3.bf16.msra.mxu0 %v7964_v22  ;;  %6006 = vmatprep.subr.bf16.mxu1 %v7967_v12 }
 0x4be   :  { %5996 = vmatmul.mubr.bf16.vlgmr.msra.gmra.mrb[12].mxu1 %v8485_v34  ;;  %v7982_v34 = vld [vmem:[#allocation10 + $0x82c] ss:$28 sps:$4 sm:$0xff]  }
 0x4bf   :  { %6248 = vmatmul.mubr.bf16.vlgmr.msra.gmra.mrb[36].mxu0 %v8519_v48  ;;  %6007 = vmatpush1.bf16.msra.mxu1 %v7965_v13  ;;  %v8031_v13 = vld [vmem:[#allocation10 + $0xbe0] ss:$28 sps:$4 sm:$0xff]  }
 0x4c0   :  { %6038 = vmatprep.mubr.bf16.mxu1 %v8505_v2  ;;  %6008 = vmatprep.subr.bf16.mxu1 %v7970_v23  ;;  %v7983_v2 = vld [vmem:[#allocation10 + $0x860] ss:$28 sps:$4 sm:$0xff]  }
 0x4c3   :  { %6009 = vmatpush1.bf16.msra.mxu1 %v7968_v14 }
 0x4c4   :  { %6010 = vmatprep.subr.bf16.mxu1 %v7973_v39 }
 0x4c7   :  { %6011 = vmatpush1.bf16.msra.mxu1 %v7971_v15 }
 0x4c8   :  { %6012 = vmatprep.subr.bf16.mxu1 %v7976_v17  ;;  %v8036_v17 = vld [vmem:[#allocation10 + $0xc1c] ss:$28 sps:$4 sm:$0xff]  }
 0x4cb   :  { %6013 = vmatpush1.bf16.msra.mxu1 %v7974_v18 }
 0x4cc   :  { %6014 = vmatprep.subr.bf16.mxu1 %v7979_v3 }
 0x4cf   :  { %6015 = vmatpush1.bf16.msra.mxu1 %v7977_v4 }
 0x4d0   :  { %6016 = vmatprep.subr.bf16.mxu1 %v7982_v34 }
 0x4d3   :  { %6017 = vmatpush1.bf16.msra.mxu1 %v7980_v11 }
 0x4d4   :  { %6018 = vmatprep.subr.bf16.mxu1 %v7985_v20 }
 0x4d7   :  { %6019 = vmatpush1.bf16.msra.mxu1 %v7983_v2  ;;  %v8034_v2 = vld [vmem:[#allocation10 + $0xc18] ss:$28 sps:$4 sm:$0xff]  }
 0x4d8   :  { %6020 = vmatprep.subr.bf16.mxu1 %v7988_v25  ;;  %v8039_v25 = vld [vmem:[#allocation10 + $0xc54] ss:$28 sps:$4 sm:$0xff]  }
 0x4db   :  { %6021 = vmatpush1.bf16.msra.mxu1 %v7986_v26  ;;  %v8037_v26 = vld [vmem:[#allocation10 + $0xc50] ss:$28 sps:$4 sm:$0xff]  }
 0x4dc   :  { %6022 = vmatprep.subr.bf16.mxu1 %v7991_v27  ;;  %v8042_v27 = vld [vmem:[#allocation10 + $0xc8c] ss:$28 sps:$4 sm:$0xff]  }
 0x4df   :  { %6023 = vmatpush1.bf16.msra.mxu1 %v7989_v29  ;;  %v8040_v29 = vld [vmem:[#allocation10 + $0xc88] ss:$28 sps:$4 sm:$0xff]  }
 0x4e0   :  { %6024 = vmatprep.subr.bf16.mxu1 %v7994_v30  ;;  %v8045_v30 = vld [vmem:[#allocation10 + $0xcc4] ss:$28 sps:$4 sm:$0xff]  }
 0x4e3   :  { %6025 = vmatpush1.bf16.msra.mxu1 %v7992_v33 }
 0x4e4   :  { %6026 = vmatprep.subr.bf16.mxu1 %v7997_v36  ;;  %v8043_v36 = vld [vmem:[#allocation10 + $0xcc0] ss:$28 sps:$4 sm:$0xff]  }
 0x4e7   :  { %6027 = vmatpush1.bf16.msra.mxu1 %v7995_v41 }
 0x4e8   :  { %6028 = vmatprep.subr.bf16.mxu1 %v8000_v42  ;;  %v8048_v42 = vld [vmem:[#allocation10 + $0xcfc] ss:$28 sps:$4 sm:$0xff]  }
 0x4eb   :  { %6029 = vmatpush1.bf16.msra.mxu1 %v7998_v44 }
 0x4ec   :  { %6030 = vmatprep.subr.bf16.mxu1 %v8003_v45 }
 0x4ef   :  { %6031 = vmatpush1.bf16.msra.mxu1 %v8001_v46 }
 0x4f0   :  { %6032 = vmatprep.subr.bf16.mxu1 %v8006_v16 }
 0x4f3   :  { %6033 = vmatpush1.bf16.msra.mxu1 %v8004_v47 }
 0x4f4   :  { %6034 = vmatprep.subr.bf16.mxu1 %v8009_v49 }
 0x4f7   :  { %6035 = vmatpush1.bf16.msra.mxu1 %v8007_v50  ;;  %v8046_v50 = vld [vmem:[#allocation10 + $0xcf8] ss:$28 sps:$4 sm:$0xff]  }
 0x4f8   :  { %6036 = vmatprep.subr.bf16.mxu1 %v8012_v51  ;;  %v8051_v51 = vld [vmem:[#allocation10 + $0xd34] ss:$28 sps:$4 sm:$0xff]  }
 0x4fb   :  { %6037 = vmatpush1.bf16.msra.mxu1 %v8010_v59  ;;  %v8049_v59 = vld [vmem:[#allocation10 + $0xd30] ss:$28 sps:$4 sm:$0xff]  }
 0x4fc   :  { %6049 = vmatprep.subr.bf16.mxu1 %v8015_v52  ;;  %v8054_v52 = vld [vmem:[#allocation10 + $0xd6c] ss:$28 sps:$4 sm:$0xff]  }
 0x4fe   :  { %6039 = vmatmul.mubr.bf16.vlgmr.msra.gmra.mrb[12].mxu1 %v8507_v10  ;;  %v8028_v10 = vld [vmem:[#allocation10 + $0xba8] ss:$28 sps:$4 sm:$0xff]  }
 0x4ff   :  { %6050 = vmatpush1.bf16.msra.mxu1 %v8013_v53  ;;  %6081 = vmatprep.mubr.bf16.mxu1 %v8511_v21  ;;  %v3240_v21 = vrot.slane %v8538_v24, %v8408_v38  ;;  %v8052_v53 = vld [vmem:[#allocation10 + $0xd68] ss:$28 sps:$4 sm:$0xff]  }
 0x500   :  { %6051 = vmatprep.subr.bf16.mxu1 %v8018_v8  ;;  %v8057_v8 = vld [vmem:[#allocation10 + $0xda4] ss:$28 sps:$4 sm:$0xff]  }
 0x503   :  { %6052 = vmatpush1.bf16.msra.mxu1 %v8016_v55 }
 0x504   :  { %6053 = vmatprep.subr.bf16.mxu1 %v8021_v56 }
 0x507   :  { %6054 = vmatpush1.bf16.msra.mxu1 %v8019_v57  ;;  %v8055_v57 = vld [vmem:[#allocation10 + $0xda0] ss:$28 sps:$4 sm:$0xff]  }
 0x508   :  { %6055 = vmatprep.subr.bf16.mxu1 %v8024_v58 }
 0x50b   :  { %6056 = vmatpush1.bf16.msra.mxu1 %v8022_v61 }
 0x50c   :  { %6057 = vmatprep.subr.bf16.mxu1 %v8027_v62  ;;  %v8060_v62 = vld [vmem:[#allocation10 + $0xddc] ss:$28 sps:$4 sm:$0xff]  }
 0x50f   :  { %6058 = vmatpush1.bf16.msra.mxu1 %v8025_v63 }
 0x510   :  { %6059 = vmatprep.subr.bf16.mxu1 %v8030_v7 }
 0x511   :  { %v5739_v1 = vpop.f32.mrb[8].mxu1  ;;  %v5911_v54 = vpop.f32.mrb[20].mxu0 }
 0x512   :  { %v5741_v9 = vpop.f32.mrb[9].mxu1  ;;  %v5913_v19 = vpop.f32.mrb[21].mxu0  ;;  %v7220_v38 = vadd.f32 %v5739_v1, %v3240_v21  ;;  %v7224_v23 = vadd.f32 %v5911_v54, %v3248_v60 }
 0x513   :  { %v5743_v22 = vpop.f32.mrb[10].mxu1  ;;  %v5915_v12 = vpop.f32.mrb[22].mxu0  ;;  %6060 = vmatpush1.bf16.msra.mxu1 %v8028_v10  ;;  %v7221_v18 = vadd.f32 %v5741_v9, %v3244_v5  ;;  %v7225_v3 = vadd.f32 %v5913_v19, %v3252_v6  ;;  %v8058_v10 = vld [vmem:[#allocation10 + $0xdd8] ss:$28 sps:$4 sm:$0xff]  }
 0x514   :  { %v7222_v14 = vadd.f32 %v5743_v22, %v3240_v21  ;;  %v7226_v35 = vadd.f32 %v5915_v12, %v3248_v60  ;;  %v5745_v39 = vpop.f32.mrb[11].mxu1  ;;  %v5917_v15 = vpop.f32.mrb[23].mxu0  ;;  %6061 = vmatprep.subr.bf16.mxu1 %v8033_v0  ;;  %v3264_v21 = vrot.slane %v8538_v24, %v1061_v31 }
 0x515   :  { %v7223_v40 = vadd.f32 %v5745_v39, %v3244_v5  ;;  %v7227_v4 = vadd.f32 %v5917_v15, %v3252_v6 }
 0x516   :  { %v6256_v34 = vpack.c.bf16 %v7222_v14, %v7220_v38  ;;  %v6258_v43 = vpack.c.bf16 %v7226_v35, %v7224_v23 }
 0x517   :  { %v6257_v11 = vpack.c.bf16 %v7223_v40, %v7221_v18  ;;  %v6259_v20 = vpack.c.bf16 %v7227_v4, %v7225_v3  ;;  %6062 = vmatpush1.bf16.msra.mxu1 %v8031_v13 }
 0x518   :  { %8061 = vtanh.bf16 %v6256_v34  ;;  %6063 = vmatprep.subr.bf16.mxu1 %v8036_v17 }
 0x519   :  { %8063 = vtanh.bf16 %v6258_v43 }
 0x51a   :  { %8065 = vtanh.bf16 %v6257_v11 }
 0x51b   :  { %8067 = vtanh.bf16 %v6259_v20  ;;  %6064 = vmatpush1.bf16.msra.mxu1 %v8034_v2 }
 0x51c   :  { %6065 = vmatprep.subr.bf16.mxu1 %v8039_v25 }
 0x51f   :  { %6066 = vmatpush1.bf16.msra.mxu1 %v8037_v26  ;;  %v3256_v26 = vrot.slane %v8538_v24, %v1053_v28 }
 0x520   :  { %6067 = vmatprep.subr.bf16.mxu1 %v8042_v27 }
 0x523   :  { %v8062_v33 = vpop.eup %8061  ;;  %6068 = vmatpush1.bf16.msra.mxu1 %v8040_v29  ;;  %v3260_v29 = vrot.slane %v8538_v24, %v1057_v32 }
 0x524   :  { %v8064_v41 = vpop.eup %8063  ;;  %6069 = vmatprep.subr.bf16.mxu1 %v8045_v30 }
 0x525   :  { %v8066_v44 = vpop.eup %8065 }
 0x526   :  { %v8068_v45 = vpop.eup %8067  ;;  %v7108_v46 = vcombine.low %v8062_v33, %v8066_v44  ;;  %v7112_v16 = vcombine.high %v8062_v33, %v8066_v44 }
 0x527   :  { %v7109_v47 = vcombine.low %v8064_v41, %v8068_v45  ;;  %v7113_v49 = vcombine.high %v8064_v41, %v8068_v45  ;;  %6070 = vmatpush1.bf16.msra.mxu1 %v8043_v36 }
 0x528   :  { %6307 = vst [vmem:[%s8590_s8] sm:$0xff] %v7108_v46  ;;  %6311 = vst [vmem:[%s8590_s8 + $0x1c] sm:$0xff] %v7112_v16  ;;  %6071 = vmatprep.subr.bf16.mxu1 %v8048_v42 }
 0x529   :  { %6308 = vst [vmem:[%s8590_s8 + $0x8] sm:$0xff] %v7109_v47  ;;  %6312 = vst [vmem:[%s8590_s8 + $0x24] sm:$0xff] %v7113_v49 }
 0x52b   :  { %6072 = vmatpush1.bf16.msra.mxu1 %v8046_v50 }
 0x52c   :  { %6073 = vmatprep.subr.bf16.mxu1 %v8051_v51 }
 0x52f   :  { %6074 = vmatpush1.bf16.msra.mxu1 %v8049_v59 }
 0x530   :  { %6075 = vmatprep.subr.bf16.mxu1 %v8054_v52 }
 0x532   :  { %v7132_v55 = vpop.f32.mrb[24].mxu0 }
 0x533   :  { %v7133_v56 = vpop.f32.mrb[25].mxu0  ;;  %6076 = vmatpush1.bf16.msra.mxu1 %v8052_v53 }
 0x534   :  { %v7134_v58 = vadd.f32 %v7133_v56, %v7132_v55  ;;  %v7135_v61 = vpop.f32.mrb[26].mxu0  ;;  %6077 = vmatprep.subr.bf16.mxu1 %v8057_v8 }
 0x535   :  { %v7136_v63 = vpop.f32.mrb[27].mxu0 }
 0x536   :  { %v7137_v7 = vadd.f32 %v7136_v63, %v7135_v61  ;;  %v6127_v1 = vadd.f32 %v7134_v58, %v3264_v21 }
 0x537   :  { %6078 = vmatpush1.bf16.msra.mxu1 %v8055_v57 }
 0x538   :  { %6079 = vmatprep.subr.bf16.mxu1 %v8060_v62  ;;  %v6130_v9 = vadd.f32 %v7137_v7, %v3264_v21 }
 0x53b   :  { %6080 = vmatpush1.bf16.msra.mxu1 %v8058_v10 }
 0x53e   :  { %6082 = vmatmul.mubr.bf16.vlgmr.msra.gmra.mrb[12].mxu1 %v8519_v48 }
 0x552   :  { %v7154_v60 = vpop.f32.mrb[28].mxu0 }
 0x553   :  { %v7155_v0 = vpop.f32.mrb[29].mxu0 }
 0x554   :  { %v7156_v54 = vadd.f32 %v7155_v0, %v7154_v60  ;;  %v7157_v5 = vpop.f32.mrb[30].mxu0 }
 0x555   :  { %v7158_v6 = vpop.f32.mrb[31].mxu0 }
 0x556   :  { %v6168_v19 = vadd.f32 %v7156_v54, %v6127_v1  ;;  %v7159_v22 = vadd.f32 %v7158_v6, %v7157_v5 }
 0x558   :  { %v6171_v12 = vadd.f32 %v7159_v22, %v6130_v9 }
 0x572   :  { %v7176_v13 = vpop.f32.mrb[32].mxu0 }
 0x573   :  { %v7177_v38 = vpop.f32.mrb[33].mxu0 }
 0x574   :  { %v7178_v23 = vadd.f32 %v7177_v38, %v7176_v13  ;;  %v7179_v14 = vpop.f32.mrb[34].mxu0 }
 0x575   :  { %v7180_v35 = vpop.f32.mrb[35].mxu0 }
 0x576   :  { %v6209_v48 = vadd.f32 %v7178_v23, %v6168_v19  ;;  %v7181_v39 = vadd.f32 %v7180_v35, %v7179_v14 }
 0x578   :  { %v6212_v15 = vadd.f32 %v7181_v39, %v6171_v12 }
 0x592   :  { %v7198_v17 = vpop.f32.mrb[36].mxu0 }
 0x593   :  { %v7199_v31 = vpop.f32.mrb[37].mxu0 }
 0x594   :  { %v7200_v18 = vadd.f32 %v7199_v31, %v7198_v17  ;;  %v7201_v3 = vpop.f32.mrb[38].mxu0 }
 0x595   :  { %v7202_v40 = vpop.f32.mrb[39].mxu0 }
 0x596   :  { %v6250_v4 = vadd.f32 %v7200_v18, %v6209_v48  ;;  %v7203_v34 = vadd.f32 %v7202_v40, %v7201_v3 }
 0x598   :  { %v6253_v43 = vadd.f32 %v7203_v34, %v6212_v15 }
 0x59a   :  { %v6262_v11 = vpack.c.bf16 %v6253_v43, %v6250_v4 }
 0x59c   :  { %8069 = vtanh.bf16 %v6262_v11 }
 0x5a7   :  { %v8070_v20 = vpop.eup %8069 }
 0x5a8   :  { %v7111_v2 = vcombine.low %v8070_v20, %v8070_v20  ;;  %v7115_v25 = vcombine.high %v8070_v20, %v8070_v20 }
 0x5aa   :  { %6310 = vst [vmem:[%s8590_s8 + $0x18] sm:$0xf] %v7111_v2  ;;  %6314 = vst [vmem:[%s8590_s8 + $0x34] sm:$0xf] %v7115_v25 }
 0x611   :  { %v6083_v27 = vpop.f32.mrb[12].mxu1 }
 0x612   :  { %v6085_v30 = vpop.f32.mrb[13].mxu1  ;;  %v7228_v36 = vadd.f32 %v6083_v27, %v3256_v26 }
 0x613   :  { %v6087_v33 = vpop.f32.mrb[14].mxu1  ;;  %v7229_v44 = vadd.f32 %v6085_v30, %v3260_v29 }
 0x614   :  { %v7230_v41 = vadd.f32 %v6087_v33, %v3256_v26  ;;  %v6089_v42 = vpop.f32.mrb[15].mxu1 }
 0x615   :  { %v7231_v45 = vadd.f32 %v6089_v42, %v3260_v29 }
 0x616   :  { %v6260_v46 = vpack.c.bf16 %v7230_v41, %v7228_v36 }
 0x617   :  { %v6261_v16 = vpack.c.bf16 %v7231_v45, %v7229_v44 }
 0x618   :  { %8071 = vtanh.bf16 %v6260_v46 }
 0x619   :  { %8073 = vtanh.bf16 %v6261_v16 }
 0x623   :  { %v8072_v47 = vpop.eup %8071 }
 0x624   :  { %v8074_v49 = vpop.eup %8073 }
 0x625   :  { %v7110_v50 = vcombine.low %v8072_v47, %v8074_v49  ;;  %v7114_v28 = vcombine.high %v8072_v47, %v8074_v49 }
 0x627   :  { %6309 = vst [vmem:[%s8590_s8 + $0x10] sm:$0xff] %v7110_v50  ;;  %6313 = vst [vmem:[%s8590_s8 + $0x2c] sm:$0xff] %v7114_v28 }
 0x628   :  { %6319 = vsyncpa [#allocation3], 1 }
 0x629   :  { %6320 = vsyncpa [#allocation5], 1 }
 0x62a   :  { %6321 = vsyncpa [#allocation8], 1 }
 0x62b   :  { %6322 = vsyncpa [#allocation11], 1 }

</bundles_post_ra>
